<compile_context>
chip_gen: v7x
topology: tpu7x:2x2x1
jax: 0.10.0
libtpu: 0.0.40
codegen_flags: <defaults>
</compile_context>

<pallas_src>
import math
from functools import partial

import numpy as np
import jax
import jax.numpy as jnp
from jax import lax
from jax.experimental import pallas as pl
from jax.experimental.pallas import tpu as pltpu

_LANE = 128        # pad all conv channel dims to multiples of this (lane alignment)
_LOGIT_PAD = 128   # lane-dense padded width for the 10-wide logits
_FC_ROWS = 8       # classifier runs on a full sublane tile of replicated rows


def _round_up(v, m):
    return ((v + m - 1) // m) * m


# ------------------------------ fused kernel ------------------------------- #

def _shift_rows(a, s):
    """out[r] = a[(r + s) mod M] for a static integer s (sublane rotation, XLU)."""
    if s == 0:
        return a
    return pltpu.roll(a, shift=(-s) % a.shape[0], axis=0)


def _make_fused_kernel(plan, num_fc):
    """Build the fused VGG kernel for a static `plan`.

    plan items (static):
      ("conv", Wp, has_mask) : 3x3/pad=1 conv + bias + ReLU -> consumes (w9, bias[, mask])
      ("pool", Wp)           : 2x2 max-pool (+ padding-ring rebuild, or -- for the
                               final pool -- the fused flatten) -> consumes (selection,)
    followed by `num_fc` (weight, bias) pairs for the classifier.

    Per-image activation layout: 2-D (rows, channels) with row = (h+1)*(W+2)+(w+1),
    i.e. an explicit zero padding ring is stored, so a conv tap (dh, dw) is a
    sublane roll by dh*(W+2)+dw and the whole 3x3 conv is a single
    (Mp, 9*Cin) x (9*Cin, Cout) MXU matmul.
    """

    def kernel(*refs):
        out_ref = refs[-1]
        it = iter(refs[:-1])

        act = next(it)[0]                                    # (Mp, Cin), bf16 input

        for op in plan:
            if op[0] == "conv":
                _, wp, has_mask = op
                w_ref, b_ref = next(it), next(it)
                mask_ref = next(it) if has_mask else None
                a32 = act.astype(jnp.float32)
                # im2col: nine sublane rolls (XLU), lane-concat of 128-aligned
                # pieces, ONE bf16 cast, ONE MXU matmul with K = 9*Cin.
                cols = jnp.concatenate(
                    [_shift_rows(a32, dh * wp + dw)
                     for dh in (-1, 0, 1) for dw in (-1, 0, 1)], axis=1)
                acc = jnp.dot(cols.astype(jnp.bfloat16), w_ref[...],
                              preferred_element_type=jnp.float32)
                act = jnp.maximum(acc + b_ref[...], 0.0)     # bias + ReLU, f32
                if mask_ref is not None:                     # re-zero the ring only
                    act = act * mask_ref[...]                # when next op is a conv
            else:                                            # "pool"
                _, wp = op
                s_ref = next(it)
                pooled = act
                for s in (1, wp, wp + 1):                    # 2x2 window max (f32)
                    pooled = jnp.maximum(pooled, _shift_rows(act, s))
                # Selection matmul: compacts rows and rebuilds the next padding
                # ring (final pool: replicates the flattened features 8x instead).
                act = jnp.dot(s_ref[...], pooled.astype(jnp.bfloat16),
                              preferred_element_type=jnp.float32)

        # Classifier (Linear-ReLU-Linear-ReLU-Linear) on a full (8, 512) tile.
        # TODO(synk): nn.Dropout is eval-mode identity here; training-mode dropout
        # would need pltpu.prng_seed / prng_random_bits masks.
        for li in range(num_fc):
            w_ref, b_ref = next(it), next(it)
            act = jnp.dot(act.astype(jnp.bfloat16), w_ref[...],
                          preferred_element_type=jnp.float32) + b_ref[...]
            if li < num_fc - 1:
                act = jnp.maximum(act, 0.0)

        out_ref[0] = act.astype(out_ref.dtype)               # dense (8, 128) store

    return kernel


# ----------------------- static constants for the plan --------------------- #

def _border_mask(h, w):
    """Per-image interior mask for the padded-flat layout (conv->conv only)."""
    m = np.zeros((h + 2, w + 2, 1), np.float32)
    m[1:h + 1, 1:w + 1, :] = 1.0
    return m.reshape((h + 2) * (w + 2), 1)


def _pool_selection(h, w):
    """0/1 matrix taking the per-image padded-flat (h, w) stage to the padded-flat
    (h//2, w//2) stage (rows of the next padding ring are all-zero)."""
    hp, wp = h + 2, w + 2
    ho, wo = h // 2, w // 2
    hop, wop = ho + 2, wo + 2
    s = np.zeros((hop * wop, hp * wp), np.float32)
    for oh in range(ho):
        for ow in range(wo):
            s[(oh + 1) * wop + (ow + 1), (2 * oh + 1) * wp + (2 * ow + 1)] = 1.0
    return s


def _final_pool_selection(h, w):
    """Last pool (h=w=2 -> 1x1) fused with the flatten: emit _FC_ROWS identical
    rows holding the single pooled interior feature vector (full sublane tile)."""
    wp = w + 2
    s = np.zeros((_FC_ROWS, (h + 2) * (w + 2)), np.float32)
    s[:, wp + 1] = 1.0
    return s


# --------------------------- parameter preparation ------------------------- #

def prepare_vgg(feat_params, cls_params, spatial):
    """Turn HWIO/f32 parameters into (static plan, kernel input arrays, #classes).
    All conv channel dims are zero-padded to multiples of 128 so the in-kernel
    im2col lane-concat and every matmul are lane-aligned."""
    assert not isinstance(feat_params[0], str), "cfg must start with a conv"
    assert isinstance(feat_params[-1], str), "cfg must end with a max-pool"
    plan, kargs = [], []
    h = w = spatial
    cin_pad = None
    for idx, item in enumerate(feat_params):
        if isinstance(item, str):                              # "M"
            assert h % 2 == 0 and w % 2 == 0, "max-pool needs even spatial dims"
            last = idx == len(feat_params) - 1
            if last:
                assert h == 2 and w == 2, "classifier expects a final 1x1 spatial"
                sel = _final_pool_selection(h, w)              # pool + flatten fused
            else:
                sel = _pool_selection(h, w)
            kargs.append(jnp.asarray(sel, jnp.bfloat16))
            plan.append(("pool", w + 2))
            h //= 2
            w //= 2
        else:
            wk, b = item                                       # (3,3,Cin,Cout), (Cout,)
            assert wk.shape[0] == 3 and wk.shape[1] == 3, \
                "roll-based im2col assumes 3x3 / stride 1 / padding 1 convs"
            cin_raw, cout_raw = wk.shape[2], wk.shape[3]
            if cin_pad is None:
                cin_pad = _round_up(cin_raw, _LANE)
            cout_pad = _round_up(cout_raw, _LANE)
            wk = jnp.pad(jnp.asarray(wk, jnp.float32),
                         ((0, 0), (0, 0), (0, cin_pad - cin_raw),
                          (0, cout_pad - cout_raw)))
            b = jnp.pad(jnp.asarray(b, jnp.float32), ((0, cout_pad - cout_raw),))
            next_is_conv = (idx + 1 < len(feat_params)
                            and not isinstance(feat_params[idx + 1], str))
            kargs += [wk.reshape(9 * cin_pad, cout_pad).astype(jnp.bfloat16),
                      b.reshape(1, cout_pad)]
            if next_is_conv:                                   # ring re-zero needed
                kargs.append(jnp.asarray(_border_mask(h, w), jnp.float32))
            plan.append(("conv", w + 2, next_is_conv))
            cin_pad = cout_pad
    # PyTorch's x.view(N, -1) matches a plain row selection only because the final
    # spatial size is exactly 1x1 (flattened features = last Cout).
    assert h == 1 and w == 1, "features must reduce the spatial dims to 1x1"

    num_classes = cls_params[-1][0].shape[1]
    assert num_classes <= _LOGIT_PAD
    feat_dim = cin_pad                                         # padded last Cout * 1 * 1
    for i, (wl, bl) in enumerate(cls_params):
        wl = jnp.asarray(wl, jnp.float32)
        bl = jnp.asarray(bl, jnp.float32)
        if i == 0 and wl.shape[0] < feat_dim:                  # zero rows for pad lanes
            wl = jnp.pad(wl, ((0, feat_dim - wl.shape[0]), (0, 0)))
        if i == len(cls_params) - 1:                           # lane-dense logits
            wl = jnp.pad(wl, ((0, 0), (0, _LOGIT_PAD - num_classes)))
            bl = jnp.pad(bl, ((0, _LOGIT_PAD - num_classes),))
        kargs += [wl.astype(jnp.bfloat16), bl.reshape(1, -1)]
    return tuple(plan), tuple(kargs), num_classes


# ------------------------------ fused forward ------------------------------ #

def _const_map(ndim, b):
    return (0,) * ndim


def _img_map(b):
    return (b, 0, 0)


@partial(jax.jit, static_argnames=("plan", "num_classes"))
def vgg_forward(x_nchw, kargs, plan, num_classes):
    """x_nchw: (N, C, H, W) f32 -> logits (N, num_classes).
    One pallas_call; grid = batch ("parallel" -> both TCs on v7x)."""
    n, c, h, w = x_nchw.shape
    cin_pad = kargs[0].shape[0] // 9                 # first conv's padded Cin
    x = jnp.transpose(x_nchw, (0, 2, 3, 1))          # NHWC: channels on lanes
    x = jnp.pad(x, ((0, 0), (1, 1), (1, 1), (0, cin_pad - c)))   # ring + lane pad
    x = x.reshape(n, (h + 2) * (w + 2), cin_pad).astype(jnp.bfloat16)

    inputs = (x,) + tuple(kargs)
    in_specs = [pl.BlockSpec((1,) + x.shape[1:], _img_map)]
    # Weights / selections: constant block index -> stay VMEM-resident across steps.
    in_specs += [pl.BlockSpec(a.shape, partial(_const_map, a.ndim)) for a in kargs]

    out = pl.pallas_call(
        _make_fused_kernel(plan, num_fc=3),
        out_shape=jax.ShapeDtypeStruct((n, _FC_ROWS, _LOGIT_PAD), jnp.float32),
        grid=(n,),
        in_specs=in_specs,
        out_specs=pl.BlockSpec((1, _FC_ROWS, _LOGIT_PAD), _img_map),
        compiler_params=pltpu.CompilerParams(
            dimension_semantics=("parallel",),
            vmem_limit_bytes=32 * 1024 * 1024),
    )(*inputs)
    return out[:, 0, :num_classes]


# ------------------------- init + pure-JAX reference ------------------------ #

def init_params(key, cfg, in_ch=3):
    """Conv: N(0, sqrt(2/(3*3*Cout))) weights (HWIO) and zero bias (as in the
    module's __init__); Linear: PyTorch-default U(-1/sqrt(fan_in), +...)."""
    feat_params, cin = [], in_ch
    for v in cfg:
        if v == "M":
            feat_params.append("M")
            continue
        key, kw = jax.random.split(key)
        std = math.sqrt(2.0 / (3 * 3 * v))
        feat_params.append((jax.random.normal(kw, (3, 3, cin, v), jnp.float32) * std,
                            jnp.zeros((v,), jnp.float32)))
        cin = v

    def linear(k, fin, fout):
        kw_, kb_ = jax.random.split(k)
        bound = 1.0 / math.sqrt(fin)
        return (jax.random.uniform(kw_, (fin, fout), jnp.float32, -bound, bound),
                jax.random.uniform(kb_, (fout,), jnp.float32, -bound, bound))

    key, k1, k2, k3 = jax.random.split(key, 4)
    return feat_params, [linear(k1, 512, 512), linear(k2, 512, 512),
                         linear(k3, 512, 10)]


def reference_forward(x_nchw, feat_params, cls_params):
    """Pure-JAX reference with the original PyTorch module's semantics."""
    x = jnp.transpose(x_nchw, (0, 2, 3, 1))
    for item in feat_params:
        if isinstance(item, str):
            n, h, w, c = x.shape
            x = x.reshape(n, h // 2, 2, w // 2, 2, c).max(axis=(2, 4))
        else:
            wk, bk = item
            x = lax.conv_general_dilated(
                x, wk, window_strides=(1, 1), padding="SAME",
                dimension_numbers=("NHWC", "HWIO", "NHWC")) + bk
            x = jnp.maximum(x, 0.0)
    x = jnp.transpose(x, (0, 3, 1, 2)).reshape(x.shape[0], -1)
    for i, (wl, bl) in enumerate(cls_params):
        x = x @ wl + bl
        if i < len(cls_params) - 1:
            x = jnp.maximum(x, 0.0)
    return x


# ---------------------------------- main ------------------------------------ #

if __name__ == "__main__":
    key = jax.random.PRNGKey(0)
    kx, kp = jax.random.split(key)

    # Small VGG-style config: three max-pools take 8x8 -> 1x1, so the flattened
    # feature size is exactly 512, matching nn.Linear(512, 512).
    cfg = [64, "M", 128, "M", 512, "M"]
    x = jax.random.normal(kx, (2, 3, 8, 8), jnp.float32)          # NCHW, like PyTorch

    feat_params, cls_params = init_params(kp, cfg, in_ch=3)
    plan, kargs, num_classes = prepare_vgg(feat_params, cls_params,
                                           spatial=x.shape[2])

    out = vgg_forward(x, kargs, plan=plan, num_classes=num_classes)
    out = jax.block_until_ready(out)

    assert out.shape == (2, 10) and out.dtype == jnp.float32
    assert bool(jnp.all(jnp.isfinite(out)))

    # Numerical check against the pure-JAX reference (bf16-matmul tolerance).
    ref = reference_forward(x, feat_params, cls_params)
    err = float(jnp.max(jnp.abs(out - ref)))
    scale = float(jnp.max(jnp.abs(ref)))
    assert err <= 0.05 * scale + 0.05, f"mismatch vs reference: {err} (scale {scale})"

    print("KERNEL_OK")
</pallas_src>

<mosaic_0001>
module attributes {stable_mosaic.version = 11 : i64} {
  func.func @kernel(%arg0: i32, %arg1: memref<1x100x128xbf16, #tpu.memory_space<vmem>>, %arg2: memref<1152x128xbf16, #tpu.memory_space<vmem>>, %arg3: memref<1x128xf32, #tpu.memory_space<vmem>>, %arg4: memref<36x100xbf16, #tpu.memory_space<vmem>>, %arg5: memref<1152x128xbf16, #tpu.memory_space<vmem>>, %arg6: memref<1x128xf32, #tpu.memory_space<vmem>>, %arg7: memref<16x36xbf16, #tpu.memory_space<vmem>>, %arg8: memref<1152x512xbf16, #tpu.memory_space<vmem>>, %arg9: memref<1x512xf32, #tpu.memory_space<vmem>>, %arg10: memref<8x16xbf16, #tpu.memory_space<vmem>>, %arg11: memref<512x512xbf16, #tpu.memory_space<vmem>>, %arg12: memref<1x512xf32, #tpu.memory_space<vmem>>, %arg13: memref<512x512xbf16, #tpu.memory_space<vmem>>, %arg14: memref<1x512xf32, #tpu.memory_space<vmem>>, %arg15: memref<512x128xbf16, #tpu.memory_space<vmem>>, %arg16: memref<1x128xf32, #tpu.memory_space<vmem>>, %arg17: memref<1x8x128xf32, #tpu.memory_space<vmem>>) attributes {dimension_semantics = [#tpu.dimension_semantics<parallel>], iteration_bounds = array<i64: 2>, scalar_prefetch = 0 : i64, scratch_operands = 0 : i64, tpu.core_type = #tpu.core_type<tc>, window_params = [{transform_indices = @transform_0, window_bounds = array<i64: 1, 100, 128>}, {pipeline_mode = #tpu.pipeline_mode<synchronous>, transform_indices = @transform_1, window_bounds = array<i64: 1152, 128>}, {pipeline_mode = #tpu.pipeline_mode<synchronous>, transform_indices = @transform_2, window_bounds = array<i64: 1, 128>}, {pipeline_mode = #tpu.pipeline_mode<synchronous>, transform_indices = @transform_3, window_bounds = array<i64: 36, 100>}, {pipeline_mode = #tpu.pipeline_mode<synchronous>, transform_indices = @transform_4, window_bounds = array<i64: 1152, 128>}, {pipeline_mode = #tpu.pipeline_mode<synchronous>, transform_indices = @transform_5, window_bounds = array<i64: 1, 128>}, {pipeline_mode = #tpu.pipeline_mode<synchronous>, transform_indices = @transform_6, window_bounds = array<i64: 16, 36>}, {pipeline_mode = #tpu.pipeline_mode<synchronous>, transform_indices = @transform_7, window_bounds = array<i64: 1152, 512>}, {pipeline_mode = #tpu.pipeline_mode<synchronous>, transform_indices = @transform_8, window_bounds = array<i64: 1, 512>}, {pipeline_mode = #tpu.pipeline_mode<synchronous>, transform_indices = @transform_9, window_bounds = array<i64: 8, 16>}, {pipeline_mode = #tpu.pipeline_mode<synchronous>, transform_indices = @transform_10, window_bounds = array<i64: 512, 512>}, {pipeline_mode = #tpu.pipeline_mode<synchronous>, transform_indices = @transform_11, window_bounds = array<i64: 1, 512>}, {pipeline_mode = #tpu.pipeline_mode<synchronous>, transform_indices = @transform_12, window_bounds = array<i64: 512, 512>}, {pipeline_mode = #tpu.pipeline_mode<synchronous>, transform_indices = @transform_13, window_bounds = array<i64: 1, 512>}, {pipeline_mode = #tpu.pipeline_mode<synchronous>, transform_indices = @transform_14, window_bounds = array<i64: 512, 128>}, {pipeline_mode = #tpu.pipeline_mode<synchronous>, transform_indices = @transform_15, window_bounds = array<i64: 1, 128>}, {transform_indices = @transform_16, window_bounds = array<i64: 1, 8, 128>}]} {
    %c0 = arith.constant 0 : index
    %c0_0 = arith.constant 0 : index
    %c0_1 = arith.constant 0 : index
    %0 = vector.load %arg1[%c0, %c0_0, %c0_1] : memref<1x100x128xbf16, #tpu.memory_space<vmem>>, vector<1x100x128xbf16>
    %1 = vector.shape_cast %0 : vector<1x100x128xbf16> to vector<100x128xbf16>
    %2 = arith.extf %1 : vector<100x128xbf16> to vector<100x128xf32>
    %c11_i32 = arith.constant 11 : i32
    %3 = tpu.dynamic_rotate %2 by %c11_i32 dim 0 : vector<100x128xf32>, i32 -> vector<100x128xf32>
    %c10_i32 = arith.constant 10 : i32
    %4 = tpu.dynamic_rotate %2 by %c10_i32 dim 0 : vector<100x128xf32>, i32 -> vector<100x128xf32>
    %c9_i32 = arith.constant 9 : i32
    %5 = tpu.dynamic_rotate %2 by %c9_i32 dim 0 : vector<100x128xf32>, i32 -> vector<100x128xf32>
    %c1_i32 = arith.constant 1 : i32
    %6 = tpu.dynamic_rotate %2 by %c1_i32 dim 0 : vector<100x128xf32>, i32 -> vector<100x128xf32>
    %c99_i32 = arith.constant 99 : i32
    %7 = tpu.dynamic_rotate %2 by %c99_i32 dim 0 : vector<100x128xf32>, i32 -> vector<100x128xf32>
    %c91_i32 = arith.constant 91 : i32
    %8 = tpu.dynamic_rotate %2 by %c91_i32 dim 0 : vector<100x128xf32>, i32 -> vector<100x128xf32>
    %c90_i32 = arith.constant 90 : i32
    %9 = tpu.dynamic_rotate %2 by %c90_i32 dim 0 : vector<100x128xf32>, i32 -> vector<100x128xf32>
    %c89_i32 = arith.constant 89 : i32
    %10 = tpu.dynamic_rotate %2 by %c89_i32 dim 0 : vector<100x128xf32>, i32 -> vector<100x128xf32>
    %11 = tpu.concatenate %3, %4, %5, %6, %2, %7, %8, %9, %10 in 1 : vector<100x128xf32>, vector<100x128xf32>, vector<100x128xf32>, vector<100x128xf32>, vector<100x128xf32>, vector<100x128xf32>, vector<100x128xf32>, vector<100x128xf32>, vector<100x128xf32> -> vector<100x1152xf32>
    %12 = arith.truncf %11 : vector<100x1152xf32> to vector<100x1152xbf16>
    %c0_2 = arith.constant 0 : index
    %c0_3 = arith.constant 0 : index
    %13 = vector.load %arg2[%c0_2, %c0_3] : memref<1152x128xbf16, #tpu.memory_space<vmem>>, vector<1152x128xbf16>
    %cst = arith.constant dense<0.000000e+00> : vector<100x128xf32>
    %14 = tpu.matmul %12, %13, %cst {dimension_numbers = #tpu.dot_dimension_numbers<[1], [0], [0], [1], [0, 0, 1, 1], [], []>} : vector<100x1152xbf16>, vector<1152x128xbf16>, vector<100x128xf32> -> vector<100x128xf32>
    %c0_4 = arith.constant 0 : index
    %c0_5 = arith.constant 0 : index
    %15 = vector.load %arg3[%c0_4, %c0_5] : memref<1x128xf32, #tpu.memory_space<vmem>>, vector<1x128xf32>
    %16 = vector.broadcast %15 : vector<1x128xf32> to vector<100x128xf32>
    %17 = arith.addf %14, %16 : vector<100x128xf32>
    %cst_6 = arith.constant 0.000000e+00 : f32
    %18 = vector.broadcast %cst_6 : f32 to vector<100x128xf32>
    %19 = arith.maximumf %17, %18 : vector<100x128xf32>
    %c99_i32_7 = arith.constant 99 : i32
    %20 = tpu.dynamic_rotate %19 by %c99_i32_7 dim 0 : vector<100x128xf32>, i32 -> vector<100x128xf32>
    %21 = arith.maximumf %19, %20 : vector<100x128xf32>
    %c90_i32_8 = arith.constant 90 : i32
    %22 = tpu.dynamic_rotate %19 by %c90_i32_8 dim 0 : vector<100x128xf32>, i32 -> vector<100x128xf32>
    %23 = arith.maximumf %21, %22 : vector<100x128xf32>
    %c89_i32_9 = arith.constant 89 : i32
    %24 = tpu.dynamic_rotate %19 by %c89_i32_9 dim 0 : vector<100x128xf32>, i32 -> vector<100x128xf32>
    %25 = arith.maximumf %23, %24 : vector<100x128xf32>
    %c0_10 = arith.constant 0 : index
    %c0_11 = arith.constant 0 : index
    %26 = vector.load %arg4[%c0_10, %c0_11] : memref<36x100xbf16, #tpu.memory_space<vmem>>, vector<36x100xbf16>
    %27 = arith.truncf %25 : vector<100x128xf32> to vector<100x128xbf16>
    %cst_12 = arith.constant dense<0.000000e+00> : vector<36x128xf32>
    %28 = tpu.matmul %26, %27, %cst_12 {dimension_numbers = #tpu.dot_dimension_numbers<[1], [0], [0], [1], [0, 0, 1, 1], [], []>} : vector<36x100xbf16>, vector<100x128xbf16>, vector<36x128xf32> -> vector<36x128xf32>
    %c7_i32 = arith.constant 7 : i32
    %29 = tpu.dynamic_rotate %28 by %c7_i32 dim 0 : vector<36x128xf32>, i32 -> vector<36x128xf32>
    %c6_i32 = arith.constant 6 : i32
    %30 = tpu.dynamic_rotate %28 by %c6_i32 dim 0 : vector<36x128xf32>, i32 -> vector<36x128xf32>
    %c5_i32 = arith.constant 5 : i32
    %31 = tpu.dynamic_rotate %28 by %c5_i32 dim 0 : vector<36x128xf32>, i32 -> vector<36x128xf32>
    %c1_i32_13 = arith.constant 1 : i32
    %32 = tpu.dynamic_rotate %28 by %c1_i32_13 dim 0 : vector<36x128xf32>, i32 -> vector<36x128xf32>
    %c35_i32 = arith.constant 35 : i32
    %33 = tpu.dynamic_rotate %28 by %c35_i32 dim 0 : vector<36x128xf32>, i32 -> vector<36x128xf32>
    %c31_i32 = arith.constant 31 : i32
    %34 = tpu.dynamic_rotate %28 by %c31_i32 dim 0 : vector<36x128xf32>, i32 -> vector<36x128xf32>
    %c30_i32 = arith.constant 30 : i32
    %35 = tpu.dynamic_rotate %28 by %c30_i32 dim 0 : vector<36x128xf32>, i32 -> vector<36x128xf32>
    %c29_i32 = arith.constant 29 : i32
    %36 = tpu.dynamic_rotate %28 by %c29_i32 dim 0 : vector<36x128xf32>, i32 -> vector<36x128xf32>
    %37 = tpu.concatenate %29, %30, %31, %32, %28, %33, %34, %35, %36 in 1 : vector<36x128xf32>, vector<36x128xf32>, vector<36x128xf32>, vector<36x128xf32>, vector<36x128xf32>, vector<36x128xf32>, vector<36x128xf32>, vector<36x128xf32>, vector<36x128xf32> -> vector<36x1152xf32>
    %38 = arith.truncf %37 : vector<36x1152xf32> to vector<36x1152xbf16>
    %c0_14 = arith.constant 0 : index
    %c0_15 = arith.constant 0 : index
    %39 = vector.load %arg5[%c0_14, %c0_15] : memref<1152x128xbf16, #tpu.memory_space<vmem>>, vector<1152x128xbf16>
    %cst_16 = arith.constant dense<0.000000e+00> : vector<36x128xf32>
    %40 = tpu.matmul %38, %39, %cst_16 {dimension_numbers = #tpu.dot_dimension_numbers<[1], [0], [0], [1], [0, 0, 1, 1], [], []>} : vector<36x1152xbf16>, vector<1152x128xbf16>, vector<36x128xf32> -> vector<36x128xf32>
    %c0_17 = arith.constant 0 : index
    %c0_18 = arith.constant 0 : index
    %41 = vector.load %arg6[%c0_17, %c0_18] : memref<1x128xf32, #tpu.memory_space<vmem>>, vector<1x128xf32>
    %42 = vector.broadcast %41 : vector<1x128xf32> to vector<36x128xf32>
    %43 = arith.addf %40, %42 : vector<36x128xf32>
    %cst_19 = arith.constant 0.000000e+00 : f32
    %44 = vector.broadcast %cst_19 : f32 to vector<36x128xf32>
    %45 = arith.maximumf %43, %44 : vector<36x128xf32>
    %c35_i32_20 = arith.constant 35 : i32
    %46 = tpu.dynamic_rotate %45 by %c35_i32_20 dim 0 : vector<36x128xf32>, i32 -> vector<36x128xf32>
    %47 = arith.maximumf %45, %46 : vector<36x128xf32>
    %c30_i32_21 = arith.constant 30 : i32
    %48 = tpu.dynamic_rotate %45 by %c30_i32_21 dim 0 : vector<36x128xf32>, i32 -> vector<36x128xf32>
    %49 = arith.maximumf %47, %48 : vector<36x128xf32>
    %c29_i32_22 = arith.constant 29 : i32
    %50 = tpu.dynamic_rotate %45 by %c29_i32_22 dim 0 : vector<36x128xf32>, i32 -> vector<36x128xf32>
    %51 = arith.maximumf %49, %50 : vector<36x128xf32>
    %c0_23 = arith.constant 0 : index
    %c0_24 = arith.constant 0 : index
    %52 = vector.load %arg7[%c0_23, %c0_24] : memref<16x36xbf16, #tpu.memory_space<vmem>>, vector<16x36xbf16>
    %53 = arith.truncf %51 : vector<36x128xf32> to vector<36x128xbf16>
    %cst_25 = arith.constant dense<0.000000e+00> : vector<16x128xf32>
    %54 = tpu.matmul %52, %53, %cst_25 {dimension_numbers = #tpu.dot_dimension_numbers<[1], [0], [0], [1], [0, 0, 1, 1], [], []>} : vector<16x36xbf16>, vector<36x128xbf16>, vector<16x128xf32> -> vector<16x128xf32>
    %c5_i32_26 = arith.constant 5 : i32
    %55 = tpu.dynamic_rotate %54 by %c5_i32_26 dim 0 : vector<16x128xf32>, i32 -> vector<16x128xf32>
    %c4_i32 = arith.constant 4 : i32
    %56 = tpu.dynamic_rotate %54 by %c4_i32 dim 0 : vector<16x128xf32>, i32 -> vector<16x128xf32>
    %c3_i32 = arith.constant 3 : i32
    %57 = tpu.dynamic_rotate %54 by %c3_i32 dim 0 : vector<16x128xf32>, i32 -> vector<16x128xf32>
    %c1_i32_27 = arith.constant 1 : i32
    %58 = tpu.dynamic_rotate %54 by %c1_i32_27 dim 0 : vector<16x128xf32>, i32 -> vector<16x128xf32>
    %c15_i32 = arith.constant 15 : i32
    %59 = tpu.dynamic_rotate %54 by %c15_i32 dim 0 : vector<16x128xf32>, i32 -> vector<16x128xf32>
    %c13_i32 = arith.constant 13 : i32
    %60 = tpu.dynamic_rotate %54 by %c13_i32 dim 0 : vector<16x128xf32>, i32 -> vector<16x128xf32>
    %c12_i32 = arith.constant 12 : i32
    %61 = tpu.dynamic_rotate %54 by %c12_i32 dim 0 : vector<16x128xf32>, i32 -> vector<16x128xf32>
    %c11_i32_28 = arith.constant 11 : i32
    %62 = tpu.dynamic_rotate %54 by %c11_i32_28 dim 0 : vector<16x128xf32>, i32 -> vector<16x128xf32>
    %63 = tpu.concatenate %55, %56, %57, %58, %54, %59, %60, %61, %62 in 1 : vector<16x128xf32>, vector<16x128xf32>, vector<16x128xf32>, vector<16x128xf32>, vector<16x128xf32>, vector<16x128xf32>, vector<16x128xf32>, vector<16x128xf32>, vector<16x128xf32> -> vector<16x1152xf32>
    %64 = arith.truncf %63 : vector<16x1152xf32> to vector<16x1152xbf16>
    %c0_29 = arith.constant 0 : index
    %c0_30 = arith.constant 0 : index
    %65 = vector.load %arg8[%c0_29, %c0_30] : memref<1152x512xbf16, #tpu.memory_space<vmem>>, vector<1152x512xbf16>
    %cst_31 = arith.constant dense<0.000000e+00> : vector<16x512xf32>
    %66 = tpu.matmul %64, %65, %cst_31 {dimension_numbers = #tpu.dot_dimension_numbers<[1], [0], [0], [1], [0, 0, 1, 1], [], []>} : vector<16x1152xbf16>, vector<1152x512xbf16>, vector<16x512xf32> -> vector<16x512xf32>
    %c0_32 = arith.constant 0 : index
    %c0_33 = arith.constant 0 : index
    %67 = vector.load %arg9[%c0_32, %c0_33] : memref<1x512xf32, #tpu.memory_space<vmem>>, vector<1x512xf32>
    %68 = vector.broadcast %67 : vector<1x512xf32> to vector<16x512xf32>
    %69 = arith.addf %66, %68 : vector<16x512xf32>
    %cst_34 = arith.constant 0.000000e+00 : f32
    %70 = vector.broadcast %cst_34 : f32 to vector<16x512xf32>
    %71 = arith.maximumf %69, %70 : vector<16x512xf32>
    %c15_i32_35 = arith.constant 15 : i32
    %72 = tpu.dynamic_rotate %71 by %c15_i32_35 dim 0 : vector<16x512xf32>, i32 -> vector<16x512xf32>
    %73 = arith.maximumf %71, %72 : vector<16x512xf32>
    %c12_i32_36 = arith.constant 12 : i32
    %74 = tpu.dynamic_rotate %71 by %c12_i32_36 dim 0 : vector<16x512xf32>, i32 -> vector<16x512xf32>
    %75 = arith.maximumf %73, %74 : vector<16x512xf32>
    %c11_i32_37 = arith.constant 11 : i32
    %76 = tpu.dynamic_rotate %71 by %c11_i32_37 dim 0 : vector<16x512xf32>, i32 -> vector<16x512xf32>
    %77 = arith.maximumf %75, %76 : vector<16x512xf32>
    %c0_38 = arith.constant 0 : index
    %c0_39 = arith.constant 0 : index
    %78 = vector.load %arg10[%c0_38, %c0_39] : memref<8x16xbf16, #tpu.memory_space<vmem>>, vector<8x16xbf16>
    %79 = arith.truncf %77 : vector<16x512xf32> to vector<16x512xbf16>
    %cst_40 = arith.constant dense<0.000000e+00> : vector<8x512xf32>
    %80 = tpu.matmul %78, %79, %cst_40 {dimension_numbers = #tpu.dot_dimension_numbers<[1], [0], [0], [1], [0, 0, 1, 1], [], []>} : vector<8x16xbf16>, vector<16x512xbf16>, vector<8x512xf32> -> vector<8x512xf32>
    %81 = arith.truncf %80 : vector<8x512xf32> to vector<8x512xbf16>
    %c0_41 = arith.constant 0 : index
    %c0_42 = arith.constant 0 : index
    %82 = vector.load %arg11[%c0_41, %c0_42] : memref<512x512xbf16, #tpu.memory_space<vmem>>, vector<512x512xbf16>
    %cst_43 = arith.constant dense<0.000000e+00> : vector<8x512xf32>
    %83 = tpu.matmul %81, %82, %cst_43 {dimension_numbers = #tpu.dot_dimension_numbers<[1], [0], [0], [1], [0, 0, 1, 1], [], []>} : vector<8x512xbf16>, vector<512x512xbf16>, vector<8x512xf32> -> vector<8x512xf32>
    %c0_44 = arith.constant 0 : index
    %c0_45 = arith.constant 0 : index
    %84 = vector.load %arg12[%c0_44, %c0_45] : memref<1x512xf32, #tpu.memory_space<vmem>>, vector<1x512xf32>
    %85 = vector.broadcast %84 : vector<1x512xf32> to vector<8x512xf32>
    %86 = arith.addf %83, %85 : vector<8x512xf32>
    %cst_46 = arith.constant 0.000000e+00 : f32
    %87 = vector.broadcast %cst_46 : f32 to vector<8x512xf32>
    %88 = arith.maximumf %86, %87 : vector<8x512xf32>
    %89 = arith.truncf %88 : vector<8x512xf32> to vector<8x512xbf16>
    %c0_47 = arith.constant 0 : index
    %c0_48 = arith.constant 0 : index
    %90 = vector.load %arg13[%c0_47, %c0_48] : memref<512x512xbf16, #tpu.memory_space<vmem>>, vector<512x512xbf16>
    %cst_49 = arith.constant dense<0.000000e+00> : vector<8x512xf32>
    %91 = tpu.matmul %89, %90, %cst_49 {dimension_numbers = #tpu.dot_dimension_numbers<[1], [0], [0], [1], [0, 0, 1, 1], [], []>} : vector<8x512xbf16>, vector<512x512xbf16>, vector<8x512xf32> -> vector<8x512xf32>
    %c0_50 = arith.constant 0 : index
    %c0_51 = arith.constant 0 : index
    %92 = vector.load %arg14[%c0_50, %c0_51] : memref<1x512xf32, #tpu.memory_space<vmem>>, vector<1x512xf32>
    %93 = vector.broadcast %92 : vector<1x512xf32> to vector<8x512xf32>
    %94 = arith.addf %91, %93 : vector<8x512xf32>
    %cst_52 = arith.constant 0.000000e+00 : f32
    %95 = vector.broadcast %cst_52 : f32 to vector<8x512xf32>
    %96 = arith.maximumf %94, %95 : vector<8x512xf32>
    %97 = arith.truncf %96 : vector<8x512xf32> to vector<8x512xbf16>
    %c0_53 = arith.constant 0 : index
    %c0_54 = arith.constant 0 : index
    %98 = vector.load %arg15[%c0_53, %c0_54] : memref<512x128xbf16, #tpu.memory_space<vmem>>, vector<512x128xbf16>
    %cst_55 = arith.constant dense<0.000000e+00> : vector<8x128xf32>
    %99 = tpu.matmul %97, %98, %cst_55 {dimension_numbers = #tpu.dot_dimension_numbers<[1], [0], [0], [1], [0, 0, 1, 1], [], []>} : vector<8x512xbf16>, vector<512x128xbf16>, vector<8x128xf32> -> vector<8x128xf32>
    %c0_56 = arith.constant 0 : index
    %c0_57 = arith.constant 0 : index
    %100 = vector.load %arg16[%c0_56, %c0_57] : memref<1x128xf32, #tpu.memory_space<vmem>>, vector<1x128xf32>
    %101 = vector.broadcast %100 : vector<1x128xf32> to vector<8x128xf32>
    %102 = arith.addf %99, %101 : vector<8x128xf32>
    %c0_58 = arith.constant 0 : index
    %c0_59 = arith.constant 0 : index
    %c0_60 = arith.constant 0 : index
    %103 = vector.load %arg17[%c0_58, %c0_59, %c0_60] : memref<1x8x128xf32, #tpu.memory_space<vmem>>, vector<1x8x128xf32>
    %104 = vector.shape_cast %103 : vector<1x8x128xf32> to vector<8x128xf32>
    %105 = vector.shape_cast %102 : vector<8x128xf32> to vector<1x8x128xf32>
    tpu.vector_store %arg17[%c0_58, %c0_59, %c0_60], %105 {strides = array<i32>} : memref<1x8x128xf32, #tpu.memory_space<vmem>>, vector<1x8x128xf32>,
    return
  }
  func.func @transform_0(%arg0: i32) -> (i32, i32, i32) {
    %c0_i32 = arith.constant 0 : i32
    %c0_i32_0 = arith.constant 0 : i32
    %c0_i32_1 = arith.constant 0 : i32
    return %arg0, %c0_i32, %c0_i32_0 : i32, i32, i32
  }
  func.func @transform_1(%arg0: i32) -> (i32, i32) {
    %c0_i32 = arith.constant 0 : i32
    %c0_i32_0 = arith.constant 0 : i32
    %c0_i32_1 = arith.constant 0 : i32
    return %c0_i32, %c0_i32_0 : i32, i32
  }
  func.func @transform_2(%arg0: i32) -> (i32, i32) {
    %c0_i32 = arith.constant 0 : i32
    %c0_i32_0 = arith.constant 0 : i32
    %c0_i32_1 = arith.constant 0 : i32
    return %c0_i32, %c0_i32_0 : i32, i32
  }
  func.func @transform_3(%arg0: i32) -> (i32, i32) {
    %c0_i32 = arith.constant 0 : i32
    %c0_i32_0 = arith.constant 0 : i32
    %c0_i32_1 = arith.constant 0 : i32
    return %c0_i32, %c0_i32_0 : i32, i32
  }
  func.func @transform_4(%arg0: i32) -> (i32, i32) {
    %c0_i32 = arith.constant 0 : i32
    %c0_i32_0 = arith.constant 0 : i32
    %c0_i32_1 = arith.constant 0 : i32
    return %c0_i32, %c0_i32_0 : i32, i32
  }
  func.func @transform_5(%arg0: i32) -> (i32, i32) {
    %c0_i32 = arith.constant 0 : i32
    %c0_i32_0 = arith.constant 0 : i32
    %c0_i32_1 = arith.constant 0 : i32
    return %c0_i32, %c0_i32_0 : i32, i32
  }
  func.func @transform_6(%arg0: i32) -> (i32, i32) {
    %c0_i32 = arith.constant 0 : i32
    %c0_i32_0 = arith.constant 0 : i32
    %c0_i32_1 = arith.constant 0 : i32
    return %c0_i32, %c0_i32_0 : i32, i32
  }
  func.func @transform_7(%arg0: i32) -> (i32, i32) {
    %c0_i32 = arith.constant 0 : i32
    %c0_i32_0 = arith.constant 0 : i32
    %c0_i32_1 = arith.constant 0 : i32
    return %c0_i32, %c0_i32_0 : i32, i32
  }
  func.func @transform_8(%arg0: i32) -> (i32, i32) {
    %c0_i32 = arith.constant 0 : i32
    %c0_i32_0 = arith.constant 0 : i32
    %c0_i32_1 = arith.constant 0 : i32
    return %c0_i32, %c0_i32_0 : i32, i32
  }
  func.func @transform_9(%arg0: i32) -> (i32, i32) {
    %c0_i32 = arith.constant 0 : i32
    %c0_i32_0 = arith.constant 0 : i32
    %c0_i32_1 = arith.constant 0 : i32
    return %c0_i32, %c0_i32_0 : i32, i32
  }
  func.func @transform_10(%arg0: i32) -> (i32, i32) {
    %c0_i32 = arith.constant 0 : i32
    %c0_i32_0 = arith.constant 0 : i32
    %c0_i32_1 = arith.constant 0 : i32
    return %c0_i32, %c0_i32_0 : i32, i32
  }
  func.func @transform_11(%arg0: i32) -> (i32, i32) {
    %c0_i32 = arith.constant 0 : i32
    %c0_i32_0 = arith.constant 0 : i32
    %c0_i32_1 = arith.constant 0 : i32
    return %c0_i32, %c0_i32_0 : i32, i32
  }
  func.func @transform_12(%arg0: i32) -> (i32, i32) {
    %c0_i32 = arith.constant 0 : i32
    %c0_i32_0 = arith.constant 0 : i32
    %c0_i32_1 = arith.constant 0 : i32
    return %c0_i32, %c0_i32_0 : i32, i32
  }
  func.func @transform_13(%arg0: i32) -> (i32, i32) {
    %c0_i32 = arith.constant 0 : i32
    %c0_i32_0 = arith.constant 0 : i32
    %c0_i32_1 = arith.constant 0 : i32
    return %c0_i32, %c0_i32_0 : i32, i32
  }
  func.func @transform_14(%arg0: i32) -> (i32, i32) {
    %c0_i32 = arith.constant 0 : i32
    %c0_i32_0 = arith.constant 0 : i32
    %c0_i32_1 = arith.constant 0 : i32
    return %c0_i32, %c0_i32_0 : i32, i32
  }
  func.func @transform_15(%arg0: i32) -> (i32, i32) {
    %c0_i32 = arith.constant 0 : i32
    %c0_i32_0 = arith.constant 0 : i32
    %c0_i32_1 = arith.constant 0 : i32
    return %c0_i32, %c0_i32_0 : i32, i32
  }
  func.func @transform_16(%arg0: i32) -> (i32, i32, i32) {
    %c0_i32 = arith.constant 0 : i32
    %c0_i32_0 = arith.constant 0 : i32
    %c0_i32_1 = arith.constant 0 : i32
    return %arg0, %c0_i32, %c0_i32_0 : i32, i32, i32
  }
}

</mosaic_0001>

<bundles_post_ra>
// kernel: vgg_forward.1
= control target key start
LH: loop header
LB: loop body
LE: loop exit
PB: predicated region body
PF: predicated region fallthrough
CT: control target
= control target key end

     0   :  { %s13780_s0 = inlined_call_operand.vmem [shape: bf16[2,100,128], index: 0, kind: input, shape index: {}]   ;;  %s13781_s1 = inlined_call_operand.hbm [shape: bf16[1152,128], index: 1, kind: input, shape index: {}]   ;;  %s13782_s2 = inlined_call_operand.hbm [shape: f32[1,128], index: 2, kind: input, shape index: {}]   ;;  %s13783_s3 = inlined_call_operand.hbm [shape: bf16[36,100], index: 3, kind: input, shape index: {}]   ;;  %s13784_s4 = inlined_call_operand.hbm [shape: bf16[1152,128], index: 4, kind: input, shape index: {}]   ;;  %s13785_s5 = inlined_call_operand.hbm [shape: f32[1,128], index: 5, kind: input, shape index: {}]   ;;  %s13786_s6 = inlined_call_operand.hbm [shape: bf16[16,36], index: 6, kind: input, shape index: {}]   ;;  %s13787_s7 = inlined_call_operand.hbm [shape: bf16[1152,512], index: 7, kind: input, shape index: {}]   ;;  %s13788_s8 = inlined_call_operand.hbm [shape: f32[1,512], index: 8, kind: input, shape index: {}]   ;;  %s13789_s9 = inlined_call_operand.hbm [shape: bf16[8,16], index: 9, kind: input, shape index: {}]   ;;  %s13790_s10 = inlined_call_operand.hbm [shape: bf16[512,512], index: 10, kind: input, shape index: {}]   ;;  %s13791_s11 = inlined_call_operand.hbm [shape: f32[1,512], index: 11, kind: input, shape index: {}]   ;;  %s13792_s12 = inlined_call_operand.hbm [shape: bf16[512,512], index: 12, kind: input, shape index: {}]   ;;  %s13793_s13 = inlined_call_operand.hbm [shape: f32[1,512], index: 13, kind: input, shape index: {}]   ;;  %s13794_s14 = inlined_call_operand.hbm [shape: bf16[512,128], index: 14, kind: input, shape index: {}]   ;;  %s13795_s15 = inlined_call_operand.hbm [shape: f32[1,128], index: 15, kind: input, shape index: {}]   ;;  %s13796_s16 = inlined_call_operand.vmem [shape: f32[2,8,128], index: 16, kind: output, shape index: {}]  }
   0x1   :  { %13825 = sst [smem:[#allocation42_spill]] %s13780_s0 }
   0x2   :  { %13826 = sst [smem:[#allocation43_spill]] %s13782_s2 }
   0x3   :  { %13827 = sst [smem:[#allocation44_spill]] %s13784_s4 }
   0x4   :  { %13828 = sst [smem:[#allocation45_spill]] %s13796_s16 }
   0x5   :  { %21 = vsyncpa [#allocation3], 0 }
   0x6   :  { %22 = vsyncpa [#allocation5], 0 }
   0x7   :  { %23 = vsyncpa [#allocation8], 0 }
   0x8   :  { %24 = vsyncpa [#allocation11], 0 }
   0x9   :  { %25 = vsyncpa [#allocation14], 0 }
   0xa   :  { %26 = vsyncpa [#allocation17], 0 }
   0xb   :  { %27 = vsyncpa [#allocation20], 0 }
   0xc   :  { %28 = vsyncpa [#allocation23], 0  ;;  %s12301_s21 = smov 0  }
   0xd LB: > { %13829 = sst [smem:[#allocation33_spill]] %s12192_s21  ;;  %s12194_s22 = smov [#allocation4]   ;;  %s12192_s21 = sphi %s12301_s21, %s34_s21  }
   0xe   : > { %s432_s23 = sshll.u32 %s12194_s22, 4  ;;  %s12307_s24 = sadd.s32 4294967295, %s12192_s21   ;;  %s12312_s23 = int_to_ptr.vmem [resolvable:$true] %s432_s23 }
   0xf   : > { %13830 = sst [smem:[#allocation34_spill]] %s12307_s24  ;;  %p9153_p0 = scmp.ge.s32.totalorder %s12192_s21, 1 }
  0x10   : > { %p406_p1 = scmp.lt.s32.totalorder %s12192_s21, 3  ;;  %p13800_p2 = scmp.eq.s32.totalorder %s12307_s24, 0 }
  0x11   : > { %s12195_s26 = smov [#allocation7]   ;;  %s12196_s29 = smov [#allocation10]  }
  0x12   : > { %p12314_p3 = pnand %p9153_p0, %p406_p1  ;;  %s455_s27 = sshll.u32 %s12195_s26, 4  ;;  %s12320_s27 = int_to_ptr.vmem [resolvable:$true] %s455_s27 }
  0x13   : > { %s479_s30 = sshll.u32 %s12196_s29, 4  ;;  %s12197_s0 = smov [#allocation13]   ;;  %s12328_s30 = int_to_ptr.vmem [resolvable:$true] %s479_s30 }
  0x14   : > { %s13831_s25 = scalar_select %p12314_p3, 1, 0 }
  0x15   : > { %p10619_p4 = pneg %p12314_p3  ;;  %s12330_s17 = sshll.u32 %s12197_s0, 4  ;;  %s507_s17 = int_to_ptr.vmem [resolvable:$true] %s12330_s17 }
  0x16   : > { %s13833_s2 = sld [smem:[#allocation43_spill]] }
  0x17   : > { %p12324_p5 = pnand %p13800_p2, %p10619_p4 }
  0x19   : > { %p12340_p7 = pneg %p12324_p5 }
  0x1c   : > { %s11734_s20 = scalar_lea.hbm %s13833_s2, 16 }
  0x1d   : > { %p11735_p6 = scmp.ne.s32.totalorder %s13833_s2, %s11734_s20  ;;  %p11741_p10 = scmp.lt.u32.totalorder %s11734_s20, %s13833_s2 }
  0x1f   : > { %p11737_p8 = pnand %p12340_p7, %p11735_p6 }
  0x21   : > { %p11738_p9 = pneg %p11737_p8 }
  0x23   : > { %p11743_p11 = pnand %p11741_p10, %p11738_p9 }
  0x25   : > { %11746 = shalt.err (!%p11743_p11)
}
  0x26   : > { %s11747_s18 = scalar_lea.vmem %s12312_s23, 16  ;;  %s11754_s19 = scalar_lea.vmem %s12312_s23, 32 }
  0x27   : > { %p11748_p12 = scmp.ne.s32.totalorder %s12312_s23, %s11747_s18  ;;  %p11755_p1 = scmp.lt.s32.totalorder %s12312_s23, %s12312_s23 }
  0x28   : > { %p11756_p4 = scmp.lt.s32.totalorder %s11754_s19, %s11747_s18 }
  0x29   : > { %p11750_p13 = pnand %p11748_p12, %p12340_p7 }
  0x2a   : > { %p11757_p6 = por %p11756_p4, %p11755_p1 }
  0x2b   : > { %p11751_p0 = pneg %p11750_p13 }
  0x2d   : > { %p11758_p8 = pnand %p11757_p6, %p11751_p0 }
  0x2f   : > { %11761 = shalt.err (!%p11758_p8)
}
  0x30   : > { %10625 = dma.hbm_to_vmem [thread:$0]  (!%p12324_p5), %s13833_s2, 16, %s12312_s23, [#allocation5]  }
  0x31   : > { %s13835_s4 = sld [smem:[#allocation44_spill]] }
  0x37   : > { %s11762_s0 = scalar_lea.hbm %s13835_s4, 9216 }
  0x38   : > { %p11763_p9 = scmp.ne.s32.totalorder %s13835_s4, %s11762_s0  ;;  %p11769_p12 = scmp.lt.u32.totalorder %s11762_s0, %s13835_s4 }
  0x3a   : > { %p11765_p10 = pnand %p11763_p9, %p12340_p7 }
  0x3c   : > { %p11766_p11 = pneg %p11765_p10 }
  0x3e   : > { %p11771_p13 = pnand %p11769_p12, %p11766_p11 }
  0x40   : > { %11774 = shalt.err (!%p11771_p13)
}
  0x41   : > { %s11775_s23 = scalar_lea.vmem %s12320_s27, 9216  ;;  %p11783_p6 = scmp.lt.s32.totalorder %s12320_s27, %s12320_s27 }
  0x42   : > { %p11776_p0 = scmp.ne.s32.totalorder %s12320_s27, %s11775_s23  ;;  %p11784_p8 = scmp.lt.s32.totalorder %s11775_s23, %s11775_s23 }
  0x44   : > { %p11778_p1 = pnand %p11776_p0, %p12340_p7  ;;  %p11785_p9 = por %p11784_p8, %p11783_p6 }
  0x46   : > { %p11779_p4 = pneg %p11778_p1 }
  0x48   : > { %p11786_p10 = pnand %p11785_p9, %p11779_p4 }
  0x4a   : > { %11789 = shalt.err (!%p11786_p10)
}
  0x4b   : > { %s13802_s16 = smov 64   ;;  %s13804_s24 = smov 4  }
  0x4c   : > { %10631 = dma.hbm_to_vmem [thread:$0]  (!%p12324_p5), %s13835_s4, 9216, %s12320_s27, [#allocation8], %s13802_s16, %s13802_s16, %s13804_s24  }
  0x4d   : > { %s11790_s0 = scalar_lea.hbm %s13786_s6, 128 }
  0x4e   : > { %p11791_p11 = scmp.ne.s32.totalorder %s13786_s6, %s11790_s0  ;;  %p11797_p0 = scmp.lt.u32.totalorder %s11790_s0, %s13786_s6 }
  0x50   : > { %p11793_p12 = pnand %p11791_p11, %p12340_p7 }
  0x52   : > { %p11794_p13 = pneg %p11793_p12 }
  0x54   : > { %p11799_p1 = pnand %p11797_p0, %p11794_p13 }
  0x56   : > { %11802 = shalt.err (!%p11799_p1)
}
  0x57   : > { %s11803_s27 = scalar_lea.vmem %s12328_s30, 128  ;;  %p11811_p9 = scmp.lt.s32.totalorder %s12328_s30, %s12328_s30 }
  0x58   : > { %p11804_p4 = scmp.ne.s32.totalorder %s12328_s30, %s11803_s27  ;;  %p11812_p10 = scmp.lt.s32.totalorder %s11803_s27, %s11803_s27 }
  0x5a   : > { %p11806_p6 = pnand %p11804_p4, %p12340_p7  ;;  %p11813_p11 = por %p11812_p10, %p11811_p9 }
  0x5c   : > { %p11807_p8 = pneg %p11806_p6 }
  0x5e   : > { %p11814_p12 = pnand %p11813_p11, %p11807_p8 }
  0x60   : > { %11817 = shalt.err (!%p11814_p12)
}
  0x61   : > { %10637 = dma.hbm_to_vmem [thread:$0]  (!%p12324_p5), %s13786_s6, 128, %s12328_s30, [#allocation11], %s13802_s16, %s13802_s16, %s13804_s24  }
  0x62   : > { %s11818_s29 = scalar_lea.hbm %s13788_s8, 64 }
  0x63   : > { %p11819_p13 = scmp.ne.s32.totalorder %s13788_s8, %s11818_s29  ;;  %p11825_p4 = scmp.lt.u32.totalorder %s11818_s29, %s13788_s8 }
  0x65   : > { %p11821_p0 = pnand %p11819_p13, %p12340_p7 }
  0x67   : > { %p11822_p1 = pneg %p11821_p0 }
  0x69   : > { %p11827_p6 = pnand %p11825_p4, %p11822_p1 }
  0x6b   : > { %11830 = shalt.err (!%p11827_p6)
}
  0x6c   : > { %s11831_s27 = scalar_lea.vmem %s507_s17, 64  ;;  %p11839_p11 = scmp.lt.s32.totalorder %s507_s17, %s507_s17 }
  0x6d   : > { %p11832_p8 = scmp.ne.s32.totalorder %s507_s17, %s11831_s27  ;;  %p11840_p12 = scmp.lt.s32.totalorder %s11831_s27, %s11831_s27 }
  0x6f   : > { %p11834_p9 = pnand %p11832_p8, %p12340_p7  ;;  %p11841_p2 = por %p11840_p12, %p11839_p11 }
  0x71   : > { %p11835_p10 = pneg %p11834_p9 }
  0x73   : > { %p11842_p3 = pnand %p11841_p2, %p11835_p10 }
  0x75   : > { %11845 = shalt.err (!%p11842_p3)
}
  0x76   : > { %10643 = dma.hbm_to_vmem [thread:$0]  (!%p12324_p5), %s13788_s8, 64, %s507_s17, [#allocation14]  }
  0x77   : > { %s12200_s20 = smov [#allocation16]   ;;  %s12201_s26 = smov [#allocation19]  }
  0x78   : > { %s527_s22 = sshll.u32 %s12200_s20, 4  ;;  %s551_s29 = sshll.u32 %s12201_s26, 4  ;;  %s528_s22 = int_to_ptr.vmem [resolvable:$true] %s527_s22  ;;  %s552_s29 = int_to_ptr.vmem [resolvable:$true] %s551_s29 }
  0x79   : > { %s11846_s19 = scalar_lea.hbm %s13790_s10, 16384 }
  0x7a   : > { %p11847_p2 = scmp.ne.s32.totalorder %s13790_s10, %s11846_s19  ;;  %p11853_p0 = scmp.lt.u32.totalorder %s11846_s19, %s13790_s10 }
  0x7c   : > { %p11849_p3 = pnand %p11847_p2, %p12340_p7 }
  0x7e   : > { %p11850_p13 = pneg %p11849_p3 }
  0x80   : > { %p11855_p1 = pnand %p11853_p0, %p11850_p13 }
  0x82   : > { %11858 = shalt.err (!%p11855_p1)
}
  0x83   : > { %s11859_s17 = scalar_lea.vmem %s528_s22, 16384  ;;  %p11867_p9 = scmp.lt.s32.totalorder %s528_s22, %s528_s22 }
  0x84   : > { %p11860_p4 = scmp.ne.s32.totalorder %s528_s22, %s11859_s17  ;;  %p11868_p10 = scmp.lt.s32.totalorder %s11859_s17, %s11859_s17 }
  0x86   : > { %p11862_p6 = pnand %p11860_p4, %p12340_p7  ;;  %p11869_p11 = por %p11868_p10, %p11867_p9 }
  0x88   : > { %p11863_p8 = pneg %p11862_p6 }
  0x8a   : > { %p11870_p12 = pnand %p11869_p11, %p11863_p8 }
  0x8c   : > { %11873 = shalt.err (!%p11870_p12)
}
  0x8d   : > { %s13806_s2 = smov 256   ;;  %s13807_s20 = smov 16  }
  0x8e   : > { %10649 = dma.hbm_to_vmem [thread:$0]  (!%p12324_p5), %s13790_s10, 16384, %s528_s22, [#allocation17], %s13806_s2, %s13806_s2, %s13807_s20  }
  0x8f   : > { %s11874_s19 = scalar_lea.hbm %s13792_s12, 16384 }
  0x90   : > { %p11875_p2 = scmp.ne.s32.totalorder %s13792_s12, %s11874_s19  ;;  %p11881_p0 = scmp.lt.u32.totalorder %s11874_s19, %s13792_s12 }
  0x92   : > { %p11877_p3 = pnand %p11875_p2, %p12340_p7 }
  0x94   : > { %p11878_p13 = pneg %p11877_p3 }
  0x96   : > { %p11883_p1 = pnand %p11881_p0, %p11878_p13 }
  0x98   : > { %11886 = shalt.err (!%p11883_p1)
}
  0x99   : > { %s11887_s16 = scalar_lea.vmem %s552_s29, 16384  ;;  %p11895_p9 = scmp.lt.s32.totalorder %s552_s29, %s552_s29 }
  0x9a   : > { %p11888_p4 = scmp.ne.s32.totalorder %s552_s29, %s11887_s16  ;;  %p11896_p10 = scmp.lt.s32.totalorder %s11887_s16, %s11887_s16 }
  0x9c   : > { %p11890_p6 = pnand %p11888_p4, %p12340_p7  ;;  %p11897_p11 = por %p11896_p10, %p11895_p9 }
  0x9e   : > { %p11891_p8 = pneg %p11890_p6 }
  0xa0   : > { %p11898_p12 = pnand %p11897_p11, %p11891_p8 }
  0xa2   : > { %11901 = shalt.err (!%p11898_p12)
}
  0xa3   : > { %10655 = dma.hbm_to_vmem [thread:$0]  (!%p12324_p5), %s13792_s12, 16384, %s552_s29, [#allocation20], %s13806_s2, %s13806_s2, %s13807_s20  }
  0xa4   : > { %s12204_s0 = smov [#allocation22]   ;;  %s12205_s19 = smov [#allocation2]  }
  0xa5   : > { %s575_s18 = sshll.u32 %s12204_s0, 4  ;;  %s418_s23 = sshll.u32 %s12205_s19, 4  ;;  %s576_s18 = int_to_ptr.vmem [resolvable:$true] %s575_s18  ;;  %s419_s23 = int_to_ptr.vmem [resolvable:$true] %s418_s23 }
  0xa6   : > { %s11902_s17 = scalar_lea.hbm %s13794_s14, 4096 }
  0xa7   : > { %p11903_p2 = scmp.ne.s32.totalorder %s13794_s14, %s11902_s17  ;;  %p11909_p0 = scmp.lt.u32.totalorder %s11902_s17, %s13794_s14 }
  0xa9   : > { %p11905_p3 = pnand %p11903_p2, %p12340_p7 }
  0xab   : > { %p11906_p13 = pneg %p11905_p3 }
  0xad   : > { %p11911_p1 = pnand %p11909_p0, %p11906_p13 }
  0xaf   : > { %11914 = shalt.err (!%p11911_p1)
}
  0xb0   : > { %s11915_s29 = scalar_lea.vmem %s576_s18, 4096  ;;  %p11923_p9 = scmp.lt.s32.totalorder %s576_s18, %s576_s18 }
  0xb1   : > { %p11916_p4 = scmp.ne.s32.totalorder %s576_s18, %s11915_s29  ;;  %p11924_p10 = scmp.lt.s32.totalorder %s11915_s29, %s11915_s29 }
  0xb3   : > { %p11918_p6 = pnand %p11916_p4, %p12340_p7  ;;  %p11925_p11 = por %p11924_p10, %p11923_p9 }
  0xb5   : > { %p11919_p8 = pneg %p11918_p6 }
  0xb7   : > { %p11926_p12 = pnand %p11925_p11, %p11919_p8 }
  0xb9   : > { %11929 = shalt.err (!%p11926_p12)
}
  0xba   : > { %s13836_s24 = smov 4   ;;  %s13837_s26 = smov 64  }
  0xbb   : > { %10661 = dma.hbm_to_vmem [thread:$0]  (!%p12324_p5), %s13794_s14, 4096, %s576_s18, [#allocation23], %s13837_s26, %s13837_s26, %s13836_s24  }
  0xbc   : > { %s11930_s30 = scalar_lea.hbm %s13781_s1, 9216 }
  0xbd   : > { %p11931_p2 = scmp.ne.s32.totalorder %s13781_s1, %s11930_s30  ;;  %p11937_p0 = scmp.lt.u32.totalorder %s11930_s30, %s13781_s1 }
  0xbf   : > { %p11933_p3 = pnand %p11931_p2, %p12340_p7 }
  0xc1   : > { %p11934_p13 = pneg %p11933_p3 }
  0xc3   : > { %p11939_p1 = pnand %p11937_p0, %p11934_p13 }
  0xc5   : > { %11942 = shalt.err (!%p11939_p1)
}
  0xc6   : > { %s11943_s4 = scalar_lea.vmem %s419_s23, 9216  ;;  %p11951_p9 = scmp.lt.s32.totalorder %s419_s23, %s419_s23 }
  0xc7   : > { %p11944_p4 = scmp.ne.s32.totalorder %s419_s23, %s11943_s4  ;;  %p11952_p10 = scmp.lt.s32.totalorder %s11943_s4, %s11943_s4 }
  0xc9   : > { %p11946_p6 = pnand %p11944_p4, %p12340_p7  ;;  %p11953_p11 = por %p11952_p10, %p11951_p9 }
  0xcb   : > { %p11947_p8 = pneg %p11946_p6 }
  0xcd   : > { %p11954_p12 = pnand %p11953_p11, %p11947_p8 }
  0xcf   : > { %11957 = shalt.err (!%p11954_p12)
}
  0xd0   : > { %10622 = dma.hbm_to_vmem [thread:$0]  (!%p12324_p5), %s13781_s1, 9216, %s419_s23, [#allocation3], %s13837_s26, %s13837_s26, %s13836_s24  }
  0xd1   : > { %s12206_s19 = smov [#allocation6]   ;;  %s12207_s30 = smov [#allocation9]  }
  0xd2   : > { %s442_s27 = sshll.u32 %s12206_s19, 4  ;;  %s469_s17 = sshll.u32 %s12207_s30, 4  ;;  %s443_s27 = int_to_ptr.vmem [resolvable:$true] %s442_s27  ;;  %s470_s17 = int_to_ptr.vmem [resolvable:$true] %s469_s17 }
  0xd3   : > { %s11958_s29 = scalar_lea.hbm %s13783_s3, 320 }
  0xd4   : > { %p11959_p2 = scmp.ne.s32.totalorder %s13783_s3, %s11958_s29  ;;  %p11965_p0 = scmp.lt.u32.totalorder %s11958_s29, %s13783_s3 }
  0xd6   : > { %p11961_p3 = pnand %p11959_p2, %p12340_p7 }
  0xd8   : > { %p11962_p13 = pneg %p11961_p3 }
  0xda   : > { %p11967_p1 = pnand %p11965_p0, %p11962_p13 }
  0xdc   : > { %11970 = shalt.err (!%p11967_p1)
}
  0xdd   : > { %s11971_s23 = scalar_lea.vmem %s443_s27, 320  ;;  %p11979_p9 = scmp.lt.s32.totalorder %s443_s27, %s443_s27 }
  0xde   : > { %p11972_p4 = scmp.ne.s32.totalorder %s443_s27, %s11971_s23  ;;  %p11980_p10 = scmp.lt.s32.totalorder %s11971_s23, %s11971_s23 }
  0xe0   : > { %p11974_p6 = pnand %p11972_p4, %p12340_p7  ;;  %p11981_p11 = por %p11980_p10, %p11979_p9 }
  0xe2   : > { %p11975_p8 = pneg %p11974_p6 }
  0xe4   : > { %p11982_p12 = pnand %p11981_p11, %p11975_p8 }
  0xe6   : > { %11985 = shalt.err (!%p11982_p12)
}
  0xe7   : > { %10628 = dma.hbm_to_vmem [thread:$0]  (!%p12324_p5), %s13783_s3, 320, %s443_s27, [#allocation5], %s13837_s26, %s13837_s26, %s13836_s24  }
  0xe8   : > { %s11986_s30 = scalar_lea.hbm %s13785_s5, 16 }
  0xe9   : > { %p11987_p2 = scmp.ne.s32.totalorder %s13785_s5, %s11986_s30  ;;  %p11993_p0 = scmp.lt.u32.totalorder %s11986_s30, %s13785_s5 }
  0xeb   : > { %p11989_p3 = pnand %p11987_p2, %p12340_p7 }
  0xed   : > { %p11990_p13 = pneg %p11989_p3 }
  0xef   : > { %p11995_p1 = pnand %p11993_p0, %p11990_p13 }
  0xf1   : > { %11998 = shalt.err (!%p11995_p1)
}
  0xf2   : > { %s11999_s18 = scalar_lea.vmem %s470_s17, 16  ;;  %s12006_s24 = scalar_lea.vmem %s470_s17, 32 }
  0xf3   : > { %p12000_p4 = scmp.ne.s32.totalorder %s470_s17, %s11999_s18  ;;  %p12007_p9 = scmp.lt.s32.totalorder %s470_s17, %s470_s17 }
  0xf4   : > { %p12008_p10 = scmp.lt.s32.totalorder %s12006_s24, %s11999_s18 }
  0xf5   : > { %p12002_p6 = pnand %p12000_p4, %p12340_p7 }
  0xf6   : > { %p12009_p11 = por %p12008_p10, %p12007_p9 }
  0xf7   : > { %p12003_p8 = pneg %p12002_p6 }
  0xf9   : > { %p12010_p12 = pnand %p12009_p11, %p12003_p8 }
  0xfb   : > { %12013 = shalt.err (!%p12010_p12)
}
  0xfc   : > { %10634 = dma.hbm_to_vmem [thread:$0]  (!%p12324_p5), %s13785_s5, 16, %s470_s17, [#allocation8]  }
  0xfd   : > { %s12208_s23 = smov [#allocation12]   ;;  %s12209_s20 = smov [#allocation15]  }
  0xfe   : > { %s492_s2 = sshll.u32 %s12208_s23, 4  ;;  %s517_s0 = sshll.u32 %s12209_s20, 4  ;;  %s493_s2 = int_to_ptr.vmem [resolvable:$true] %s492_s2  ;;  %s518_s0 = int_to_ptr.vmem [resolvable:$true] %s517_s0 }
  0xff   : > { %s12014_s16 = scalar_lea.hbm %s13787_s7, 36864 }
 0x100   : > { %p12015_p2 = scmp.ne.s32.totalorder %s13787_s7, %s12014_s16  ;;  %p12021_p0 = scmp.lt.u32.totalorder %s12014_s16, %s13787_s7 }
 0x102   : > { %p12017_p3 = pnand %p12015_p2, %p12340_p7 }
 0x104   : > { %p12018_p13 = pneg %p12017_p3 }
 0x106   : > { %p12023_p1 = pnand %p12021_p0, %p12018_p13 }
 0x108   : > { %12026 = shalt.err (!%p12023_p1)
}
 0x109   : > { %s12027_s17 = scalar_lea.vmem %s493_s2, 36864  ;;  %p12035_p9 = scmp.lt.s32.totalorder %s493_s2, %s493_s2 }
 0x10a   : > { %p12028_p4 = scmp.ne.s32.totalorder %s493_s2, %s12027_s17  ;;  %p12036_p10 = scmp.lt.s32.totalorder %s12027_s17, %s12027_s17 }
 0x10c   : > { %p12030_p6 = pnand %p12028_p4, %p12340_p7  ;;  %p12037_p11 = por %p12036_p10, %p12035_p9 }
 0x10e   : > { %p12031_p8 = pneg %p12030_p6 }
 0x110   : > { %p12038_p12 = pnand %p12037_p11, %p12031_p8 }
 0x112   : > { %12041 = shalt.err (!%p12038_p12)
}
 0x113   : > { %s13838_s24 = smov 16   ;;  %s13839_s26 = smov 256  }
 0x114   : > { %10640 = dma.hbm_to_vmem [thread:$0]  (!%p12324_p5), %s13787_s7, 36864, %s493_s2, [#allocation11], %s13839_s26, %s13839_s26, %s13838_s24  }
 0x115   : > { %s12042_s30 = scalar_lea.hbm %s13789_s9, 64 }
 0x116   : > { %p12043_p2 = scmp.ne.s32.totalorder %s13789_s9, %s12042_s30  ;;  %p12049_p0 = scmp.lt.u32.totalorder %s12042_s30, %s13789_s9 }
 0x118   : > { %p12045_p3 = pnand %p12043_p2, %p12340_p7 }
 0x11a   : > { %p12046_p13 = pneg %p12045_p3 }
 0x11c   : > { %p12051_p1 = pnand %p12049_p0, %p12046_p13 }
 0x11e   : > { %12054 = shalt.err (!%p12051_p1)
}
 0x11f   : > { %s12055_s18 = scalar_lea.vmem %s518_s0, 64  ;;  %p12063_p9 = scmp.lt.s32.totalorder %s518_s0, %s518_s0 }
 0x120   : > { %p12056_p4 = scmp.ne.s32.totalorder %s518_s0, %s12055_s18  ;;  %p12064_p10 = scmp.lt.s32.totalorder %s12055_s18, %s12055_s18 }
 0x122   : > { %p12058_p6 = pnand %p12056_p4, %p12340_p7  ;;  %p12065_p11 = por %p12064_p10, %p12063_p9 }
 0x124   : > { %p12059_p8 = pneg %p12058_p6 }
 0x126   : > { %p12066_p12 = pnand %p12065_p11, %p12059_p8 }
 0x128   : > { %12069 = shalt.err (!%p12066_p12)
}
 0x129   : > { %10646 = dma.hbm_to_vmem [thread:$0]  (!%p12324_p5), %s13789_s9, 64, %s518_s0, [#allocation14]  }
 0x12a   : > { %s12210_s24 = smov [#allocation18]   ;;  %s12211_s27 = smov [#allocation21]  }
 0x12b   : > { %s541_s26 = sshll.u32 %s12210_s24, 4  ;;  %s565_s23 = sshll.u32 %s12211_s27, 4  ;;  %s542_s26 = int_to_ptr.vmem [resolvable:$true] %s541_s26  ;;  %s566_s23 = int_to_ptr.vmem [resolvable:$true] %s565_s23 }
 0x12c   : > { %s12070_s30 = scalar_lea.hbm %s13791_s11, 64 }
 0x12d   : > { %p12071_p2 = scmp.ne.s32.totalorder %s13791_s11, %s12070_s30  ;;  %p12077_p0 = scmp.lt.u32.totalorder %s12070_s30, %s13791_s11 }
 0x12f   : > { %p12073_p3 = pnand %p12071_p2, %p12340_p7 }
 0x131   : > { %p12074_p13 = pneg %p12073_p3 }
 0x133   : > { %p12079_p1 = pnand %p12077_p0, %p12074_p13 }
 0x135   : > { %12082 = shalt.err (!%p12079_p1)
}
 0x136   : > { %s12083_s0 = scalar_lea.vmem %s542_s26, 64  ;;  %p12091_p9 = scmp.lt.s32.totalorder %s542_s26, %s542_s26 }
 0x137   : > { %p12084_p4 = scmp.ne.s32.totalorder %s542_s26, %s12083_s0  ;;  %p12092_p10 = scmp.lt.s32.totalorder %s12083_s0, %s12083_s0 }
 0x139   : > { %p12086_p6 = pnand %p12084_p4, %p12340_p7  ;;  %p12093_p11 = por %p12092_p10, %p12091_p9 }
 0x13b   : > { %p12087_p8 = pneg %p12086_p6 }
 0x13d   : > { %p12094_p12 = pnand %p12093_p11, %p12087_p8 }
 0x13f   : > { %12097 = shalt.err (!%p12094_p12)
}
 0x140   : > { %10652 = dma.hbm_to_vmem [thread:$0]  (!%p12324_p5), %s13791_s11, 64, %s542_s26, [#allocation17]  }
 0x141   : > { %s12098_s27 = scalar_lea.hbm %s13793_s13, 64 }
 0x142   : > { %p12099_p2 = scmp.ne.s32.totalorder %s13793_s13, %s12098_s27  ;;  %p12105_p0 = scmp.lt.u32.totalorder %s12098_s27, %s13793_s13 }
 0x144   : > { %p12101_p3 = pnand %p12099_p2, %p12340_p7 }
 0x146   : > { %p12102_p13 = pneg %p12101_p3 }
 0x148   : > { %p12107_p1 = pnand %p12105_p0, %p12102_p13 }
 0x14a   : > { %12110 = shalt.err (!%p12107_p1)
}
 0x14b   : > { %s12111_s22 = scalar_lea.vmem %s566_s23, 64  ;;  %p12119_p9 = scmp.lt.s32.totalorder %s566_s23, %s566_s23 }
 0x14c   : > { %p12112_p4 = scmp.ne.s32.totalorder %s566_s23, %s12111_s22  ;;  %p12120_p10 = scmp.lt.s32.totalorder %s12111_s22, %s12111_s22 }
 0x14e   : > { %p12114_p6 = pnand %p12112_p4, %p12340_p7  ;;  %p12121_p11 = por %p12120_p10, %p12119_p9 }
 0x150   : > { %p12115_p8 = pneg %p12114_p6 }
 0x152   : > { %p12122_p12 = pnand %p12121_p11, %p12115_p8 }
 0x154   : > { %12125 = shalt.err (!%p12122_p12)
}
 0x155   : > { %10658 = dma.hbm_to_vmem [thread:$0]  (!%p12324_p5), %s13793_s13, 64, %s566_s23, [#allocation20]  }
 0x156   : > { %s12212_s4 = smov [#allocation24]   ;;  %s12126_s17 = scalar_lea.hbm %s13795_s15, 16 }
 0x157   : > { %s589_s0 = sshll.u32 %s12212_s4, 4  ;;  %p12127_p2 = scmp.ne.s32.totalorder %s13795_s15, %s12126_s17  ;;  %s590_s0 = int_to_ptr.vmem [resolvable:$true] %s589_s0 }
 0x158   : > { %p12133_p0 = scmp.lt.u32.totalorder %s12126_s17, %s13795_s15 }
 0x159   : > { %p12129_p3 = pnand %p12127_p2, %p12340_p7 }
 0x15b   : > { %p12130_p13 = pneg %p12129_p3 }
 0x15d   : > { %p12135_p1 = pnand %p12133_p0, %p12130_p13 }
 0x15f   : > { %12138 = shalt.err (!%p12135_p1)
}
 0x160   : > { %s12139_s23 = scalar_lea.vmem %s590_s0, 16  ;;  %s12146_s30 = scalar_lea.vmem %s590_s0, 32 }
 0x161   : > { %p12140_p4 = scmp.ne.s32.totalorder %s590_s0, %s12139_s23  ;;  %p12147_p9 = scmp.lt.s32.totalorder %s590_s0, %s590_s0 }
 0x162   : > { %p12148_p10 = scmp.lt.s32.totalorder %s12146_s30, %s12139_s23 }
 0x163   : > { %p12142_p6 = pnand %p12140_p4, %p12340_p7 }
 0x164   : > { %p12149_p11 = por %p12148_p10, %p12147_p9 }
 0x165   : > { %p12143_p8 = pneg %p12142_p6 }
 0x167   : > { %p12150_p12 = pnand %p12149_p11, %p12143_p8 }
 0x169   : > { %12153 = shalt.err (!%p12150_p12)
}
 0x16a   : > { %10664 = dma.hbm_to_vmem [thread:$0]  (!%p12324_p5), %s13795_s15, 16, %s590_s0, [#allocation23]  }
 0x16b   : > { %p13840_p2 = scmp.ne.s32.totalorder %s13831_s25, 0 }
 0x16d   : > { %610 = sbr.rel (%p13840_p2) target bundleno = 3086 (0xc0e), region = 84 }
 0x174   : > { %s13841_s26 = sld [smem:[#allocation34_spill]] }
 0x17a   : > { %p13842_p3 = scmp.eq.s32.totalorder %s13841_s26, 0 }
 0x17c   : > { %12159 = dma.done.wait (%p13842_p3), [#allocation3], 9216   ;;  %p13843_p7 = pmov %p13842_p3 }
 0x17d   : > { %p13844_p13 = pmov %p13842_p3 }
 0x17e   : > { %12161 = vsyncadd (%p13843_p7), [#allocation3], 4294958080 }
 0x17f   : > { %12163 = dma.done.wait (%p13844_p13), [#allocation5], 336   ;;  %p13845_p0 = pmov %p13842_p3 }
 0x181   : > { %12165 = vsyncadd (%p13845_p0), [#allocation5], 4294966960  ;;  %p13846_p1 = pmov %p13845_p0 }
 0x182   : > { %p13847_p5 = pmov %p13845_p0 }
 0x183   : > { %12167 = dma.done.wait (%p13846_p1), [#allocation8], 9232  }
 0x184   : > { %12169 = vsyncadd (%p13847_p5), [#allocation8], 4294958064  ;;  %p13848_p4 = pmov %p13845_p0 }
 0x185   : > { %p13849_p6 = pmov %p13845_p0 }
 0x186   : > { %12171 = dma.done.wait (%p13848_p4), [#allocation11], 36992  }
 0x187   : > { %12173 = vsyncadd (%p13849_p6), [#allocation11], 4294930304  ;;  %p13850_p8 = pmov %p13845_p0 }
 0x188   : > { %p13851_p9 = pmov %p13845_p0 }
 0x189   : > { %12175 = dma.done.wait (%p13850_p8), [#allocation14], 128  }
 0x18a   : > { %12177 = vsyncadd (%p13851_p9), [#allocation14], 4294967168  ;;  %p13852_p10 = pmov %p13845_p0 }
 0x18b   : > { %p13853_p11 = pmov %p13845_p0 }
 0x18c   : > { %12179 = dma.done.wait (%p13852_p10), [#allocation17], 16448  }
 0x18d   : > { %12181 = vsyncadd (%p13853_p11), [#allocation17], 4294950848  ;;  %p13854_p12 = pmov %p13845_p0 }
 0x18e   : > { %p13855_p2 = pmov %p13845_p0 }
 0x18f   : > { %12183 = dma.done.wait (%p13854_p12), [#allocation20], 16448  }
 0x190   : > { %12185 = vsyncadd (%p13855_p2), [#allocation20], 4294950848  ;;  %p13856_p3 = pmov %p13845_p0 }
 0x191   : > { %p13857_p7 = pmov %p13845_p0 }
 0x192   : > { %12187 = dma.done.wait (%p13856_p3), [#allocation23], 4112  }
 0x193   : > { %12189 = vsyncadd (%p13857_p7), [#allocation23], 4294963184  ;;  %v10725_v0 = vld [vmem:[#allocation2 + $0x40] sm:$0xff]   ;;  %v10729_v4 = vld [vmem:[#allocation2 + $0x48] sm:$0xff]   ;;  %p715_p13 = scmp.lt.s32.totalorder %s13841_s26, 1  ;;  %s13858_s29 = sld [smem:[#allocation42_spill]] }
 0x194   : > { %v10726_v1 = vld [vmem:[#allocation2] sm:$0xff]   ;;  %9934 = vmatprep.subr.bf16.mxu0 %v10725_v0  ;;  %v10730_v5 = vld [vmem:[#allocation2 + $0x8] sm:$0xff]   ;;  %v10733_v8 = vld [vmem:[#allocation2 + $0x50] sm:$0xff]   ;;  %vm751_vm0 = vcmask 1047556   ;;  %vm791_vm1 = vcmask 1046528   ;;  %vm830_vm2 = vcmask 1045504  }
 0x195   : > { %v10727_v2 = vld [vmem:[#allocation2 + $0xc0] sm:$0xff]   ;;  %9935 = vmatpush3.bf16.msra.mxu0 %v10726_v1  ;;  %v10731_v6 = vld [vmem:[#allocation2 + $0xc8] sm:$0xff]   ;;  %v10734_v9 = vld [vmem:[#allocation2 + $0x10] sm:$0xff]   ;;  %s13885_s26 = smov (!%p715_p13, %s13841_s26), 1  ;;  %vm1198_vm3 = vsmask.f32 7424 }
 0x196   : > { %v10728_v3 = vld [vmem:[#allocation2 + $0x80] sm:$0xff]   ;;  %9992 = vmatprep.subr.bf16.mxu1 %v10727_v2  ;;  %9936 = vmatprep.subr.bf16.mxu0 %v10729_v4  ;;  %v10732_v7 = vld [vmem:[#allocation2 + $0x88] sm:$0xff]   ;;  %v10735_v10 = vld [vmem:[#allocation2 + $0xd0] sm:$0xff]   ;;  %s10558_s21 = smul.u32 52, %s13885_s26  ;;  %vm886_vm4 = vcmask 1040384   ;;  %vm12214_vm5 = vmmov 0  }
 0x197   : > { %9993 = vmatpush3.bf16.msra.mxu1 %v10728_v3  ;;  %v10736_v11 = vld [vmem:[#allocation2 + $0x90] sm:$0xff]   ;;  %v10737_v12 = vld [vmem:[#allocation2 + $0x58] sm:$0xff]   ;;  %v10741_v16 = vld [vmem:[#allocation2 + $0x60] sm:$0xff]   ;;  %vm2741_vm6 = vcmask 1044480   ;;  %vm2828_vm7 = vcmask 1041408   ;;  %vm2818_vm8 = vcmask 818176  }
 0x198   : > { %9994 = vmatprep.subr.bf16.mxu1 %v10731_v6  ;;  %v10738_v13 = vld [vmem:[#allocation2 + $0x18] sm:$0xff]   ;;  %v10742_v17 = vld [vmem:[#allocation2 + $0x20] sm:$0xff]   ;;  %v10745_v20 = vld [vmem:[#allocation2 + $0x68] sm:$0xff]   ;;  %vm2972_vm9 = vcmask 1043456   ;;  %vm3186_vm10 = vsmask.f32 5376 }
 0x199   : > { %9937 = vmatpush3.bf16.msra.mxu0 %v10730_v5  ;;  %v10739_v14 = vld [vmem:[#allocation2 + $0xd8] sm:$0xff]   ;;  %v10743_v18 = vld [vmem:[#allocation2 + $0xe0] sm:$0xff]   ;;  %v10746_v21 = vld [vmem:[#allocation2 + $0x28] sm:$0xff]   ;;  %s12691_s4 = scalar_lea.vmem %s13858_s29, %s10558_s21  ;;  %vm4246_vm11 = vcmask 293888   ;;  %s9187_s0 = sshll.u32 %s13885_s26, 3 }
 0x19a   : > { %9938 = vmatprep.subr.bf16.mxu0 %v10733_v8  ;;  %v10740_v15 = vld [vmem:[#allocation2 + $0x98] sm:$0xff]   ;;  %v10744_v19 = vld [vmem:[#allocation2 + $0xa0] sm:$0xff]   ;;  %v10747_v22 = vld [vmem:[#allocation2 + $0xe8] sm:$0xff]   ;;  %s13882_s17 = sld [smem:[#allocation45_spill]] }
 0x19b   : > { %9995 = vmatpush3.bf16.msra.mxu1 %v10732_v7  ;;  %v10748_v23 = vld [vmem:[#allocation2 + $0xa8] sm:$0xff]   ;;  %v10749_v24 = vld [vmem:[#allocation2 + $0x70] sm:$0xff]   ;;  %v10753_v28 = vld [vmem:[#allocation2 + $0x78] sm:$0xff]  }
 0x19c   : > { %9996 = vmatprep.subr.bf16.mxu1 %v10735_v10  ;;  %v10750_v25 = vld [vmem:[#allocation2 + $0x30] sm:$0xff]   ;;  %v10754_v29 = vld [vmem:[#allocation2 + $0x38] sm:$0xff]   ;;  %v12694_v31 = vld [vmem:[%s12691_s4] sm:$0xf] }
 0x19d   : > { %9939 = vmatpush3.bf16.msra.mxu0 %v10734_v9  ;;  %v10751_v26 = vld [vmem:[#allocation2 + $0xf0] sm:$0xff]   ;;  %v10755_v30 = vld [vmem:[#allocation2 + $0xf8] sm:$0xff]   ;;  %v726_v32 = vld [vmem:[%s12691_s4 + $0x4] sm:$0xf]  ;;  %v13811_v37 = vunpack.c.l.bf16 %v12694_v31 }
 0x19e   : > { %9940 = vmatprep.subr.bf16.mxu0 %v10737_v12  ;;  %v10752_v27 = vld [vmem:[#allocation2 + $0xb0] sm:$0xff]   ;;  %v727_v33 = vld [vmem:[%s12691_s4 + $0x8] sm:$0xf]  ;;  %v12699_v34 = vld [vmem:[%s12691_s4 + $0xc] sm:$0xf]  ;;  %v12706_v38 = vunpack.c.l.bf16 %v726_v32  ;;  %v12711_v40 = vcombine.low %v12694_v31, %v726_v32 }
 0x19f   : > { %9997 = vmatpush3.bf16.msra.mxu1 %v10736_v11  ;;  %v736_v35 = vld [vmem:[%s12691_s4 + $0x2c] sm:$0xf]  ;;  %v12703_v36 = vld [vmem:[%s12691_s4 + $0x30] sm:$0x3]  ;;  %v12708_v39 = vunpack.c.l.bf16 %v727_v33  ;;  %v12714_v41 = vunpack.c.l.bf16 %v12699_v34  ;;  %v10756_v44 = vld [vmem:[#allocation2 + $0xb8] sm:$0xff]   ;;  %v12720_v45 = vcombine.low %v727_v33, %v12699_v34  ;;  %v752_v46 = vrot.slane %v13811_v37, 4 }
 0x1a0   : > { %9998 = vmatprep.subr.bf16.mxu1 %v10739_v14  ;;  %v12716_v42 = vunpack.c.l.bf16 %v736_v35  ;;  %v13809_v43 = vunpack.c.l.bf16 %v12703_v36  ;;  %v753_v47 = vrot.slane %v12706_v38, 4  ;;  %v12727_v49 = vld [vmem:[%s12691_s4 + $0x10] sm:$0xf]  ;;  %v10757_v50 = vld [vmem:[#allocation2 + $0x140] sm:$0xff]   ;;  %v12729_v51 = vcombine.low %v726_v32, %v727_v33  ;;  %v12738_v56 = vld [vmem:[%s12691_s4 + $0x14] sm:$0xf]  ;;  %s723_s24 = scalar_lea.vmem %s13882_s17, %s9187_s0 }
 0x1a1   : > { %9941 = vmatpush3.bf16.msra.mxu0 %v10738_v13  ;;  %v754_v48 = vrot.slane %v12708_v39, 4  ;;  %v755_v52 = vrot.slane %v12714_v41, 4  ;;  %v12734_v54 = vunpack.c.l.bf16 %v12727_v49  ;;  %v12750_v60 = vunpack.c.l.bf16 %v12738_v56 }
 0x1a2   : > { %9942 = vmatprep.subr.bf16.mxu0 %v10741_v16  ;;  %v13810_v53 = vrot.slane %v12716_v42, 1  ;;  %v13808_v55 = vrot.slane %v12716_v42, 2  ;;  %v12743_v57 = vsel %vm751_vm0, %v752_v46, %v13809_v43  ;;  %v12746_v58 = vsel %vm751_vm0, %v753_v47, %v752_v46 }
 0x1a3   : > { %9999 = vmatpush3.bf16.msra.mxu1 %v10740_v15  ;;  %13859 = vst [vmem:[#allocation35_spill] sm:$0xff] %v12746_v58  ;;  %v766_v59 = vsel %vm751_vm0, %v754_v48, %v753_v47  ;;  %v12753_v61 = vsel %vm751_vm0, %v755_v52, %v754_v48  ;;  %v793_v62 = vrot.slane %v12743_v57, 1  ;;  %v12757_v63 = vrot.slane %v12746_v58, 1  ;;  %v10763_v48 = vld [vmem:[#allocation2 + $0x1c0] sm:$0xff]  }
 0x1a4   : > { %10000 = vmatprep.subr.bf16.mxu1 %v10743_v18  ;;  %v797_v0 = vrot.slane %v766_v59, 1  ;;  %v799_v1 = vrot.slane %v12753_v61, 1  ;;  %v987_v2 = vpack.c.bf16 %v12743_v57, %v12716_v42  ;;  %v12763_v3 = vpack.c.bf16 %v766_v59, %v12746_v58 }
 0x1a5   : > { %9943 = vmatpush3.bf16.msra.mxu0 %v10742_v17  ;;  %v756_v4 = vrot.slane %v12734_v54, 4  ;;  %v794_v5 = vsel %vm791_vm1, %v13810_v53, %v793_v62  ;;  %v796_v6 = vsel %vm791_vm1, %v793_v62, %v12757_v63  ;;  %v832_v8 = vrot.slane %v12743_v57, 2 }
 0x1a6   : > { %9944 = vmatprep.subr.bf16.mxu0 %v10745_v20  ;;  %v798_v7 = vsel %vm791_vm1, %v12757_v63, %v797_v0  ;;  %v800_v9 = vsel %vm791_vm1, %v797_v0, %v799_v1  ;;  %v988_v10 = vpack.c.bf16 %v796_v6, %v794_v5  ;;  %v1200_v11 = vshrl.u32 %v987_v2, 16  ;;  %v10758_v0 = vld [vmem:[#allocation2 + $0x100] sm:$0xff]  }
 0x1a7   : > { %10001 = vmatpush3.bf16.msra.mxu1 %v10744_v19  ;;  %v1202_v12 = vshll.u32 %v987_v2, 16  ;;  %v997_v13 = vpack.c.bf16 %v800_v9, %v798_v7  ;;  %v1207_v14 = vshll.u32 %v12763_v3, 16  ;;  %v12779_v15 = vsel %vm751_vm0, %v756_v4, %v755_v52  ;;  %v10759_v9 = vld [vmem:[#allocation2 + $0x148] sm:$0xff]  }
 0x1a8   : > { %10002 = vmatprep.subr.bf16.mxu1 %v10747_v22  ;;  %v12782_v16 = vrot.slane %v12746_v58, 2  ;;  %v1212_v17 = vshrl.u32 %v988_v10, 16  ;;  %v1214_v18 = vshll.u32 %v988_v10, 16  ;;  %v836_v20 = vrot.slane %v766_v59, 2 }
 0x1a9   : > { %9945 = vmatpush3.bf16.msra.mxu0 %v10746_v21  ;;  %v12784_v19 = vrot.slane %v1202_v12, 1  ;;  %v1219_v21 = vshll.u32 %v997_v13, 16  ;;  %v1209_v22 = vrot.slane %v1207_v14, 1  ;;  %v833_v33 = vsel %vm830_vm2, %v13808_v55, %v832_v8 }
 0x1aa   : > { %9946 = vmatprep.subr.bf16.mxu0 %v10749_v24  ;;  %13860 = vst [vmem:[#allocation36_spill] sm:$0xff] %v12782_v16  ;;  %v838_v24 = vrot.slane %v12753_v61, 2  ;;  %v757_v7 = vrot.slane %v12750_v60, 4  ;;  %v801_v14 = vrot.slane %v12779_v15, 1 }
 0x1ab   : > { %10003 = vmatpush3.bf16.msra.mxu1 %v10748_v23  ;;  %13861 = vst [vmem:[#allocation37_spill] sm:$0xff] %v12784_v19  ;;  %v835_v23 = vsel %vm830_vm2, %v832_v8, %v12782_v16  ;;  %v12813_v8 = vld [vmem:[%s12691_s4 + $0x18] sm:$0xf] }
 0x1ac   : > { %10004 = vmatprep.subr.bf16.mxu1 %v10751_v26  ;;  %v12792_v26 = vor.u32 %v12784_v19, %v1200_v11  ;;  %v989_v47 = vpack.c.bf16 %v835_v23, %v833_v33  ;;  %v802_v33 = vsel %vm791_vm1, %v799_v1, %v801_v14  ;;  %v12840_v1 = vunpack.c.l.bf16 %v12813_v8 }
 0x1ad   : > { %9947 = vmatpush3.bf16.msra.mxu0 %v10750_v25  ;;  %v12789_v25 = vrot.slane %v1214_v18, 1 }
 0x1ae   : > { %9948 = vmatprep.subr.bf16.mxu0 %v10753_v28  ;;  %13862 = vst [vmem:[#allocation38_spill] sm:$0xff] %v12792_v26  ;;  %v840_v28 = vrot.slane %v12779_v15, 2  ;;  %v1224_v5 = vshrl.u32 %v989_v47, 16  ;;  %v1226_v6 = vshll.u32 %v989_v47, 16 }
 0x1af   : > { %10005 = vmatpush3.bf16.msra.mxu1 %v10752_v27  ;;  %v837_v27 = vsel %vm830_vm2, %v12782_v16, %v836_v20  ;;  %v12802_v35 = vor.u32 %v12789_v25, %v1212_v17  ;;  %v10760_v17 = vld [vmem:[#allocation2 + $0x108] sm:$0xff]  }
 0x1b0   : > { %10006 = vmatprep.subr.bf16.mxu1 %v10755_v30  ;;  %v839_v30 = vsel %vm830_vm2, %v836_v20, %v838_v24  ;;  %v990_v32 = vpack.c.bf16 %v837_v27, %v835_v23  ;;  %v841_v46 = vsel %vm830_vm2, %v838_v24, %v840_v28  ;;  %v12817_v18 = vrot.slane %v1226_v6, 1  ;;  %v10761_v24 = vld [vmem:[#allocation2 + $0x150] sm:$0xff]   ;;  %v10778_v16 = vld [vmem:[#allocation2 + $0x128] sm:$0xff]  }
 0x1b1   : > { %9949 = vmatpush3.bf16.msra.mxu0 %v10754_v29  ;;  %v1221_v29 = vrot.slane %v1219_v21, 1  ;;  %13863 = vst [vmem:[#allocation39_spill] sm:$0xff] %v12802_v35  ;;  %v12807_v62 = vpack.c.bf16 %v839_v30, %v837_v27  ;;  %v12820_v20 = vsel %vm751_vm0, %v757_v7, %v756_v4  ;;  %v1315_v21 = vshrl.u32 %v997_v13, 16  ;;  %v10762_v6 = vld [vmem:[#allocation2 + $0x110] sm:$0xff]  }
 0x1b2   : > { %10050 = vmatprep.subr.bf16.mxu0 %v10757_v50  ;;  %v999_v50 = vpack.c.bf16 %v841_v46, %v839_v30  ;;  %v1236_v52 = vshrl.u32 %v990_v32, 16  ;;  %v1238_v59 = vshll.u32 %v990_v32, 16  ;;  %13864 = vst [vmem:[#allocation40_spill] sm:$0xff] %v12817_v18  ;;  %v12824_v23 = vpack.c.bf16 %v12779_v15, %v12753_v61 }
 0x1b3   : > { %10007 = vmatpush3.bf16.msra.mxu1 %v10756_v44  ;;  %v1210_v44 = vsel %vm1198_vm3, %v12792_v26, %v1209_v22  ;;  %v1222_v2 = vsel %vm1198_vm3, %v12802_v35, %v1221_v29  ;;  %v1231_v12 = vshll.u32 %v12807_v62, 16  ;;  %v12833_v47 = vor.u32 %v12817_v18, %v1224_v5 }
 0x1b4   : > { %10108 = vmatprep.subr.bf16.mxu1 %v10763_v48  ;;  %2200 = vmatprep.mubr.bf16.mxu0 %v1222_v2  ;;  %v1240_v10 = vrot.slane %v1238_v59, 1  ;;  %v1243_v11 = vshll.u32 %v999_v50, 16  ;;  %v803_v4 = vrot.slane %v12820_v20, 1  ;;  %v1317_v13 = vor.u32 %v1315_v21, %v1221_v29  ;;  %v10764_v48 = vld [vmem:[#allocation2 + $0x180] sm:$0xff]  }
 0x1b5   : > { %2201 = vmatmul.mubr.bf16.vlgmr.msra.gmra.mrb[0].mxu0 %v1210_v44  ;;  %v1233_v32 = vrot.slane %v1231_v12, 1  ;;  %v12830_v44 = vld [vmem:[%s12691_s4 + $0x1c] sm:$0xf]  ;;  %13865 = vst [vmem:[#allocation41_spill] sm:$0xff] %v12833_v47  ;;  %v1307_v15 = vshrl.u32 %v12763_v3, 16  ;;  %v1311_v61 = vshll.u32 %v12824_v23, 16 }
 0x1b6   : > { %v1241_v27 = vor.u32 %v1240_v10, %v1236_v52  ;;  %v1245_v30 = vrot.slane %v1243_v11, 1  ;;  %10051 = vmatpush3.bf16.msra.mxu0 %v10758_v0  ;;  %v10767_v52 = vld [vmem:[#allocation2 + $0x1c8] sm:$0xff]   ;;  %v842_v0 = vrot.slane %v12820_v20, 2  ;;  %v804_v29 = vsel %vm791_vm1, %v801_v14, %v803_v4  ;;  %v12849_v21 = vld [vmem:[%s12691_s4 + $0x20] sm:$0xf]  ;;  %v10769_v14 = vld [vmem:[#allocation2 + $0x1d0] sm:$0xff]  }
 0x1b7   : > { %10052 = vmatprep.subr.bf16.mxu0 %v10759_v9  ;;  %v1234_v2 = vsel %vm1198_vm3, %v12833_v47, %v1233_v32  ;;  %v1309_v3 = vor.u32 %v1307_v15, %v1209_v22  ;;  %v1331_v5 = vshrl.u32 %v999_v50, 16  ;;  %v1006_v9 = vpack.c.bf16 %v804_v29, %v802_v33 }
 0x1b8   : > { %v1246_v59 = vsel %vm1198_vm3, %v1241_v27, %v1245_v30  ;;  %v1313_v10 = vrot.slane %v1311_v61, 1  ;;  %v758_v11 = vrot.slane %v12840_v1, 4  ;;  %v843_v12 = vsel %vm830_vm2, %v840_v28, %v842_v0  ;;  %v10765_v27 = vld [vmem:[#allocation2 + $0x158] sm:$0xff]  }
 0x1b9   : > { %2288 = vmatprep.mubr.bf16.mxu1 %v1246_v59  ;;  %v10768_v59 = vld [vmem:[#allocation2 + $0x188] sm:$0xff]   ;;  %v12851_v55 = vor.u32 %v1331_v5, %v1245_v30  ;;  %v12853_v43 = vpack.c.bf16 %v843_v12, %v841_v46  ;;  %v1323_v22 = vshrl.u32 %v12807_v62, 16  ;;  %v12857_v50 = vunpack.c.l.bf16 %v12830_v44 }
 0x1ba   : > { %2289 = vmatmul.mubr.bf16.vlgmr.msra.gmra.mrb[0].mxu1 %v1234_v2  ;;  %10053 = vmatpush3.bf16.msra.mxu0 %v10760_v17  ;;  %v1319_v33 = vshll.u32 %v1006_v9, 16  ;;  %v1314_v28 = vsel %vm1198_vm3, %v1309_v3, %v1313_v10  ;;  %v770_v17 = vsel %vm751_vm0, %v758_v11, %v757_v7  ;;  %v1387_v15 = vshrl.u32 %v1006_v9, 16  ;;  %v10766_v2 = vld [vmem:[#allocation2 + $0x118] sm:$0xff]   ;;  %v10770_v3 = vld [vmem:[#allocation2 + $0x190] sm:$0xff]  }
 0x1bb   : > { %10054 = vmatprep.subr.bf16.mxu0 %v10761_v24  ;;  %10109 = vmatpush3.bf16.msra.mxu1 %v10764_v48  ;;  %v844_v30 = vrot.slane %v770_v17, 2  ;;  %v1325_v61 = vor.u32 %v1323_v22, %v1233_v32  ;;  %v1327_v46 = vshll.u32 %v12853_v43, 16  ;;  %v759_v62 = vrot.slane %v12857_v50, 4  ;;  %v12875_v22 = vld [vmem:[%s12691_s4 + $0x24] sm:$0xf] }
 0x1bc   : > { %10110 = vmatprep.subr.bf16.mxu1 %v10767_v52  ;;  %v1321_v29 = vrot.slane %v1319_v33, 1  ;;  %v805_v5 = vrot.slane %v770_v17, 1  ;;  %v12864_v24 = vpack.c.bf16 %v770_v17, %v12820_v20  ;;  %v1379_v48 = vshrl.u32 %v12824_v23, 16  ;;  %v10771_v33 = vld [vmem:[#allocation2 + $0x160] sm:$0xff]  }
 0x1bd   : > { %v845_v7 = vsel %vm830_vm2, %v842_v0, %v844_v30  ;;  %v1329_v52 = vrot.slane %v1327_v46, 1  ;;  %v12869_v9 = vsel %vm751_vm0, %v759_v62, %v758_v11  ;;  %v12872_v32 = vunpack.c.l.bf16 %v12849_v21  ;;  %v10773_v0 = vld [vmem:[#allocation2 + $0x1d8] sm:$0xff]  }
 0x1be   : > { %10055 = vmatpush3.bf16.msra.mxu0 %v10762_v6  ;;  %v1322_v20 = vsel %vm1198_vm3, %v1317_v13, %v1321_v29  ;;  %v1008_v17 = vpack.c.bf16 %v845_v7, %v843_v12  ;;  %v806_v23 = vsel %vm791_vm1, %v803_v4, %v805_v5  ;;  %v807_v6 = vrot.slane %v12869_v9, 1  ;;  %v10772_v4 = vld [vmem:[#allocation2 + $0x120] sm:$0xff]  }
 0x1bf   : > { %10056 = vmatprep.subr.bf16.mxu0 %v10765_v27  ;;  %10111 = vmatpush3.bf16.msra.mxu1 %v10768_v59  ;;  %v1330_v11 = vsel %vm1198_vm3, %v1325_v61, %v1329_v52  ;;  %v1389_v46 = vor.u32 %v1387_v15, %v1321_v29  ;;  %v1381_v53 = vor.u32 %v1379_v48, %v1313_v10  ;;  %v1383_v37 = vshll.u32 %v12864_v24, 16  ;;  %v10774_v15 = vld [vmem:[#allocation2 + $0x198] sm:$0xff]  }
 0x1c0   : > { %10112 = vmatprep.subr.bf16.mxu1 %v10769_v14  ;;  %2208 = vmatprep.mubr.bf16.mxu0 %v1322_v20  ;;  %v1335_v27 = vshll.u32 %v1008_v17, 16  ;;  %v808_v59 = vsel %vm791_vm1, %v805_v5, %v807_v6  ;;  %v760_v13 = vrot.slane %v12872_v32, 4  ;;  %v846_v12 = vrot.slane %v12869_v9, 2  ;;  %v10776_v5 = vld [vmem:[#allocation2 + $0x168] sm:$0xff]  }
 0x1c1   : > { %2209 = vmatmul.mubr.bf16.gmra.mrb[4].mxu0 %v1314_v28  ;;  %v1015_v47 = vpack.c.bf16 %v808_v59, %v806_v23  ;;  %v1385_v18 = vrot.slane %v1383_v37, 1  ;;  %v1403_v14 = vshrl.u32 %v1008_v17, 16  ;;  %v1395_v20 = vshrl.u32 %v12853_v43, 16 }
 0x1c2   : > { %10057 = vmatpush3.bf16.msra.mxu0 %v10766_v2  ;;  %v1337_v10 = vrot.slane %v1335_v27, 1  ;;  %v772_v28 = vsel %vm751_vm0, %v760_v13, %v759_v62  ;;  %v847_v61 = vsel %vm830_vm2, %v844_v30, %v846_v12  ;;  %v12889_v29 = vunpack.c.l.bf16 %v12875_v22  ;;  %v12898_v30 = vld [vmem:[%s12691_s4 + $0x28] sm:$0xf]  ;;  %v10775_v27 = vld [vmem:[#allocation2 + $0x1e0] sm:$0xff]  }
 0x1c3   : > { %10113 = vmatpush3.bf16.msra.mxu1 %v10770_v3  ;;  %10058 = vmatprep.subr.bf16.mxu0 %v10771_v33  ;;  %v1391_v48 = vshll.u32 %v1015_v47, 16  ;;  %v1386_v37 = vsel %vm1198_vm3, %v1381_v53, %v1385_v18  ;;  %v848_v17 = vrot.slane %v772_v28, 2  ;;  %v12892_v43 = vpack.c.bf16 %v847_v61, %v845_v7  ;;  %v10777_v7 = vld [vmem:[#allocation2 + $0x1a0] sm:$0xff]  }
 0x1c4   : > { %10114 = vmatprep.subr.bf16.mxu1 %v10773_v0  ;;  %v1338_v2 = vsel %vm1198_vm3, %v12851_v55, %v1337_v10  ;;  %v1405_v3 = vor.u32 %v1403_v14, %v1337_v10  ;;  %v1397_v23 = vor.u32 %v1395_v20, %v1329_v52  ;;  %v761_v62 = vrot.slane %v12889_v29, 4  ;;  %v10781_v20 = vld [vmem:[#allocation2 + $0x170] sm:$0xff]  }
 0x1c5   : > { %2296 = vmatprep.mubr.bf16.mxu1 %v1338_v2  ;;  %v1393_v33 = vrot.slane %v1391_v48, 1  ;;  %v849_v0 = vsel %vm830_vm2, %v846_v12, %v848_v17  ;;  %v1399_v59 = vshll.u32 %v12892_v43, 16  ;;  %v809_v53 = vrot.slane %v772_v28, 1  ;;  %v10782_v2 = vld [vmem:[#allocation2 + $0x130] sm:$0xff]  }
 0x1c6   : > { %10059 = vmatpush3.bf16.msra.mxu0 %v10772_v4  ;;  %2297 = vmatmul.mubr.bf16.gmra.mrb[4].mxu1 %v1330_v11  ;;  %v1017_v26 = vpack.c.bf16 %v849_v0, %v847_v61  ;;  %v12903_v55 = vsel %vm751_vm0, %v761_v62, %v760_v13  ;;  %v1459_v52 = vshrl.u32 %v1015_v47, 16  ;;  %v12906_v14 = vpack.c.bf16 %v772_v28, %v12869_v9  ;;  %v10779_v9 = vld [vmem:[#allocation2 + $0x1e8] sm:$0xff]  }
 0x1c7   : > { %10060 = vmatprep.subr.bf16.mxu0 %v10776_v5  ;;  %v1394_v10 = vsel %vm1198_vm3, %v1389_v46, %v1393_v33  ;;  %v1401_v12 = vrot.slane %v1399_v59, 1  ;;  %v810_v48 = vsel %vm791_vm1, %v807_v6, %v809_v53  ;;  %v811_v4 = vrot.slane %v12903_v55, 1  ;;  %10115 = vmatpush3.bf16.msra.mxu1 %v10774_v15  ;;  %v10780_v15 = vld [vmem:[#allocation2 + $0x1a8] sm:$0xff]  }
 0x1c8   : > { %2216 = vmatprep.mubr.bf16.mxu0 %v1394_v10  ;;  %v1407_v11 = vshll.u32 %v1017_v26, 16  ;;  %v1461_v61 = vor.u32 %v1459_v52, %v1393_v33  ;;  %v1451_v13 = vshrl.u32 %v12864_v24, 16  ;;  %v1455_v47 = vshll.u32 %v12906_v14, 16  ;;  %10116 = vmatprep.subr.bf16.mxu1 %v10775_v27 }
 0x1c9   : > { %2217 = vmatmul.mubr.bf16.gmra.mrb[8].mxu0 %v1386_v37  ;;  %v1402_v28 = vsel %vm1198_vm3, %v1397_v23, %v1401_v12  ;;  %v812_v46 = vsel %vm791_vm1, %v809_v53, %v811_v4  ;;  %v12916_v5 = vunpack.c.l.bf16 %v12898_v30  ;;  %v850_v6 = vrot.slane %v12903_v55, 2  ;;  %v10785_v53 = vld [vmem:[#allocation2 + $0x178] sm:$0xff]  }
 0x1ca   : > { %v1409_v59 = vrot.slane %v1407_v11, 1  ;;  %v1024_v33 = vpack.c.bf16 %v812_v46, %v810_v48  ;;  %v1453_v52 = vor.u32 %v1451_v13, %v1385_v18  ;;  %v1457_v24 = vrot.slane %v1455_v47, 1  ;;  %10061 = vmatpush3.bf16.msra.mxu0 %v10778_v16  ;;  %v10783_v18 = vld [vmem:[#allocation2 + $0x1f0] sm:$0xff]  }
 0x1cb   : > { %v762_v27 = vrot.slane %v12916_v5, 4  ;;  %v851_v37 = vsel %vm830_vm2, %v848_v17, %v850_v6  ;;  %v1475_v10 = vshrl.u32 %v1017_v26, 16  ;;  %v1467_v23 = vshrl.u32 %v12892_v43, 16  ;;  %10117 = vmatpush3.bf16.msra.mxu1 %v10777_v7  ;;  %10062 = vmatprep.subr.bf16.mxu0 %v10781_v20  ;;  %v10784_v17 = vld [vmem:[#allocation2 + $0x1b0] sm:$0xff]   ;;  %v10786_v43 = vld [vmem:[#allocation2 + $0x138] sm:$0xff]  }
 0x1cc   : > { %v1410_v35 = vsel %vm1198_vm3, %v1405_v3, %v1409_v59  ;;  %v1463_v19 = vshll.u32 %v1024_v33, 16  ;;  %v1458_v58 = vsel %vm1198_vm3, %v1453_v52, %v1457_v24  ;;  %v1025_v11 = vpack.c.bf16 %v851_v37, %v849_v0  ;;  %10118 = vmatprep.subr.bf16.mxu1 %v10779_v9 }
 0x1cd   : > { %2304 = vmatprep.mubr.bf16.mxu1 %v1410_v35  ;;  %v774_v16 = vsel %vm751_vm0, %v762_v27, %v761_v62  ;;  %v1477_v48 = vor.u32 %v1475_v10, %v1409_v59  ;;  %v1469_v13 = vor.u32 %v1467_v23, %v1401_v12  ;;  %v763_v26 = vrot.slane %v12716_v42, 4  ;;  %v10787_v59 = vld [vmem:[#allocation2 + $0x1f8] sm:$0xff]  }
 0x1ce   : > { %2305 = vmatmul.mubr.bf16.gmra.mrb[8].mxu1 %v1402_v28  ;;  %v1465_v7 = vrot.slane %v1463_v19, 1  ;;  %v852_v20 = vrot.slane %v774_v16, 2  ;;  %v1471_v47 = vshll.u32 %v1025_v11, 16  ;;  %v813_v3 = vrot.slane %v774_v16, 1  ;;  %10063 = vmatpush3.bf16.msra.mxu0 %v10782_v2 }
 0x1cf   : > { %v775_v46 = vsel %vm751_vm0, %v763_v26, %v762_v27  ;;  %v1531_v0 = vshrl.u32 %v1024_v33, 16  ;;  %v12928_v9 = vpack.c.bf16 %v774_v16, %v12903_v55  ;;  %v1523_v35 = vshrl.u32 %v12906_v14, 16  ;;  %10119 = vmatpush3.bf16.msra.mxu1 %v10780_v15  ;;  %10064 = vmatprep.subr.bf16.mxu0 %v10785_v53  ;;  %v10790_v53 = vld [vmem:[#allocation2 + $0x1b8] sm:$0xff]  }
 0x1d0   : > { %v1466_v62 = vsel %vm1198_vm3, %v1461_v61, %v1465_v7  ;;  %v853_v12 = vsel %vm830_vm2, %v850_v6, %v852_v20  ;;  %v1473_v28 = vrot.slane %v1471_v47, 1  ;;  %v814_v19 = vsel %vm791_vm1, %v811_v4, %v813_v3  ;;  %10120 = vmatprep.subr.bf16.mxu1 %v10783_v18 }
 0x1d1   : > { %2224 = vmatprep.mubr.bf16.mxu0 %v1466_v62  ;;  %v1026_v2 = vpack.c.bf16 %v853_v12, %v851_v37  ;;  %v815_v52 = vrot.slane %v775_v46, 1  ;;  %v1533_v33 = vor.u32 %v1531_v0, %v1465_v7  ;;  %v1525_v27 = vor.u32 %v1523_v35, %v1457_v24 }
 0x1d2   : > { %2225 = vmatmul.mubr.bf16.gmra.mrb[12].mxu0 %v1458_v58  ;;  %v1474_v55 = vsel %vm1198_vm3, %v1469_v13, %v1473_v28  ;;  %v1527_v14 = vshll.u32 %v12928_v9, 16  ;;  %v776_v15 = vrot.slane %v12743_v57, 4  ;;  %v854_v61 = vrot.slane %v775_v46, 2 }
 0x1d3   : > { %v1479_v10 = vshll.u32 %v1026_v2, 16  ;;  %v816_v6 = vsel %vm791_vm1, %v813_v3, %v815_v52  ;;  %v1547_v23 = vshrl.u32 %v1026_v2, 16  ;;  %v1539_v4 = vshrl.u32 %v1025_v11, 16  ;;  %10121 = vmatpush3.bf16.msra.mxu1 %v10784_v17  ;;  %10065 = vmatpush3.bf16.msra.mxu0 %v10786_v43 }
 0x1d4   : > { %v1033_v37 = vpack.c.bf16 %v816_v6, %v814_v19  ;;  %v1529_v18 = vrot.slane %v1527_v14, 1  ;;  %v777_v24 = vsel %vm751_vm0, %v776_v15, %v763_v26  ;;  %v855_v58 = vsel %vm830_vm2, %v852_v20, %v854_v61  ;;  %10122 = vmatprep.subr.bf16.mxu1 %v10787_v59 }
 0x1d5   : > { %v13819_v16 = vmov 0.0   ;;  %v1481_v13 = vrot.slane %v1479_v10, 1  ;;  %v870_v7 = vrot.slane %v777_v24, 2  ;;  %v1034_v47 = vpack.c.bf16 %v855_v58, %v853_v12 }
 0x1d6   : > { %10386 = vmatprep.subr.bf16.mxu0 %v13819_v16  ;;  %v1541_v0 = vor.u32 %v1539_v4, %v1473_v28  ;;  %v1535_v3 = vshll.u32 %v1033_v37, 16  ;;  %v1530_v11 = vsel %vm1198_vm3, %v1525_v27, %v1529_v18  ;;  %v1039_v17 = vpack.c.bf16 %v815_v52, %v815_v52 }
 0x1d7   : > { %v1591_v43 = vshrl.u32 %v1033_v37, 16  ;;  %v1482_v35 = vsel %vm1198_vm3, %v1477_v48, %v1481_v13  ;;  %v871_v62 = vsel %vm830_vm2, %v854_v61, %v870_v7  ;;  %v1549_v26 = vor.u32 %v1547_v23, %v1481_v13  ;;  %10123 = vmatpush3.bf16.msra.mxu1 %v10790_v53 }
 0x1d8   : > { %v1543_v19 = vshll.u32 %v1034_v47, 16  ;;  %2312 = vmatprep.mubr.bf16.mxu1 %v1482_v35  ;;  %v1537_v20 = vrot.slane %v1535_v3, 1  ;;  %v1035_v59 = vpack.c.bf16 %v871_v62, %v855_v58  ;;  %v1595_v2 = vshll.u32 %v1039_v17, 16  ;;  %10430 = vmatprep.subr.bf16.mxu1 %v13819_v16 }
 0x1d9   : > { %v1038_v14 = vpack.c.bf16 %v775_v46, %v775_v46  ;;  %2313 = vmatmul.mubr.bf16.gmra.mrb[12].mxu1 %v1474_v55  ;;  %v1583_v28 = vshrl.u32 %v12928_v9, 16  ;;  %v1041_v52 = vpack.c.bf16 %v870_v7, %v870_v7  ;;  %v1040_v27 = vpack.c.bf16 %v854_v61, %v854_v61 }
 0x1da   : > { %v1545_v12 = vrot.slane %v1543_v19, 1  ;;  %v1538_v48 = vsel %vm1198_vm3, %v1533_v33, %v1537_v20  ;;  %v1551_v15 = vshll.u32 %v1035_v59, 16  ;;  %v1593_v10 = vor.u32 %v1591_v43, %v1537_v20 }
 0x1db   : > { %v1597_v6 = vrot.slane %v1595_v2, 1  ;;  %2232 = vmatprep.mubr.bf16.mxu0 %v1538_v48  ;;  %v1585_v4 = vor.u32 %v1583_v28, %v1529_v18  ;;  %v1587_v53 = vshll.u32 %v1038_v14, 16  ;;  %v1607_v46 = vshrl.u32 %v1035_v59, 16 }
 0x1dc   : > { %v1546_v23 = vsel %vm1198_vm3, %v1541_v0, %v1545_v12  ;;  %2233 = vmatmul.mubr.bf16.gmra.mrb[16].mxu0 %v1530_v11  ;;  %v1553_v37 = vrot.slane %v1551_v15, 1  ;;  %v1611_v24 = vshll.u32 %v1041_v52, 16  ;;  %v1599_v9 = vshrl.u32 %v1034_v47, 16 }
 0x1dd   : > { %v1598_v55 = vsel %vm1198_vm3, %v1593_v10, %v1597_v6  ;;  %v1589_v61 = vrot.slane %v1587_v53, 1  ;;  %v1603_v58 = vshll.u32 %v1040_v27, 16  ;;  %v1649_v13 = vshrl.u32 %v1039_v17, 16 }
 0x1de   : > { %2240 = vmatprep.mubr.bf16.mxu0 %v1598_v55  ;;  %v1646_v33 = vshrl.u32 %v1038_v14, 16  ;;  %v1554_v7 = vsel %vm1198_vm3, %v1549_v26, %v1553_v37  ;;  %v1609_v3 = vor.u32 %v1607_v46, %v1553_v37  ;;  %v1613_v43 = vrot.slane %v1611_v24, 1 }
 0x1df   : > { %v1601_v35 = vor.u32 %v1599_v9, %v1545_v12  ;;  %2320 = vmatprep.mubr.bf16.mxu1 %v1554_v7  ;;  %v1590_v18 = vsel %vm1198_vm3, %v1585_v4, %v1589_v61  ;;  %v1605_v0 = vrot.slane %v1603_v58, 1  ;;  %v1651_v11 = vor.u32 %v1649_v13, %v1597_v6 }
 0x1e0   : > { %v1648_v62 = vor.u32 %v1646_v33, %v1589_v61  ;;  %v1614_v19 = vsel %vm1198_vm3, %v1609_v3, %v1613_v43  ;;  %v1655_v20 = vshrl.u32 %v1041_v52, 16  ;;  %v1652_v47 = vshrl.u32 %v1040_v27, 16 }
 0x1e1   : > { %v1260_v59 = vshrl.u32 %v12711_v40, 16  ;;  %2321 = vmatmul.mubr.bf16.gmra.mrb[16].mxu1 %v1546_v23  ;;  %v1606_v17 = vsel %vm1198_vm3, %v1601_v35, %v1605_v0  ;;  %v1262_v26 = vshll.u32 %v12711_v40, 16  ;;  %v1267_v2 = vshll.u32 %v12720_v45, 16 }
 0x1e2   : > { %v13866_v14 = vunpack.c.l.bf16 %v12694_v31  ;;  %2328 = vmatprep.mubr.bf16.mxu1 %v1614_v19  ;;  %v1657_v28 = vor.u32 %v1655_v20, %v1613_v43  ;;  %v12958_v48 = vor.u32 %v1652_v47, %v1605_v0  ;;  %v888_v15 = vrot.slane %v12706_v38, 7 }
 0x1e3   : > { %v890_v52 = vrot.slane %v12708_v39, 7  ;;  %v1264_v27 = vrot.slane %v1262_v26, 1  ;;  %v1269_v10 = vrot.slane %v1267_v2, 1  ;;  %v892_v6 = vrot.slane %v12714_v41, 7 }
 0x1e4   : > { %v887_v12 = vrot.slane %v13866_v14, 7  ;;  %v925_v23 = vrot.slane %v12706_v38, 1  ;;  %2241 = vmatmul.mubr.bf16.gmra.mrb[20].mxu0 %v1590_v18  ;;  %v926_v4 = vrot.slane %v12708_v39, 1  ;;  %v928_v53 = vrot.slane %v12714_v41, 1 }
 0x1e5   : > { %v891_v31 = vsel %vm886_vm4, %v888_v15, %v890_v52  ;;  %2248 = vmatprep.mubr.bf16.mxu0 %v1651_v11  ;;  %v1265_v46 = vor.u32 %v1264_v27, %v1260_v59  ;;  %v893_v37 = vsel %vm886_vm4, %v890_v52, %v892_v6  ;;  %v930_v24 = vrot.slane %v12734_v54, 1 }
 0x1e6   : > { %v889_v40 = vsel %vm886_vm4, %v887_v12, %v888_v15  ;;  %v1000_v9 = vpack.c.bf16 %v893_v37, %v891_v31  ;;  %v927_v61 = vsel %vm791_vm1, %v925_v23, %v926_v4  ;;  %v929_v58 = vsel %vm791_vm1, %v926_v4, %v928_v53 }
 0x1e7   : > { %v991_v55 = vpack.c.bf16 %v889_v40, %v887_v12  ;;  %v932_v13 = vrot.slane %v12750_v60, 1  ;;  %v1270_v33 = vsel %vm1198_vm3, %v1265_v46, %v1269_v10  ;;  %v931_v43 = vsel %vm791_vm1, %v928_v53, %v930_v24 }
 0x1e8   : > { %v1255_v35 = vshll.u32 %v1000_v9, 16  ;;  %v994_v0 = vpack.c.bf16 %v929_v58, %v927_v61  ;;  %v9191_v11 = vcombine.low %v12699_v34, %v12727_v49  ;;  %v1272_v47 = vshrl.u32 %v12729_v51, 16  ;;  %v10794_v61 = vld [vmem:[#allocation2 + $0x200] sm:$0xff]  }
 0x1e9   : > { %v1248_v7 = vshrl.u32 %v991_v55, 16  ;;  %v1250_v3 = vshll.u32 %v991_v55, 16  ;;  %v933_v18 = vsel %vm791_vm1, %v930_v24, %v932_v13  ;;  %2329 = vmatmul.mubr.bf16.gmra.mrb[20].mxu1 %v1606_v17  ;;  %v1274_v59 = vshll.u32 %v12729_v51, 16 }
 0x1ea   : > { %v1003_v20 = vpack.c.bf16 %v933_v18, %v931_v43  ;;  %2336 = vmatprep.mubr.bf16.mxu1 %v1657_v28  ;;  %v1257_v26 = vrot.slane %v1255_v35, 1  ;;  %v1284_v2 = vshrl.u32 %v994_v0, 16  ;;  %v1286_v14 = vshll.u32 %v994_v0, 16  ;;  %v11732_v0 = vld [vmem:[%s12691_s4 + $0x14] sm:$0xf] }
 0x1eb   : > { %v1252_v19 = vrot.slane %v1250_v3, 1  ;;  %v1279_v12 = vshll.u32 %v9191_v11, 16  ;;  %v1276_v27 = vrot.slane %v1274_v59, 1  ;;  %v9192_v23 = vcombine.low %v12727_v49, %v12738_v56 }
 0x1ec   : > { %v1291_v52 = vshll.u32 %v1003_v20, 16  ;;  %2249 = vmatmul.mubr.bf16.gmra.mrb[24].mxu0 %v1648_v62  ;;  %v1288_v34 = vrot.slane %v1286_v14, 1  ;;  %v1347_v40 = vshrl.u32 %v12720_v45, 16  ;;  %v894_v31 = vrot.slane %v12734_v54, 7  ;;  %v10797_v14 = vld [vmem:[#allocation2 + $0x208] sm:$0xff]  }
 0x1ed   : > { %v1253_v15 = vor.u32 %v1252_v19, %v1248_v7  ;;  %v1281_v17 = vrot.slane %v1279_v12, 1  ;;  %2376 = vmatprep.mubr.bf16.mxu0 %v1270_v33  ;;  %v1277_v4 = vor.u32 %v1276_v27, %v1272_v47  ;;  %v1351_v53 = vshll.u32 %v9192_v23, 16 }
 0x1ee   : > { %v1293_v28 = vrot.slane %v1291_v52, 1  ;;  %v1289_v46 = vor.u32 %v1288_v34, %v1284_v2  ;;  %v1349_v37 = vor.u32 %v1347_v40, %v1269_v10  ;;  %v895_v55 = vsel %vm886_vm4, %v892_v6, %v894_v31 }
 0x1ef   : > { %v1258_v51 = vsel %vm1198_vm3, %v1253_v15, %v1257_v26  ;;  %v896_v24 = vrot.slane %v12750_v60, 7  ;;  %v1282_v49 = vsel %vm1198_vm3, %v1277_v4, %v1281_v17  ;;  %v1353_v56 = vrot.slane %v1351_v53, 1  ;;  %v10800_v4 = vld [vmem:[#allocation2 + $0x210] sm:$0xff]  }
 0x1f0   : > { %v1339_v62 = vshrl.u32 %v1000_v9, 16  ;;  %v934_v45 = vrot.slane %v12840_v1, 1  ;;  %v1294_v58 = vsel %vm1198_vm3, %v1289_v46, %v1293_v28  ;;  %v936_v7 = vrot.slane %v12857_v50, 1 }
 0x1f1   : > { %v897_v33 = vsel %vm886_vm4, %v894_v31, %v896_v24  ;;  %v1363_v3 = vshrl.u32 %v1003_v20, 16  ;;  %2337 = vmatmul.mubr.bf16.gmra.mrb[24].mxu1 %v12958_v48  ;;  %v1354_v10 = vsel %vm1198_vm3, %v1349_v37, %v1353_v56  ;;  %v9193_v19 = vcombine.low %v11732_v0, %v12813_v8  ;;  %v10802_v0 = vld [vmem:[#allocation2 + $0x218] sm:$0xff]  }
 0x1f2   : > { %v1009_v6 = vpack.c.bf16 %v897_v33, %v895_v55  ;;  %v1341_v43 = vor.u32 %v1339_v62, %v1257_v26  ;;  %v935_v35 = vsel %vm791_vm1, %v932_v13, %v934_v45  ;;  %2464 = vmatprep.mubr.bf16.mxu1 %v1294_v58  ;;  %v937_v9 = vsel %vm791_vm1, %v934_v45, %v936_v7 }
 0x1f3   : > { %v1365_v18 = vor.u32 %v1363_v3, %v1293_v28  ;;  %v1355_v47 = vshrl.u32 %v9191_v11, 16  ;;  %v1012_v2 = vpack.c.bf16 %v937_v9, %v935_v35  ;;  %v9194_v20 = vcombine.low %v12813_v8, %v12830_v44 }
 0x1f4   : > { %v1343_v59 = vshll.u32 %v1009_v6, 16  ;;  %v1419_v48 = vshrl.u32 %v9192_v23, 16  ;;  %2377 = vmatmul.mubr.bf16.vlgmr.msra.gmra.mrb[28].mxu0 %v1258_v51  ;;  %v1359_v26 = vshll.u32 %v9193_v19, 16  ;;  %v898_v13 = vrot.slane %v12840_v1, 7 }
 0x1f5   : > { %v1357_v12 = vor.u32 %v1355_v47, %v1281_v17  ;;  %v900_v15 = vrot.slane %v12857_v50, 7  ;;  %2384 = vmatprep.mubr.bf16.mxu0 %v1354_v10  ;;  %v1367_v27 = vshll.u32 %v1012_v2, 16  ;;  %10387 = vmatpush3.bf16.msra.mxu0 %v10794_v61  ;;  %v1423_v11 = vshll.u32 %v9194_v20, 16 }
 0x1f6   : > { %v1345_v52 = vrot.slane %v1343_v59, 1  ;;  %v1421_v34 = vor.u32 %v1419_v48, %v1353_v56  ;;  %v1361_v40 = vrot.slane %v1359_v26, 1  ;;  %10388 = vmatprep.subr.bf16.mxu0 %v13819_v16  ;;  %v899_v8 = vsel %vm886_vm4, %v896_v24, %v898_v13 }
 0x1f7   : > { %v901_v23 = vsel %vm886_vm4, %v898_v13, %v900_v15  ;;  %v1411_v31 = vshrl.u32 %v1009_v6, 16  ;;  %v1369_v17 = vrot.slane %v1367_v27, 1  ;;  %v1425_v51 = vrot.slane %v1423_v11, 1 }
 0x1f8   : > { %v13005_v28 = vpack.c.bf16 %v901_v23, %v899_v8  ;;  %v1346_v53 = vsel %vm1198_vm3, %v1341_v43, %v1345_v52  ;;  %v1362_v46 = vsel %vm1198_vm3, %v1357_v12, %v1361_v40  ;;  %v938_v37 = vrot.slane %v12872_v32, 1 }
 0x1f9   : > { %v940_v55 = vrot.slane %v12889_v29, 1  ;;  %2465 = vmatmul.mubr.bf16.vlgmr.msra.gmra.mrb[28].mxu1 %v1282_v49  ;;  %v1370_v56 = vsel %vm1198_vm3, %v1365_v18, %v1369_v17  ;;  %v1426_v24 = vsel %vm1198_vm3, %v1421_v34, %v1425_v51  ;;  %10389 = vmatpush3.bf16.msra.mxu0 %v10797_v14  ;;  %v1435_v45 = vshrl.u32 %v1012_v2, 16 }
 0x1fa   : > { %v1415_v62 = vshll.u32 %v13005_v28, 16  ;;  %2472 = vmatprep.mubr.bf16.mxu1 %v1370_v56  ;;  %v939_v61 = vsel %vm791_vm1, %v936_v7, %v938_v37  ;;  %v9195_v33 = vcombine.low %v12830_v44, %v12849_v21  ;;  %v1427_v3 = vshrl.u32 %v9193_v19, 16  ;;  %10390 = vmatprep.subr.bf16.mxu0 %v13819_v16 }
 0x1fb   : > { %v941_v58 = vsel %vm791_vm1, %v938_v37, %v940_v55  ;;  %v1413_v49 = vor.u32 %v1411_v31, %v1345_v52  ;;  %v9196_v43 = vcombine.low %v12849_v21, %v12875_v22  ;;  %v1491_v18 = vshrl.u32 %v9194_v20, 16 }
 0x1fc   : > { %v1417_v10 = vrot.slane %v1415_v62, 1  ;;  %v1021_v6 = vpack.c.bf16 %v941_v58, %v939_v61  ;;  %2385 = vmatmul.mubr.bf16.gmra.mrb[32].mxu0 %v1346_v53  ;;  %v1429_v35 = vor.u32 %v1427_v3, %v1361_v40  ;;  %v1431_v9 = vshll.u32 %v9195_v33, 16  ;;  %v10804_v40 = vld [vmem:[#allocation2 + $0x220] sm:$0xff]  }
 0x1fd   : > { %v902_v7 = vrot.slane %v12872_v32, 7  ;;  %2392 = vmatprep.mubr.bf16.mxu0 %v1426_v24  ;;  %v1437_v47 = vor.u32 %v1435_v45, %v1369_v17  ;;  %v1495_v44 = vshll.u32 %v9196_v43, 16  ;;  %10391 = vmatpush3.bf16.msra.mxu0 %v10800_v4  ;;  %v904_v19 = vrot.slane %v12889_v29, 7 }
 0x1fe   : > { %v1439_v59 = vshll.u32 %v1021_v6, 16  ;;  %v1433_v2 = vrot.slane %v1431_v9, 1  ;;  %v1493_v48 = vor.u32 %v1491_v18, %v1425_v51  ;;  %v1483_v21 = vshrl.u32 %v13005_v28, 16  ;;  %10392 = vmatprep.subr.bf16.mxu0 %v13819_v16  ;;  %v10805_v9 = vld [vmem:[#allocation2 + $0x228] sm:$0xff]  }
 0x1ff   : > { %v903_v14 = vsel %vm886_vm4, %v900_v15, %v902_v7  ;;  %v1497_v20 = vrot.slane %v1495_v44, 1  ;;  %v905_v26 = vsel %vm886_vm4, %v902_v7, %v904_v19  ;;  %v942_v13 = vrot.slane %v12916_v5, 1 }
 0x200   : > { %v1441_v12 = vrot.slane %v1439_v59, 1  ;;  %v1418_v52 = vsel %vm1198_vm3, %v1413_v49, %v1417_v10  ;;  %v1434_v27 = vsel %vm1198_vm3, %v1429_v35, %v1433_v2  ;;  %v1027_v34 = vpack.c.bf16 %v905_v26, %v903_v14 }
 0x201   : > { %v1507_v11 = vshrl.u32 %v1021_v6, 16  ;;  %2473 = vmatmul.mubr.bf16.gmra.mrb[32].mxu1 %v1362_v46  ;;  %v1498_v8 = vsel %vm1198_vm3, %v1493_v48, %v1497_v20  ;;  %v943_v23 = vsel %vm791_vm1, %v940_v55, %v942_v13  ;;  %v13867_v31 = vrot.slane %v12716_v42, 1  ;;  %10393 = vmatpush3.bf16.msra.mxu0 %v10802_v0  ;;  %v11733_v46 = vld [vmem:[%s12691_s4 + $0x2c] sm:$0xf] }
 0x202   : > { %v1442_v15 = vsel %vm1198_vm3, %v1437_v47, %v1441_v12  ;;  %v1487_v51 = vshll.u32 %v1027_v34, 16  ;;  %v9197_v53 = vcombine.low %v12875_v22, %v12898_v30  ;;  %v1499_v37 = vshrl.u32 %v9195_v33, 16  ;;  %10394 = vmatprep.subr.bf16.mxu0 %v13819_v16 }
 0x203   : > { %v944_v17 = vsel %vm791_vm1, %v942_v13, %v13867_v31  ;;  %2480 = vmatprep.mubr.bf16.mxu1 %v1442_v15  ;;  %v1509_v4 = vor.u32 %v1507_v11, %v1441_v12  ;;  %v9198_v56 = vcombine.low %v12898_v30, %v11733_v46  ;;  %v1563_v24 = vshrl.u32 %v9196_v43, 16 }
 0x204   : > { %v1030_v28 = vpack.c.bf16 %v944_v17, %v943_v23  ;;  %v906_v62 = vrot.slane %v12916_v5, 7  ;;  %2393 = vmatmul.mubr.bf16.gmra.mrb[36].mxu0 %v1418_v52  ;;  %v1489_v55 = vrot.slane %v1487_v51, 1  ;;  %v1503_v61 = vshll.u32 %v9197_v53, 16  ;;  %v10807_v23 = vld [vmem:[#allocation2 + $0x238] sm:$0xff]  }
 0x205   : > { %v908_v58 = vrot.slane %v12716_v42, 7  ;;  %2400 = vmatprep.mubr.bf16.mxu0 %v1498_v8  ;;  %v1485_v3 = vor.u32 %v1483_v21, %v1417_v10  ;;  %v1501_v49 = vor.u32 %v1499_v37, %v1433_v2  ;;  %v1567_v22 = vshll.u32 %v9198_v56, 16  ;;  %10395 = vmatpush3.bf16.msra.mxu0 %v10804_v40 }
 0x206   : > { %v1511_v45 = vshll.u32 %v1030_v28, 16  ;;  %v907_v33 = vsel %vm886_vm4, %v904_v19, %v906_v62  ;;  %v1505_v35 = vrot.slane %v1503_v61, 1  ;;  %v1565_v30 = vor.u32 %v1563_v24, %v1497_v20  ;;  %10396 = vmatprep.subr.bf16.mxu0 %v13819_v16  ;;  %v10806_v19 = vld [vmem:[#allocation2 + $0x230] sm:$0xff]  }
 0x207   : > { %v909_v43 = vsel %vm886_vm4, %v906_v62, %v908_v58  ;;  %v1569_v18 = vrot.slane %v1567_v22, 1  ;;  %v1575_v0 = vshrl.u32 %v1030_v28, 16  ;;  %v1555_v59 = vshrl.u32 %v1027_v34, 16 }
 0x208   : > { %v1513_v6 = vrot.slane %v1511_v45, 1  ;;  %v1036_v7 = vpack.c.bf16 %v909_v43, %v907_v33  ;;  %v1506_v10 = vsel %vm1198_vm3, %v1501_v49, %v1505_v35  ;;  %v13050_v44 = vpack.c.bf16 %v12743_v57, %v12743_v57 }
 0x209   : > { %2481 = vmatmul.mubr.bf16.gmra.mrb[36].mxu1 %v1434_v27  ;;  %v1490_v2 = vsel %vm1198_vm3, %v1485_v3, %v1489_v55  ;;  %v1570_v14 = vsel %vm1198_vm3, %v1565_v30, %v1569_v18  ;;  %v1623_v21 = vshrl.u32 %v9198_v56, 16  ;;  %v13868_v20 = vunpack.c.l.bf16 %v12703_v36  ;;  %10397 = vmatpush3.bf16.msra.mxu0 %v10805_v9  ;;  %v13869_v56 = vld [vmem:[#allocation35_spill] sm:$0xff] }
 0x20a   : > { %v1514_v47 = vsel %vm1198_vm3, %v1509_v4, %v1513_v6  ;;  %v1559_v48 = vshll.u32 %v1036_v7, 16  ;;  %v1627_v12 = vshll.u32 %v13050_v44, 16  ;;  %v1577_v52 = vor.u32 %v1575_v0, %v1513_v6  ;;  %10398 = vmatprep.subr.bf16.mxu0 %v13819_v16  ;;  %v13870_v6 = vld [vmem:[#allocation37_spill] sm:$0xff]  ;;  %v13871_v30 = vld [vmem:[#allocation39_spill] sm:$0xff] }
 0x20b   : > { %2488 = vmatprep.mubr.bf16.mxu1 %v1514_v47  ;;  %v910_v26 = vrot.slane %v13868_v20, 7  ;;  %v1571_v34 = vshrl.u32 %v9197_v53, 16  ;;  %v13059_v57 = vpack.c.bf16 %v12757_v63, %v12757_v63  ;;  %v1557_v27 = vor.u32 %v1555_v59, %v1489_v55  ;;  %v13872_v20 = vld [vmem:[#allocation38_spill] sm:$0xff] }
 0x20c   : > { %v1561_v13 = vrot.slane %v1559_v48, 1  ;;  %2401 = vmatmul.mubr.bf16.gmra.mrb[40].mxu0 %v1490_v2  ;;  %v1629_v11 = vrot.slane %v1627_v12, 1  ;;  %v1625_v15 = vor.u32 %v1623_v21, %v1569_v18  ;;  %v1578_v31 = vsel %vm1198_vm3, %v1577_v52, %v12789_v25 }
 0x20d   : > { %v911_v40 = vsel %vm886_vm4, %v908_v58, %v910_v26  ;;  %2408 = vmatprep.mubr.bf16.mxu0 %v1570_v14  ;;  %v1637_v36 = vshll.u32 %v13059_v57, 16  ;;  %10399 = vmatpush3.bf16.msra.mxu0 %v10806_v19  ;;  %v1573_v17 = vor.u32 %v1571_v34, %v1505_v35  ;;  %v1615_v28 = vshrl.u32 %v1036_v7, 16 }
 0x20e   : > { %v1042_v8 = vpack.c.bf16 %v911_v40, %v911_v40  ;;  %10400 = vmatprep.subr.bf16.mxu0 %v13819_v16  ;;  %v1562_v51 = vsel %vm1198_vm3, %v1557_v27, %v1561_v13  ;;  %v1661_v4 = vshrl.u32 %v13050_v44, 16  ;;  %v956_v53 = vrot.slane %v12706_v38, 2 }
 0x20f   : > { %v1630_v37 = vsel %vm1198_vm3, %v1625_v15, %v1629_v11  ;;  %v1639_v46 = vrot.slane %v1637_v36, 1  ;;  %v1044_v24 = vpack.c.bf16 %v13869_v56, %v13869_v56  ;;  %v957_v25 = vrot.slane %v12708_v39, 2 }
 0x210   : > { %v1619_v63 = vshll.u32 %v1042_v8, 16  ;;  %v959_v55 = vrot.slane %v12714_v41, 2  ;;  %v961_v45 = vrot.slane %v12734_v54, 2  ;;  %v963_v61 = vrot.slane %v12750_v60, 2 }
 0x211   : > { %2489 = vmatmul.mubr.bf16.gmra.mrb[40].mxu1 %v1506_v10  ;;  %10401 = vmatpush3.bf16.msra.mxu0 %v10807_v23  ;;  %v958_v38 = vsel %vm830_vm2, %v956_v53, %v957_v25  ;;  %v965_v58 = vrot.slane %v12840_v1, 2  ;;  %v1617_v39 = vor.u32 %v1615_v28, %v1561_v13  ;;  %v967_v41 = vrot.slane %v12857_v50, 2 }
 0x212   : > { %2496 = vmatprep.mubr.bf16.mxu1 %v1578_v31  ;;  %v1621_v62 = vrot.slane %v1619_v63, 1  ;;  %v960_v3 = vsel %vm830_vm2, %v957_v25, %v959_v55  ;;  %v962_v49 = vsel %vm830_vm2, %v959_v55, %v961_v45  ;;  %v964_v22 = vsel %vm830_vm2, %v961_v45, %v963_v61 }
 0x213   : > { %v995_v33 = vpack.c.bf16 %v960_v3, %v958_v38  ;;  %v1574_v54 = vsel %vm1198_vm3, %v1573_v17, %v13870_v6  ;;  %v1632_v60 = vshll.u32 %v1044_v24, 16  ;;  %v1004_v35 = vpack.c.bf16 %v964_v22, %v962_v49  ;;  %v13876_v22 = vld [vmem:[#allocation41_spill] sm:$0xff] }
 0x214   : > { %2409 = vmatmul.mubr.bf16.gmra.mrb[44].mxu0 %v1562_v51  ;;  %v1640_v1 = vsel %vm1198_vm3, %v13871_v30, %v1639_v46  ;;  %v966_v43 = vsel %vm830_vm2, %v963_v61, %v965_v58  ;;  %v968_v9 = vsel %vm830_vm2, %v965_v58, %v967_v41  ;;  %v1622_v18 = vsel %vm1198_vm3, %v1617_v39, %v1621_v62  ;;  %v13874_v61 = vld [vmem:[#allocation36_spill] sm:$0xff] }
 0x215   : > { %2416 = vmatprep.mubr.bf16.mxu0 %v1630_v37  ;;  %v1663_v7 = vor.u32 %v1661_v4, %v1629_v11  ;;  %v1298_v0 = vshll.u32 %v995_v33, 16  ;;  %v1634_v47 = vrot.slane %v1632_v60, 1  ;;  %v1667_v50 = vshrl.u32 %v13059_v57, 16  ;;  %v13875_v58 = vld [vmem:[#allocation40_spill] sm:$0xff] }
 0x216   : > { %v1303_v10 = vshll.u32 %v1004_v35, 16  ;;  %v1658_v59 = vshrl.u32 %v1042_v8, 16  ;;  %v1013_v44 = vpack.c.bf16 %v968_v9, %v966_v43  ;;  %v1664_v19 = vshrl.u32 %v1044_v24, 16  ;;  %v13128_v60 = vld [vmem:[#allocation4] ss:$0 sm:$0xff] }
 0x217   : > { %v969_v2 = vrot.slane %v12872_v32, 2  ;;  %v971_v48 = vrot.slane %v12889_v29, 2  ;;  %v1296_v14 = vshrl.u32 %v995_v33, 16  ;;  %v1300_v21 = vrot.slane %v1298_v0, 1 }
 0x218   : > { %v1371_v12 = vshrl.u32 %v1004_v35, 16  ;;  %v1635_v26 = vsel %vm1198_vm3, %v13872_v20, %v1634_v47  ;;  %v1669_v13 = vor.u32 %v1667_v50, %v1639_v46  ;;  %v1305_v52 = vrot.slane %v1303_v10, 1 }
 0x219   : > { %2497 = vmatmul.mubr.bf16.gmra.mrb[44].mxu1 %v1574_v54  ;;  %v1375_v34 = vshll.u32 %v1013_v44, 16  ;;  %v1660_v57 = vor.u32 %v1658_v59, %v1621_v62  ;;  %v1666_v27 = vor.u32 %v1664_v19, %v1634_v47  ;;  %v1301_v32 = vor.u32 %v1300_v21, %v1296_v14 }
 0x21a   : > { %2504 = vmatprep.mubr.bf16.mxu1 %v1640_v1  ;;  %v970_v11 = vsel %vm830_vm2, %v967_v41, %v969_v2  ;;  %v972_v40 = vsel %vm830_vm2, %v969_v2, %v971_v48  ;;  %v1373_v15 = vor.u32 %v1371_v12, %v1305_v52  ;;  %v973_v23 = vrot.slane %v12916_v5, 2 }
 0x21b   : > { %v1306_v29 = vsel %vm1198_vm3, %v1301_v32, %v1305_v52  ;;  %v1377_v8 = vrot.slane %v1375_v34, 1  ;;  %v1022_v36 = vpack.c.bf16 %v972_v40, %v970_v11  ;;  %v1443_v17 = vshrl.u32 %v1013_v44, 16 }
 0x21c   : > { %2417 = vmatmul.mubr.bf16.gmra.mrb[48].mxu0 %v1622_v18  ;;  %v974_v51 = vsel %vm830_vm2, %v971_v48, %v973_v23  ;;  %v13873_v28 = vrot.slane %v12716_v42, 2  ;;  %v1046_v38 = vpack.c.bf16 %v13874_v61, %v13874_v61 }
 0x21d   : > { %2424 = vmatprep.mubr.bf16.mxu0 %v1663_v7  ;;  %v1378_v31 = vsel %vm1198_vm3, %v1373_v15, %v1377_v8  ;;  %v1447_v63 = vshll.u32 %v1022_v36, 16  ;;  %v1445_v53 = vor.u32 %v1443_v17, %v1377_v8  ;;  %v1515_v5 = vshrl.u32 %v1022_v36, 16 }
 0x21e   : > { %v975_v4 = vsel %vm830_vm2, %v973_v23, %v13873_v28  ;;  %v1642_v49 = vshll.u32 %v1046_v38, 16  ;;  %v1670_v41 = vshrl.u32 %v1046_v38, 16 }
 0x21f   : > { %v1449_v37 = vrot.slane %v1447_v63, 1  ;;  %v1031_v46 = vpack.c.bf16 %v975_v4, %v974_v51 }
 0x220   : > { %v1644_v39 = vrot.slane %v1642_v49, 1 }
 0x221   : > { %2505 = vmatmul.mubr.bf16.gmra.mrb[48].mxu1 %v1635_v26  ;;  %v1450_v56 = vsel %vm1198_vm3, %v1445_v53, %v1449_v37  ;;  %v1519_v24 = vshll.u32 %v1031_v46, 16  ;;  %v1517_v25 = vor.u32 %v1515_v5, %v1449_v37  ;;  %v1579_v55 = vshrl.u32 %v1031_v46, 16 }
 0x222   : > { %2512 = vmatprep.mubr.bf16.mxu1 %v1669_v13  ;;  %v1645_v33 = vsel %vm1198_vm3, %v13876_v22, %v1644_v39  ;;  %v1672_v6 = vor.u32 %v1670_v41, %v1644_v39 }
 0x223   : > { %v1521_v62 = vrot.slane %v1519_v24, 1 }
 0x224   : > { %2425 = vmatmul.mubr.bf16.gmra.mrb[52].mxu0 %v1660_v57 }
 0x225   : > { %10402 = vmatprep.mubr.msk.bf16.mxu0 %vm12214_vm5, %v13819_v16  ;;  %v1522_v42 = vsel %vm1198_vm3, %v1517_v25, %v1521_v62  ;;  %v1581_v45 = vor.u32 %v1579_v55, %v1521_v62 }
 0x227   : > { %v1582_v3 = vsel %vm1198_vm3, %v1581_v45, %v13875_v58 }
 0x229   : > { %2513 = vmatmul.mubr.bf16.gmra.mrb[52].mxu1 %v1666_v27 }
 0x22a   : > { %10444 = vmatprep.mubr.msk.bf16.mxu1 %vm12214_vm5, %v13819_v16 }
 0x22c   : > { %10403 = vmatmul.mubr.bf16.vlgmr.msra.gmra.mrb[56].mxu0 %v1306_v29 }
 0x22d   : > { %10406 = vmatprep.mubr.msk.bf16.mxu0 %vm12214_vm5, %v13819_v16 }
 0x234   : > { %10407 = vmatmul.mubr.bf16.gmra.mrb[60].mxu0 %v1378_v31 }
 0x235   : > { %10410 = vmatprep.mubr.msk.bf16.mxu0 %vm12214_vm5, %v13819_v16 }
 0x23c   : > { %10411 = vmatmul.mubr.bf16.gmra.mrb[64].mxu0 %v1450_v56 }
 0x23d   : > { %10414 = vmatprep.mubr.msk.bf16.mxu0 %vm12214_vm5, %v13819_v16 }
 0x244   : > { %10415 = vmatmul.mubr.bf16.gmra.mrb[68].mxu0 %v1522_v42 }
 0x245   : > { %10418 = vmatprep.mubr.msk.bf16.mxu0 %vm12214_vm5, %v13819_v16 }
 0x24c   : > { %10419 = vmatmul.mubr.bf16.gmra.mrb[72].mxu0 %v1582_v3 }
 0x24d   : > { %10422 = vmatprep.mubr.msk.bf16.mxu0 %vm12214_vm5, %v13819_v16 }
 0x254   : > { %10423 = vmatmul.mubr.bf16.gmra.mrb[76].mxu0 %v1645_v33 }
 0x255   : > { %10426 = vmatprep.mubr.msk.bf16.mxu0 %vm12214_vm5, %v13819_v16 }
 0x25c   : > { %10427 = vmatmul.mubr.bf16.gmra.mrb[80].mxu0 %v1672_v6 }
 0x288   : > { %v9950_v54 = vpop.f32.mrb[0].mxu0 }
 0x289   : > { %v9951_v35 = vpop.f32.mrb[1].mxu0 }
 0x28a   : > { %v9952_v30 = vadd.f32 %v9951_v35, %v9950_v54  ;;  %v9953_v1 = vpop.f32.mrb[2].mxu0 }
 0x28b   : > { %v9954_v43 = vpop.f32.mrb[3].mxu0 }
 0x28c   : > { %v9955_v9 = vadd.f32 %v9954_v43, %v9953_v1  ;;  %v2203_v18 = vadd.f32 %v9952_v30, %v13128_v60 }
 0x28d   : > { %v10008_v7 = vpop.f32.mrb[0].mxu1 }
 0x28e   : > { %v10009_v0 = vpop.f32.mrb[1].mxu1  ;;  %v2206_v47 = vadd.f32 %v9955_v9, %v13128_v60 }
 0x28f   : > { %v10010_v50 = vadd.f32 %v10009_v0, %v10008_v7  ;;  %v10011_v10 = vpop.f32.mrb[2].mxu1 }
 0x290   : > { %v10012_v59 = vpop.f32.mrb[3].mxu1 }
 0x291   : > { %v13132_v44 = vadd.f32 %v10010_v50, %v2203_v18  ;;  %v10013_v19 = vadd.f32 %v10012_v59, %v10011_v10 }
 0x293   : > { %v13134_v2 = vadd.f32 %v10013_v19, %v2206_v47 }
 0x294   : > { %v9956_v48 = vpop.f32.mrb[4].mxu0 }
 0x295   : > { %v9957_v14 = vpop.f32.mrb[5].mxu0 }
 0x296   : > { %v9958_v21 = vadd.f32 %v9957_v14, %v9956_v48  ;;  %v9959_v12 = vpop.f32.mrb[6].mxu0 }
 0x297   : > { %v9960_v20 = vpop.f32.mrb[7].mxu0 }
 0x298   : > { %v9961_v26 = vadd.f32 %v9960_v20, %v9959_v12  ;;  %v2211_v13 = vadd.f32 %v9958_v21, %v13128_v60 }
 0x299   : > { %v10014_v52 = vpop.f32.mrb[4].mxu1 }
 0x29a   : > { %v10015_v34 = vpop.f32.mrb[5].mxu1  ;;  %v2214_v57 = vadd.f32 %v9961_v26, %v13128_v60 }
 0x29b   : > { %v10016_v27 = vadd.f32 %v10015_v34, %v10014_v52  ;;  %v10017_v32 = vpop.f32.mrb[6].mxu1 }
 0x29c   : > { %v10018_v29 = vpop.f32.mrb[7].mxu1  ;;  %v9962_v11 = vpop.f32.mrb[8].mxu0 }
 0x29d   : > { %v13138_v40 = vadd.f32 %v10016_v27, %v2211_v13  ;;  %v10019_v15 = vadd.f32 %v10018_v29, %v10017_v32  ;;  %v9963_v8 = vpop.f32.mrb[9].mxu0 }
 0x29e   : > { %v9964_v36 = vadd.f32 %v9963_v8, %v9962_v11  ;;  %v9965_v23 = vpop.f32.mrb[10].mxu0 }
 0x29f   : > { %v13140_v31 = vadd.f32 %v10019_v15, %v2214_v57  ;;  %v9966_v17 = vpop.f32.mrb[11].mxu0 }
 0x2a0   : > { %v9967_v63 = vadd.f32 %v9966_v17, %v9965_v23  ;;  %v2219_v51 = vadd.f32 %v9964_v36, %v13128_v60 }
 0x2a1   : > { %v10020_v28 = vpop.f32.mrb[8].mxu1 }
 0x2a2   : > { %v10021_v4 = vpop.f32.mrb[9].mxu1  ;;  %v2222_v53 = vadd.f32 %v9967_v63, %v13128_v60 }
 0x2a3   : > { %v10022_v37 = vadd.f32 %v10021_v4, %v10020_v28  ;;  %v10023_v46 = vpop.f32.mrb[10].mxu1 }
 0x2a4   : > { %v10024_v56 = vpop.f32.mrb[11].mxu1 }
 0x2a5   : > { %v13144_v5 = vadd.f32 %v10022_v37, %v2219_v51  ;;  %v10025_v24 = vadd.f32 %v10024_v56, %v10023_v46  ;;  %v9968_v25 = vpop.f32.mrb[12].mxu0 }
 0x2a6   : > { %v9969_v62 = vpop.f32.mrb[13].mxu0 }
 0x2a7   : > { %v13146_v42 = vadd.f32 %v10025_v24, %v2222_v53  ;;  %v9970_v55 = vadd.f32 %v9969_v62, %v9968_v25  ;;  %v9971_v45 = vpop.f32.mrb[14].mxu0 }
 0x2a8   : > { %v9972_v61 = vpop.f32.mrb[15].mxu0 }
 0x2a9   : > { %v9973_v38 = vadd.f32 %v9972_v61, %v9971_v45  ;;  %v2227_v58 = vadd.f32 %v9970_v55, %v13128_v60 }
 0x2ab   : > { %v2230_v39 = vadd.f32 %v9973_v38, %v13128_v60 }
 0x2ac   : > { %v10026_v3 = vpop.f32.mrb[12].mxu1 }
 0x2ad   : > { %v10027_v49 = vpop.f32.mrb[13].mxu1 }
 0x2ae   : > { %v10028_v22 = vadd.f32 %v10027_v49, %v10026_v3  ;;  %v10029_v33 = vpop.f32.mrb[14].mxu1 }
 0x2af   : > { %v10030_v41 = vpop.f32.mrb[15].mxu1  ;;  %v9974_v6 = vpop.f32.mrb[16].mxu0 }
 0x2b0   : > { %v13150_v54 = vadd.f32 %v10028_v22, %v2227_v58  ;;  %v10031_v35 = vadd.f32 %v10030_v41, %v10029_v33  ;;  %v9975_v30 = vpop.f32.mrb[17].mxu0 }
 0x2b1   : > { %v9976_v1 = vadd.f32 %v9975_v30, %v9974_v6  ;;  %v9977_v43 = vpop.f32.mrb[18].mxu0 }
 0x2b2   : > { %v13152_v9 = vadd.f32 %v10031_v35, %v2230_v39  ;;  %v9978_v18 = vpop.f32.mrb[19].mxu0 }
 0x2b3   : > { %v9979_v7 = vadd.f32 %v9978_v18, %v9977_v43  ;;  %v2235_v0 = vadd.f32 %v9976_v1, %v13128_v60 }
 0x2b4   : > { %v10032_v47 = vpop.f32.mrb[16].mxu1 }
 0x2b5   : > { %v10033_v50 = vpop.f32.mrb[17].mxu1  ;;  %v2238_v10 = vadd.f32 %v9979_v7, %v13128_v60 }
 0x2b6   : > { %v10034_v59 = vadd.f32 %v10033_v50, %v10032_v47  ;;  %v10035_v19 = vpop.f32.mrb[18].mxu1 }
 0x2b7   : > { %v10036_v48 = vpop.f32.mrb[19].mxu1  ;;  %v9980_v14 = vpop.f32.mrb[20].mxu0 }
 0x2b8   : > { %v13156_v21 = vadd.f32 %v10034_v59, %v2235_v0  ;;  %v10037_v12 = vadd.f32 %v10036_v48, %v10035_v19  ;;  %v9981_v20 = vpop.f32.mrb[21].mxu0 }
 0x2b9   : > { %v9982_v26 = vadd.f32 %v9981_v20, %v9980_v14  ;;  %v9983_v13 = vpop.f32.mrb[22].mxu0 }
 0x2ba   : > { %v13158_v52 = vadd.f32 %v10037_v12, %v2238_v10  ;;  %v9984_v34 = vpop.f32.mrb[23].mxu0 }
 0x2bb   : > { %v9985_v57 = vadd.f32 %v9984_v34, %v9983_v13  ;;  %v2243_v27 = vadd.f32 %v9982_v26, %v13128_v60  ;;  %v10812_v13 = vld [vmem:[#allocation7 + $0xc0] sm:$0xff]  }
 0x2bc   : > { %v10038_v32 = vpop.f32.mrb[20].mxu1  ;;  %10225 = vmatprep.subr.bf16.mxu0 %v10812_v13 }
 0x2bd   : > { %v10039_v29 = vpop.f32.mrb[21].mxu1  ;;  %v2246_v11 = vadd.f32 %v9985_v57, %v13128_v60 }
 0x2be   : > { %v10040_v15 = vadd.f32 %v10039_v29, %v10038_v32  ;;  %v10041_v8 = vpop.f32.mrb[22].mxu1  ;;  %v10814_v32 = vld [vmem:[#allocation7 + $0x80] sm:$0xff]  }
 0x2bf   : > { %v10042_v36 = vpop.f32.mrb[23].mxu1  ;;  %v9986_v23 = vpop.f32.mrb[24].mxu0  ;;  %10226 = vmatpush3.bf16.msra.mxu0 %v10814_v32 }
 0x2c0   : > { %v13162_v17 = vadd.f32 %v10040_v15, %v2243_v27  ;;  %v10043_v63 = vadd.f32 %v10042_v36, %v10041_v8  ;;  %v9987_v51 = vpop.f32.mrb[25].mxu0 }
 0x2c1   : > { %v9988_v28 = vadd.f32 %v9987_v51, %v9986_v23  ;;  %v9989_v4 = vpop.f32.mrb[26].mxu0 }
 0x2c2   : > { %v13164_v53 = vadd.f32 %v10043_v63, %v2246_v11  ;;  %v9990_v37 = vpop.f32.mrb[27].mxu0 }
 0x2c3   : > { %v2251_v46 = vadd.f32 %v9988_v28, %v13128_v60 }
 0x2c4   : > { %v10044_v56 = vpop.f32.mrb[24].mxu1 }
 0x2c5   : > { %v10045_v24 = vpop.f32.mrb[25].mxu1 }
 0x2c6   : > { %v10046_v25 = vadd.f32 %v10045_v24, %v10044_v56  ;;  %v10047_v62 = vpop.f32.mrb[26].mxu1 }
 0x2c7   : > { %v10066_v55 = vpop.f32.mrb[28].mxu0  ;;  %v10048_v45 = vpop.f32.mrb[27].mxu1 }
 0x2c8   : > { %v13167_v61 = vadd.f32 %v10046_v25, %v2251_v46  ;;  %v10067_v38 = vpop.f32.mrb[29].mxu0 }
 0x2c9   : > { %v10068_v58 = vadd.f32 %v10067_v38, %v10066_v55  ;;  %v10069_v3 = vpop.f32.mrb[30].mxu0 }
 0x2ca   : > { %v10070_v49 = vpop.f32.mrb[31].mxu0 }
 0x2cb   : > { %v2379_v39 = vadd.f32 %v10068_v58, %v13132_v44  ;;  %v10071_v22 = vadd.f32 %v10070_v49, %v10069_v3 }
 0x2cc   : > { %v10124_v33 = vpop.f32.mrb[28].mxu1 }
 0x2cd   : > { %v2382_v41 = vadd.f32 %v10071_v22, %v13134_v2  ;;  %v10125_v6 = vpop.f32.mrb[29].mxu1 }
 0x2ce   : > { %v10126_v60 = vadd.f32 %v10125_v6, %v10124_v33  ;;  %v10127_v35 = vpop.f32.mrb[30].mxu1 }
 0x2cf   : > { %v10128_v30 = vpop.f32.mrb[31].mxu1  ;;  %v10072_v1 = vpop.f32.mrb[32].mxu0 }
 0x2d0   : > { %v10129_v43 = vadd.f32 %v10128_v30, %v10127_v35  ;;  %v10073_v18 = vpop.f32.mrb[33].mxu0  ;;  %v13171_v7 = vadd.f32 %v10126_v60, %v2379_v39 }
 0x2d1   : > { %v10074_v0 = vadd.f32 %v10073_v18, %v10072_v1  ;;  %v10075_v47 = vpop.f32.mrb[34].mxu0 }
 0x2d2   : > { %v10076_v50 = vpop.f32.mrb[35].mxu0  ;;  %v13173_v10 = vadd.f32 %v10129_v43, %v2382_v41 }
 0x2d3   : > { %v2387_v44 = vadd.f32 %v10074_v0, %v13138_v40  ;;  %v10077_v59 = vadd.f32 %v10076_v50, %v10075_v47 }
 0x2d4   : > { %v10130_v19 = vpop.f32.mrb[32].mxu1 }
 0x2d5   : > { %v2390_v2 = vadd.f32 %v10077_v59, %v13140_v31  ;;  %v10131_v48 = vpop.f32.mrb[33].mxu1 }
 0x2d6   : > { %v10132_v14 = vadd.f32 %v10131_v48, %v10130_v19  ;;  %v10133_v12 = vpop.f32.mrb[34].mxu1 }
 0x2d7   : > { %v10134_v20 = vpop.f32.mrb[35].mxu1  ;;  %v10078_v26 = vpop.f32.mrb[36].mxu0 }
 0x2d8   : > { %v10135_v34 = vadd.f32 %v10134_v20, %v10133_v12  ;;  %v10079_v57 = vpop.f32.mrb[37].mxu0  ;;  %v13177_v27 = vadd.f32 %v10132_v14, %v2387_v44 }
 0x2d9   : > { %v10080_v29 = vadd.f32 %v10079_v57, %v10078_v26  ;;  %v10081_v11 = vpop.f32.mrb[38].mxu0 }
 0x2da   : > { %v10082_v15 = vpop.f32.mrb[39].mxu0  ;;  %v13179_v40 = vadd.f32 %v10135_v34, %v2390_v2 }
 0x2db   : > { %v2395_v31 = vadd.f32 %v10080_v29, %v13144_v5  ;;  %v10083_v8 = vadd.f32 %v10082_v15, %v10081_v11 }
 0x2dc   : > { %v10136_v36 = vpop.f32.mrb[36].mxu1 }
 0x2dd   : > { %v2398_v23 = vadd.f32 %v10083_v8, %v13146_v42  ;;  %v10137_v63 = vpop.f32.mrb[37].mxu1 }
 0x2de   : > { %v10138_v51 = vadd.f32 %v10137_v63, %v10136_v36  ;;  %v10139_v28 = vpop.f32.mrb[38].mxu1 }
 0x2df   : > { %v10140_v4 = vpop.f32.mrb[39].mxu1  ;;  %v10084_v37 = vpop.f32.mrb[40].mxu0 }
 0x2e0   : > { %v10141_v46 = vadd.f32 %v10140_v4, %v10139_v28  ;;  %v10085_v56 = vpop.f32.mrb[41].mxu0  ;;  %v13183_v24 = vadd.f32 %v10138_v51, %v2395_v31 }
 0x2e1   : > { %v10086_v25 = vadd.f32 %v10085_v56, %v10084_v37  ;;  %v10087_v62 = vpop.f32.mrb[42].mxu0 }
 0x2e2   : > { %v10088_v55 = vpop.f32.mrb[43].mxu0  ;;  %v13185_v45 = vadd.f32 %v10141_v46, %v2398_v23 }
 0x2e3   : > { %v2403_v5 = vadd.f32 %v10086_v25, %v13150_v54  ;;  %v10089_v38 = vadd.f32 %v10088_v55, %v10087_v62 }
 0x2e4   : > { %v10142_v58 = vpop.f32.mrb[40].mxu1 }
 0x2e5   : > { %v2406_v42 = vadd.f32 %v10089_v38, %v13152_v9  ;;  %v10143_v3 = vpop.f32.mrb[41].mxu1 }
 0x2e6   : > { %v10144_v49 = vadd.f32 %v10143_v3, %v10142_v58  ;;  %v10145_v39 = vpop.f32.mrb[42].mxu1 }
 0x2e7   : > { %v10146_v22 = vpop.f32.mrb[43].mxu1  ;;  %v10090_v33 = vpop.f32.mrb[44].mxu0 }
 0x2e8   : > { %v10147_v41 = vadd.f32 %v10146_v22, %v10145_v39  ;;  %v10091_v6 = vpop.f32.mrb[45].mxu0  ;;  %v13189_v60 = vadd.f32 %v10144_v49, %v2403_v5 }
 0x2e9   : > { %v10092_v35 = vadd.f32 %v10091_v6, %v10090_v33  ;;  %v10093_v30 = vpop.f32.mrb[46].mxu0 }
 0x2ea   : > { %v10094_v1 = vpop.f32.mrb[47].mxu0  ;;  %v13191_v43 = vadd.f32 %v10147_v41, %v2406_v42 }
 0x2eb   : > { %v2411_v54 = vadd.f32 %v10092_v35, %v13156_v21  ;;  %v10095_v18 = vadd.f32 %v10094_v1, %v10093_v30 }
 0x2ec   : > { %v10148_v0 = vpop.f32.mrb[44].mxu1 }
 0x2ed   : > { %v2414_v9 = vadd.f32 %v10095_v18, %v13158_v52  ;;  %v10149_v47 = vpop.f32.mrb[45].mxu1 }
 0x2ee   : > { %v10150_v50 = vadd.f32 %v10149_v47, %v10148_v0  ;;  %v10151_v44 = vpop.f32.mrb[46].mxu1 }
 0x2ef   : > { %v10152_v59 = vpop.f32.mrb[47].mxu1  ;;  %v10096_v19 = vpop.f32.mrb[48].mxu0 }
 0x2f0   : > { %v10153_v2 = vadd.f32 %v10152_v59, %v10151_v44  ;;  %v10097_v48 = vpop.f32.mrb[49].mxu0  ;;  %v13195_v14 = vadd.f32 %v10150_v50, %v2411_v54 }
 0x2f1   : > { %v10098_v12 = vadd.f32 %v10097_v48, %v10096_v19  ;;  %v10099_v20 = vpop.f32.mrb[50].mxu0 }
 0x2f2   : > { %v10100_v26 = vpop.f32.mrb[51].mxu0  ;;  %v13197_v13 = vadd.f32 %v10153_v2, %v2414_v9 }
 0x2f3   : > { %v2419_v21 = vadd.f32 %v10098_v12, %v13162_v17  ;;  %v10101_v34 = vadd.f32 %v10100_v26, %v10099_v20 }
 0x2f4   : > { %v10154_v57 = vpop.f32.mrb[48].mxu1 }
 0x2f5   : > { %v2422_v52 = vadd.f32 %v10101_v34, %v13164_v53  ;;  %v10155_v32 = vpop.f32.mrb[49].mxu1 }
 0x2f6   : > { %v10156_v29 = vadd.f32 %v10155_v32, %v10154_v57  ;;  %v10157_v11 = vpop.f32.mrb[50].mxu1 }
 0x2f7   : > { %v10158_v15 = vpop.f32.mrb[51].mxu1  ;;  %v10102_v31 = vpop.f32.mrb[52].mxu0 }
 0x2f8   : > { %v10159_v8 = vadd.f32 %v10158_v15, %v10157_v11  ;;  %v10103_v36 = vpop.f32.mrb[53].mxu0  ;;  %v13201_v23 = vadd.f32 %v10156_v29, %v2419_v21 }
 0x2f9   : > { %v10104_v63 = vadd.f32 %v10103_v36, %v10102_v31  ;;  %v10105_v51 = vpop.f32.mrb[54].mxu0 }
 0x2fa   : > { %v10106_v28 = vpop.f32.mrb[55].mxu0  ;;  %v13203_v4 = vadd.f32 %v10159_v8, %v2422_v52 }
 0x2fb   : > { %v2427_v17 = vadd.f32 %v10104_v63, %v13167_v61 }
 0x2fc   : > { %v10160_v37 = vpop.f32.mrb[52].mxu1 }
 0x2fd   : > { %v10161_v46 = vpop.f32.mrb[53].mxu1 }
 0x2fe   : > { %v10162_v56 = vadd.f32 %v10161_v46, %v10160_v37  ;;  %v10163_v53 = vpop.f32.mrb[54].mxu1 }
 0x2ff   : > { %v2554_v25 = vpop.f32.mrb[56].mxu0  ;;  %v10164_v62 = vpop.f32.mrb[55].mxu1 }
 0x300   : > { %v2555_v55 = vadd.f32 %v2554_v25, %v13171_v7  ;;  %v10404_v5 = vpop.f32.mrb[57].mxu0  ;;  %v13207_v38 = vadd.f32 %v10162_v56, %v2427_v17 }
 0x301   : > { %v2557_v58 = vpop.f32.mrb[58].mxu0 }
 0x302   : > { %v13209_v42 = vmax.f32 %v2555_v55, 0.0  ;;  %v2558_v3 = vadd.f32 %v2557_v58, %v13173_v10  ;;  %v10405_v49 = vpop.f32.mrb[59].mxu0 }
 0x304   : > { %v2609_v39 = vmax.f32 %v2558_v3, 0.0  ;;  %v2621_v61 = vrot.slane %v13209_v42, 4  ;;  %v2636_v22 = vrot.slane %v13209_v42, 1 }
 0x306   : > { %v2637_v33 = vrot.slane %v2609_v39, 1  ;;  %v2687_v41 = vrot.slane %v2609_v39, 4  ;;  %v2690_v59 = vrot.slane %v2609_v39, 2  ;;  %v2742_v19 = vrot.slane %v2609_v39, 3 }
 0x307   : > { %v2562_v6 = vpop.f32.mrb[60].mxu0 }
 0x308   : > { %v2563_v35 = vadd.f32 %v2562_v6, %v13177_v27  ;;  %v10408_v7 = vpop.f32.mrb[61].mxu0  ;;  %v2638_v30 = vsel %vm791_vm1, %v2636_v22, %v2637_v33  ;;  %v13219_v1 = vsel %vm751_vm0, %v2687_v41, %v2621_v61 }
 0x309   : > { %v2565_v10 = vpop.f32.mrb[62].mxu0  ;;  %v2674_v54 = vmax.f32 %v13209_v42, %v2638_v30 }
 0x30a   : > { %v2610_v18 = vmax.f32 %v2563_v35, 0.0  ;;  %v2566_v0 = vadd.f32 %v2565_v10, %v13179_v40  ;;  %v10409_v9 = vpop.f32.mrb[63].mxu0 }
 0x30c   : > { %v2639_v47 = vrot.slane %v2610_v18, 1  ;;  %v2691_v50 = vrot.slane %v2610_v18, 2  ;;  %v2743_v44 = vrot.slane %v2610_v18, 3  ;;  %v2611_v27 = vmax.f32 %v2566_v0, 0.0 }
 0x30e   : > { %v2640_v2 = vsel %vm791_vm1, %v2637_v33, %v2639_v47  ;;  %v2641_v48 = vrot.slane %v2611_v27, 1  ;;  %v2693_v12 = vrot.slane %v2611_v27, 2  ;;  %v2745_v20 = vrot.slane %v2611_v27, 3 }
 0x30f   : > { %v2570_v26 = vpop.f32.mrb[64].mxu0  ;;  %v2675_v21 = vmax.f32 %v2609_v39, %v2640_v2  ;;  %v2692_v34 = vsel %vm830_vm2, %v2690_v59, %v2691_v50  ;;  %v2744_v57 = vsel %vm2741_vm6, %v2742_v19, %v2743_v44 }
 0x310   : > { %v2642_v40 = vsel %vm791_vm1, %v2639_v47, %v2641_v48  ;;  %v2571_v52 = vadd.f32 %v2570_v26, %v13183_v24  ;;  %v10412_v32 = vpop.f32.mrb[65].mxu0  ;;  %v2694_v29 = vsel %vm830_vm2, %v2691_v50, %v2693_v12  ;;  %v2728_v11 = vmax.f32 %v2674_v54, %v2692_v34 }
 0x311   : > { %v2573_v15 = vpop.f32.mrb[66].mxu0  ;;  %v2729_v31 = vmax.f32 %v2675_v21, %v2694_v29  ;;  %v2746_v8 = vsel %vm2741_vm6, %v2743_v44, %v2745_v20  ;;  %v2676_v36 = vmax.f32 %v2610_v18, %v2642_v40 }
 0x312   : > { %v2612_v63 = vmax.f32 %v2571_v52, 0.0  ;;  %v2574_v51 = vadd.f32 %v2573_v15, %v13185_v45  ;;  %v10413_v28 = vpop.f32.mrb[67].mxu0  ;;  %v2780_v17 = vmax.f32 %v2728_v11, %v2744_v57 }
 0x313   : > { %v2781_v37 = vmax.f32 %v2729_v31, %v2746_v8 }
 0x314   : > { %v2643_v46 = vrot.slane %v2612_v63, 1  ;;  %v2695_v56 = vrot.slane %v2612_v63, 2  ;;  %v2747_v53 = vrot.slane %v2612_v63, 3  ;;  %v2613_v25 = vmax.f32 %v2574_v51, 0.0 }
 0x315   : > { %v2798_v24 = vpack.c.bf16 %v2781_v37, %v2780_v17 }
 0x316   : > { %v2644_v62 = vsel %vm791_vm1, %v2641_v48, %v2643_v46  ;;  %v2645_v55 = vrot.slane %v2613_v25, 1  ;;  %v2697_v5 = vrot.slane %v2613_v25, 2  ;;  %v2749_v58 = vrot.slane %v2613_v25, 3 }
 0x317   : > { %v2578_v3 = vpop.f32.mrb[68].mxu0  ;;  %10431 = vmatpush3.bf16.msra.mxu1 %v2798_v24  ;;  %v2677_v49 = vmax.f32 %v2611_v27, %v2644_v62  ;;  %v2696_v39 = vsel %vm830_vm2, %v2693_v12, %v2695_v56  ;;  %v2748_v45 = vsel %vm2741_vm6, %v2745_v20, %v2747_v53 }
 0x318   : > { %v2646_v22 = vsel %vm791_vm1, %v2643_v46, %v2645_v55  ;;  %v2579_v33 = vadd.f32 %v2578_v3, %v13189_v60  ;;  %v10416_v41 = vpop.f32.mrb[69].mxu0  ;;  %10432 = vmatprep.subr.bf16.mxu1 %v13819_v16  ;;  %v2698_v6 = vsel %vm830_vm2, %v2695_v56, %v2697_v5  ;;  %v2730_v35 = vmax.f32 %v2676_v36, %v2696_v39 }
 0x319   : > { %v2581_v7 = vpop.f32.mrb[70].mxu0  ;;  %v2731_v30 = vmax.f32 %v2677_v49, %v2698_v6  ;;  %v2750_v10 = vsel %vm2741_vm6, %v2747_v53, %v2749_v58  ;;  %v2678_v54 = vmax.f32 %v2612_v63, %v2646_v22 }
 0x31a   : > { %v2614_v18 = vmax.f32 %v2579_v33, 0.0  ;;  %v2582_v0 = vadd.f32 %v2581_v7, %v13191_v43  ;;  %v10417_v9 = vpop.f32.mrb[71].mxu0  ;;  %v2782_v47 = vmax.f32 %v2730_v35, %v2748_v45 }
 0x31b   : > { %v2783_v50 = vmax.f32 %v2731_v30, %v2750_v10 }
 0x31c   : > { %v2647_v44 = vrot.slane %v2614_v18, 1  ;;  %v2699_v27 = vrot.slane %v2614_v18, 2  ;;  %v2751_v60 = vrot.slane %v2614_v18, 3  ;;  %v2615_v59 = vmax.f32 %v2582_v0, 0.0 }
 0x31d   : > { %v2799_v19 = vpack.c.bf16 %v2783_v50, %v2782_v47 }
 0x31e   : > { %v2648_v2 = vsel %vm791_vm1, %v2645_v55, %v2647_v44  ;;  %v2649_v48 = vrot.slane %v2615_v59, 1  ;;  %v2701_v12 = vrot.slane %v2615_v59, 2  ;;  %v2753_v20 = vrot.slane %v2615_v59, 3 }
 0x31f   : > { %v2586_v26 = vpop.f32.mrb[72].mxu0  ;;  %10433 = vmatpush3.bf16.msra.mxu1 %v2799_v19  ;;  %v2679_v21 = vmax.f32 %v2613_v25, %v2648_v2  ;;  %v2700_v34 = vsel %vm830_vm2, %v2697_v5, %v2699_v27  ;;  %v2752_v43 = vsel %vm2741_vm6, %v2749_v58, %v2751_v60 }
 0x320   : > { %v2650_v57 = vsel %vm791_vm1, %v2647_v44, %v2649_v48  ;;  %v2587_v40 = vadd.f32 %v2586_v26, %v13195_v14  ;;  %v10420_v52 = vpop.f32.mrb[73].mxu0  ;;  %10434 = vmatprep.subr.bf16.mxu1 %v13819_v16  ;;  %v2702_v32 = vsel %vm830_vm2, %v2699_v27, %v2701_v12  ;;  %v2732_v29 = vmax.f32 %v2678_v54, %v2700_v34 }
 0x321   : > { %v2589_v11 = vpop.f32.mrb[74].mxu0  ;;  %v2733_v15 = vmax.f32 %v2679_v21, %v2702_v32  ;;  %v2754_v31 = vsel %vm2741_vm6, %v2751_v60, %v2753_v20  ;;  %v2680_v8 = vmax.f32 %v2614_v18, %v2650_v57 }
 0x322   : > { %v2616_v36 = vmax.f32 %v2587_v40, 0.0  ;;  %v2590_v63 = vadd.f32 %v2589_v11, %v13197_v13  ;;  %v10421_v51 = vpop.f32.mrb[75].mxu0  ;;  %v2784_v28 = vmax.f32 %v2732_v29, %v2752_v43 }
 0x323   : > { %v2785_v17 = vmax.f32 %v2733_v15, %v2754_v31 }
 0x324   : > { %v2651_v37 = vrot.slane %v2616_v36, 1  ;;  %v2703_v46 = vrot.slane %v2616_v36, 2  ;;  %v2755_v14 = vrot.slane %v2616_v36, 3  ;;  %v2617_v56 = vmax.f32 %v2590_v63, 0.0 }
 0x325   : > { %v2800_v53 = vpack.c.bf16 %v2785_v17, %v2784_v28  ;;  %v2765_v17 = vrot.slane %v13219_v1, 3 }
 0x326   : > { %v2652_v25 = vsel %vm791_vm1, %v2649_v48, %v2651_v37  ;;  %v2653_v24 = vrot.slane %v2617_v56, 1  ;;  %v2705_v62 = vrot.slane %v2617_v56, 2  ;;  %v2757_v55 = vrot.slane %v2617_v56, 3 }
 0x327   : > { %v2594_v5 = vpop.f32.mrb[76].mxu0  ;;  %10435 = vmatpush3.bf16.msra.mxu1 %v2800_v53  ;;  %v2681_v58 = vmax.f32 %v2615_v59, %v2652_v25  ;;  %v2704_v3 = vsel %vm830_vm2, %v2701_v12, %v2703_v46  ;;  %v2756_v13 = vsel %vm2741_vm6, %v2753_v20, %v2755_v14 }
 0x328   : > { %v2654_v49 = vsel %vm791_vm1, %v2651_v37, %v2653_v24  ;;  %v2595_v39 = vadd.f32 %v2594_v5, %v13201_v23  ;;  %v10424_v45 = vpop.f32.mrb[77].mxu0  ;;  %10436 = vmatprep.subr.bf16.mxu1 %v13819_v16  ;;  %v2706_v22 = vsel %vm830_vm2, %v2703_v46, %v2705_v62  ;;  %v2734_v33 = vmax.f32 %v2680_v8, %v2704_v3 }
 0x329   : > { %v2597_v41 = vpop.f32.mrb[78].mxu0  ;;  %v2735_v6 = vmax.f32 %v2681_v58, %v2706_v22  ;;  %v2758_v35 = vsel %vm2741_vm6, %v2755_v14, %v2757_v55  ;;  %v2682_v7 = vmax.f32 %v2616_v36, %v2654_v49  ;;  %v10813_v45 = vld [vmem:[#allocation7] sm:$0xff]   ;;  %v10809_v22 = vld [vmem:[#allocation6 + $0x8] sm:$0xff]  }
 0x32a   : > { %v2618_v30 = vmax.f32 %v2595_v39, 0.0  ;;  %v2598_v10 = vadd.f32 %v2597_v41, %v13203_v4  ;;  %v10425_v54 = vpop.f32.mrb[79].mxu0  ;;  %v2786_v18 = vmax.f32 %v2734_v33, %v2756_v13  ;;  %v10811_v13 = vld [vmem:[#allocation7 + $0x40] sm:$0xff]   ;;  %v10808_v39 = vld [vmem:[#allocation6] sm:$0xff]  }
 0x32b   : > { %v2787_v0 = vmax.f32 %v2735_v6, %v2758_v35  ;;  %v10810_v33 = vld [vmem:[#allocation6 + $0x10] ss:$0 sps:$4 sm:$0x33]   ;;  %v10815_v41 = vld [vmem:[#allocation7 + $0x48] sm:$0xff]   ;;  %v10821_v54 = vld [vmem:[#allocation7 + $0x10] sm:$0xff]  }
 0x32c   : > { %v2655_v9 = vrot.slane %v2618_v30, 1  ;;  %v2707_v47 = vrot.slane %v2618_v30, 2  ;;  %v2759_v23 = vrot.slane %v2618_v30, 3  ;;  %v2619_v50 = vmax.f32 %v2598_v10, 0.0  ;;  %v10816_v6 = vld [vmem:[#allocation7 + $0xc8] sm:$0xff]   ;;  %v10820_v10 = vld [vmem:[#allocation7 + $0xd0] sm:$0xff]  }
 0x32d   : > { %v2801_v44 = vpack.c.bf16 %v2787_v0, %v2786_v18  ;;  %v10817_v35 = vld [vmem:[#allocation7 + $0x8] sm:$0xff]   ;;  %10227 = vmatprep.subr.bf16.mxu0 %v10816_v6  ;;  %v10822_v18 = vld [vmem:[#allocation7 + $0x90] sm:$0xff]   ;;  %v10823_v0 = vld [vmem:[#allocation7 + $0x58] sm:$0xff]  }
 0x32e   : > { %v2656_v27 = vsel %vm791_vm1, %v2653_v24, %v2655_v9  ;;  %v2657_v60 = vrot.slane %v2619_v50, 1  ;;  %v2709_v59 = vrot.slane %v2619_v50, 2  ;;  %v2761_v19 = vrot.slane %v2619_v50, 3 }
 0x32f   : > { %v2602_v2 = vpop.f32.mrb[80].mxu0  ;;  %10437 = vmatpush3.bf16.msra.mxu1 %v2801_v44  ;;  %v2683_v48 = vmax.f32 %v2617_v56, %v2656_v27  ;;  %v2708_v12 = vsel %vm830_vm2, %v2705_v62, %v2707_v47  ;;  %v2760_v4 = vsel %vm2741_vm6, %v2757_v55, %v2759_v23  ;;  %v10828_v44 = vld [vmem:[#allocation7 + $0xe0] sm:$0xff]  }
 0x330   : > { %v2658_v20 = vsel %vm791_vm1, %v2655_v9, %v2657_v60  ;;  %v2603_v26 = vadd.f32 %v2602_v2, %v13207_v38  ;;  %v10428_v21 = vpop.f32.mrb[81].mxu0  ;;  %10438 = vmatprep.subr.bf16.mxu1 %v13819_v16  ;;  %v2710_v34 = vsel %vm830_vm2, %v2707_v47, %v2709_v59  ;;  %v2736_v43 = vmax.f32 %v2682_v7, %v2708_v12  ;;  %v10818_v7 = vld [vmem:[#allocation7 + $0x88] sm:$0xff]   ;;  %v10824_v9 = vld [vmem:[#allocation7 + $0xd8] sm:$0xff]   ;;  %v10829_v27 = vld [vmem:[#allocation7 + $0x20] sm:$0xff]  }
 0x331   : > { %v2605_v57 = vpop.f32.mrb[82].mxu0  ;;  %v2737_v40 = vmax.f32 %v2683_v48, %v2710_v34  ;;  %v2762_v52 = vsel %vm2741_vm6, %v2759_v23, %v2761_v19  ;;  %v2684_v32 = vmax.f32 %v2618_v30, %v2658_v20  ;;  %v2713_v38 = vrot.slane %v13219_v1, 2  ;;  %10228 = vmatpush3.bf16.msra.mxu0 %v10818_v7  ;;  %v10819_v30 = vld [vmem:[#allocation7 + $0x50] sm:$0xff]   ;;  %v10825_v47 = vld [vmem:[#allocation7 + $0x18] sm:$0xff]   ;;  %v10833_v2 = vld [vmem:[#allocation7 + $0x28] sm:$0xff]  }
 0x332   : > { %v2620_v29 = vmax.f32 %v2603_v26, 0.0  ;;  %v10429_v11 = vpop.f32.mrb[83].mxu0  ;;  %v2788_v15 = vmax.f32 %v2736_v43, %v2760_v4  ;;  %10229 = vmatprep.subr.bf16.mxu0 %v10820_v10  ;;  %v10826_v23 = vld [vmem:[#allocation7 + $0x98] sm:$0xff]   ;;  %v10834_v48 = vld [vmem:[#allocation7 + $0xa8] sm:$0xff]   ;;  %v10835_v12 = vld [vmem:[#allocation7 + $0x70] sm:$0xff]  }
 0x333   : > { %v2789_v31 = vmax.f32 %v2737_v40, %v2762_v52  ;;  %v10836_v4 = vld [vmem:[#allocation7 + $0xf0] sm:$0xff]   ;;  %v10839_v21 = vld [vmem:[#allocation7 + $0x78] sm:$0xff]   ;;  %v10843_v40 = vld [vmem:[#allocation7 + $0x140] sm:$0xff]  }
 0x334   : > { %v2622_v8 = vsel %vm751_vm0, %v2621_v61, %v2620_v29  ;;  %v10837_v20 = vld [vmem:[#allocation7 + $0x30] sm:$0xff]   ;;  %v10840_v34 = vld [vmem:[#allocation7 + $0xf8] sm:$0xff]   ;;  %v10844_v52 = vld [vmem:[#allocation7 + $0x1c0] sm:$0xff]  }
 0x335   : > { %v2659_v36 = vrot.slane %v2622_v8, 1  ;;  %v2711_v63 = vrot.slane %v2622_v8, 2  ;;  %v2763_v51 = vrot.slane %v2622_v8, 3  ;;  %v2802_v28 = vpack.c.bf16 %v2789_v31, %v2788_v15  ;;  %10230 = vmatpush3.bf16.msra.mxu0 %v10822_v18  ;;  %v10838_v26 = vld [vmem:[#allocation7 + $0xb0] sm:$0xff]   ;;  %v10841_v43 = vld [vmem:[#allocation7 + $0x38] sm:$0xff]  }
 0x336   : > { %10231 = vmatprep.subr.bf16.mxu0 %v10824_v9  ;;  %v10842_v57 = vld [vmem:[#allocation7 + $0xb8] sm:$0xff]  }
 0x337   : > { %v2660_v37 = vsel %vm791_vm1, %v2657_v60, %v2659_v36  ;;  %v2686_v46 = vmax.f32 %v2620_v29, %v2659_v36  ;;  %v2712_v14 = vsel %vm830_vm2, %v2709_v59, %v2711_v63  ;;  %v2714_v56 = vsel %vm830_vm2, %v2711_v63, %v2713_v38  ;;  %10439 = vmatpush3.bf16.msra.mxu1 %v2802_v28  ;;  %v10830_v60 = vld [vmem:[#allocation7 + $0xa0] sm:$0xff]   ;;  %v10831_v59 = vld [vmem:[#allocation7 + $0x68] sm:$0xff]  }
 0x338   : > { %v2685_v53 = vmax.f32 %v2619_v50, %v2660_v37  ;;  %10440 = vmatprep.subr.bf16.mxu1 %v13819_v16  ;;  %v2738_v42 = vmax.f32 %v2684_v32, %v2712_v14  ;;  %v2764_v61 = vsel %vm2741_vm6, %v2761_v19, %v2763_v51  ;;  %v2766_v25 = vsel %vm2741_vm6, %v2763_v51, %v2765_v17  ;;  %v10827_v50 = vld [vmem:[#allocation7 + $0x60] sm:$0xff]   ;;  %v10832_v19 = vld [vmem:[#allocation7 + $0xe8] sm:$0xff]  }
 0x339   : > { %v2740_v24 = vmax.f32 %v2686_v46, %v2713_v38  ;;  %10232 = vmatpush3.bf16.msra.mxu0 %v10826_v23 }
 0x33a   : > { %v2739_v62 = vmax.f32 %v2685_v53, %v2714_v56  ;;  %v2790_v55 = vmax.f32 %v2738_v42, %v2764_v61  ;;  %10233 = vmatprep.subr.bf16.mxu0 %v10828_v44 }
 0x33b   : > { %v2792_v1 = vmax.f32 %v2740_v24, %v2765_v17 }
 0x33c   : > { %v2791_v5 = vmax.f32 %v2739_v62, %v2766_v25 }
 0x33d   : > { %v2804_v3 = vpack.c.bf16 %v2792_v1, %v2792_v1  ;;  %10234 = vmatpush3.bf16.msra.mxu0 %v10830_v60 }
 0x33e   : > { %v2803_v58 = vpack.c.bf16 %v2791_v5, %v2790_v55  ;;  %10235 = vmatprep.subr.bf16.mxu0 %v10832_v19 }
 0x33f   : > { %v2830_v49 = vsel %vm2828_vm7, %v2804_v3, 0 }
 0x340   : > { %10441 = vmatpush3.bf16.msra.mxu1 %v2803_v58 }
 0x341   : > { %10442 = vmatprep.subr.bf16.mxu1 %v13819_v16  ;;  %10236 = vmatpush3.bf16.msra.mxu0 %v10834_v48 }
 0x342   : > { %10237 = vmatprep.subr.bf16.mxu0 %v10836_v4 }
 0x344   : > { %10443 = vmatpush3.bf16.msra.mxu1 %v2830_v49 }
 0x345   : > { %10191 = vmatprep.subr.bf16.mxu1 %v10811_v13  ;;  %10238 = vmatpush3.bf16.msra.mxu0 %v10838_v26 }
 0x346   : > { %10239 = vmatprep.subr.bf16.mxu0 %v10840_v34 }
 0x347   : > { %10445 = vmatmul.mubr.msk.bf16.vlgmr.msra.gmra.mrb[56].mxu1 %vm2818_vm8, %v10808_v39 }
 0x348   : > { %10448 = vmatprep.mubr.msk.bf16.mxu1 %vm12214_vm5, %v13819_v16  ;;  %10192 = vmatpush3.bf16.msra.mxu1 %v10813_v45 }
 0x349   : > { %10193 = vmatprep.subr.bf16.mxu1 %v10815_v41  ;;  %10240 = vmatpush3.bf16.msra.mxu0 %v10842_v57 }
 0x34a   : > { %10293 = vmatprep.subr.bf16.mxu0 %v10844_v52 }
 0x34c   : > { %10194 = vmatpush3.bf16.msra.mxu1 %v10817_v35 }
 0x34d   : > { %10195 = vmatprep.subr.bf16.mxu1 %v10819_v30 }
 0x34f   : > { %10449 = vmatmul.mubr.msk.bf16.gmra.mrb[60].mxu1 %vm2818_vm8, %v10809_v22 }
 0x350   : > { %10452 = vmatprep.mubr.msk.bf16.mxu1 %vm12214_vm5, %v13819_v16  ;;  %10196 = vmatpush3.bf16.msra.mxu1 %v10821_v54 }
 0x351   : > { %10197 = vmatprep.subr.bf16.mxu1 %v10823_v0 }
 0x354   : > { %10198 = vmatpush3.bf16.msra.mxu1 %v10825_v47 }
 0x355   : > { %10199 = vmatprep.subr.bf16.mxu1 %v10827_v50 }
 0x357   : > { %10453 = vmatmul.mubr.msk.bf16.gmra.mrb[64].mxu1 %vm2818_vm8, %v10810_v33 }
 0x358   : > { %10200 = vmatpush3.bf16.msra.mxu1 %v10829_v27 }
 0x359   : > { %10201 = vmatprep.subr.bf16.mxu1 %v10831_v59 }
 0x35c   : > { %10202 = vmatpush3.bf16.msra.mxu1 %v10833_v2 }
 0x35d   : > { %10203 = vmatprep.subr.bf16.mxu1 %v10835_v12 }
 0x360   : > { %10204 = vmatpush3.bf16.msra.mxu1 %v10837_v20 }
 0x361   : > { %10205 = vmatprep.subr.bf16.mxu1 %v10839_v21 }
 0x364   : > { %10206 = vmatpush3.bf16.msra.mxu1 %v10841_v43 }
 0x365   : > { %10259 = vmatprep.subr.bf16.mxu1 %v10843_v40 }
 0x41a   : > { %v2866_v32 = vpop.f32.mrb[56].mxu1 }
 0x41b   : > { %v10446_v29 = vpop.f32.mrb[57].mxu1  ;;  %v13283_v11 = vrot.slane %v2866_v32, 4  ;;  %v2957_v15 = vrot.slane %v2866_v32, 3  ;;  %v2998_v31 = vrot.slane %v2866_v32, 2  ;;  %v2988_v17 = vrot.slane %v2866_v32, 1 }
 0x41c   : > { %v13285_v8 = vpop.f32.mrb[58].mxu1 }
 0x41d   : > { %v13288_v38 = vrot.slane %v13285_v8, 4  ;;  %v2958_v36 = vrot.slane %v13285_v8, 3  ;;  %v13824_v63 = vrot.slane %v13285_v8, 1  ;;  %v2999_v51 = vrot.slane %v13285_v8, 2  ;;  %v10447_v28 = vpop.f32.mrb[59].mxu1 }
 0x41e   : > { %v3014_v37 = vpack.c.bf16 %v13285_v8, %v2866_v32 }
 0x41f   : > { %v13297_v46 = vsel %vm751_vm0, %v13288_v38, %v13283_v11  ;;  %v2959_v14 = vsel %vm2741_vm6, %v2957_v15, %v2958_v36  ;;  %v3000_v56 = vsel %vm830_vm2, %v2998_v31, %v2999_v51  ;;  %v2975_v53 = vsel %vm2972_vm9, %v13283_v11, %v13288_v38 }
 0x420   : > { %v3012_v42 = vpack.c.bf16 %v2959_v14, %v2957_v15  ;;  %v3290_v61 = vshrl.u32 %v3014_v37, 16  ;;  %v3293_v25 = vshll.u32 %v3014_v37, 16  ;;  %v13305_v24 = vrot.slane %v13297_v46, 2 }
 0x421   : > { %v13308_v62 = vrot.slane %v13297_v46, 1  ;;  %v2939_v55 = vrot.slane %v13297_v46, 6  ;;  %v13312_v1 = vpack.c.bf16 %v2975_v53, %v13283_v11  ;;  %v13317_v5 = vsel %vm791_vm1, %v2988_v17, %v13824_v63 }
 0x422   : > { %v13319_v58 = vrot.slane %v3290_v61, 2  ;;  %v13321_v3 = vrot.slane %v3293_v25, 3  ;;  %v13323_v13 = vpop.f32.mrb[60].mxu1  ;;  %v3256_v49 = vshrl.u32 %v3012_v42, 16  ;;  %v3259_v39 = vshll.u32 %v3012_v42, 16 }
 0x423   : > { %v13326_v45 = vrot.slane %v13323_v13, 4  ;;  %v2960_v22 = vrot.slane %v13323_v13, 3  ;;  %v2991_v33 = vrot.slane %v13323_v13, 1  ;;  %v13821_v41 = vrot.slane %v13323_v13, 2  ;;  %v10450_v6 = vpop.f32.mrb[61].mxu1 }
 0x424   : > { %v13331_v35 = vpop.f32.mrb[62].mxu1  ;;  %v3273_v7 = vshrl.u32 %v13312_v1, 16  ;;  %v3276_v30 = vshll.u32 %v13312_v1, 16  ;;  %v13335_v10 = vrot.slane %v3256_v49, 2  ;;  %v13337_v54 = vrot.slane %v3259_v39, 3 }
 0x425   : > { %v13342_v18 = vsel %vm751_vm0, %v13326_v45, %v13288_v38  ;;  %v13345_v0 = vsel %vm2741_vm6, %v2958_v36, %v2960_v22  ;;  %v3002_v9 = vsel %vm830_vm2, %v2999_v51, %v13821_v41  ;;  %v13351_v47 = vrot.slane %v13331_v35, 4  ;;  %v10451_v23 = vpop.f32.mrb[63].mxu1 }
 0x426   : > { %v13353_v50 = vpack.c.bf16 %v3002_v9, %v3000_v56  ;;  %v13823_v44 = vrot.slane %v13331_v35, 1  ;;  %v13822_v27 = vrot.slane %v13331_v35, 2  ;;  %v13359_v60 = vpack.c.bf16 %v13331_v35, %v13323_v13 }
 0x427   : > { %v13364_v59 = vsel %vm751_vm0, %v13351_v47, %v13326_v45  ;;  %v2962_v19 = vrot.slane %v13331_v35, 3  ;;  %v2909_v2 = vrot.slane %v13342_v18, 1  ;;  %v2941_v48 = vrot.slane %v13342_v18, 6 }
 0x428   : > { %v2911_v12 = vrot.slane %v13364_v59, 1  ;;  %v2943_v4 = vrot.slane %v13364_v59, 6  ;;  %v3017_v20 = vpack.c.bf16 %v13342_v18, %v13297_v46  ;;  %v2926_v26 = vrot.slane %v13342_v18, 2 }
 0x429   : > { %v13375_v21 = vsel %vm2741_vm6, %v2960_v22, %v2962_v19  ;;  %v2910_v34 = vsel %vm791_vm1, %v13308_v62, %v2909_v2  ;;  %v2942_v43 = vsel %vm2828_vm7, %v2939_v55, %v2941_v48  ;;  %v2928_v57 = vrot.slane %v13364_v59, 2 }
 0x42a   : > { %v2882_v40 = vpop.f32.mrb[64].mxu1  ;;  %v2912_v52 = vsel %vm791_vm1, %v2909_v2, %v2911_v12  ;;  %v2944_v32 = vsel %vm2828_vm7, %v2941_v48, %v2943_v4  ;;  %v3196_v29 = vshrl.u32 %v3017_v20, 16  ;;  %v3199_v15 = vshll.u32 %v3017_v20, 16 }
 0x42b   : > { %v13391_v31 = vsel %vm751_vm0, %v13283_v11, %v2882_v40  ;;  %v2964_v36 = vrot.slane %v2882_v40, 3  ;;  %v10454_v51 = vpop.f32.mrb[65].mxu1  ;;  %v3018_v28 = vpack.c.bf16 %v2912_v52, %v2910_v34  ;;  %v3020_v17 = vpack.c.bf16 %v2944_v32, %v2942_v43 }
 0x42c   : > { %v13394_v37 = vrot.slane %v13391_v31, 4  ;;  %v2905_v14 = vrot.slane %v13391_v31, 1  ;;  %v2922_v56 = vrot.slane %v13391_v31, 2  ;;  %v2938_v53 = vrot.slane %v13391_v31, 6  ;;  %v2885_v42 = vpop.f32.mrb[66].mxu1 }
 0x42d   : > { %v2965_v61 = vsel %vm2741_vm6, %v2962_v19, %v2964_v36  ;;  %v3008_v11 = vpack.c.bf16 %v13391_v31, %v13331_v35  ;;  %v10455_v25 = vpop.f32.mrb[67].mxu1  ;;  %v3213_v49 = vshrl.u32 %v3018_v28, 16  ;;  %v3216_v39 = vshll.u32 %v3018_v28, 16 }
 0x42e   : > { %v13405_v22 = vsel %vm751_vm0, %v13394_v37, %v13351_v47  ;;  %v13410_v6 = vsel %vm830_vm2, %v13822_v27, %v2922_v56  ;;  %v13414_v9 = vsel %vm830_vm2, %v2922_v56, %v13305_v24  ;;  %v3030_v23 = vpack.c.bf16 %v2964_v36, %v2965_v61 }
 0x42f   : > { %v13419_v19 = vsel %vm791_vm1, %v13823_v44, %v2905_v14  ;;  %v13423_v2 = vsel %vm791_vm1, %v2905_v14, %v13308_v62  ;;  %v3215_v48 = vrot.slane %v3213_v49, 2  ;;  %v3218_v20 = vrot.slane %v3216_v39, 3 }
 0x430   : > { %v3377_v34 = vshrl.u32 %v3030_v23, 16  ;;  %v3380_v43 = vshll.u32 %v3030_v23, 16  ;;  %v3009_v40 = vpack.c.bf16 %v13423_v2, %v13419_v19  ;;  %v2940_v52 = vsel %vm2828_vm7, %v2938_v53, %v2939_v55 }
 0x431   : > { %v13430_v32 = vor.u32 %v3218_v20, %v3215_v48  ;;  %v3011_v36 = vpack.c.bf16 %v2940_v52, %v2938_v53  ;;  %v3247_v51 = vshrl.u32 %v3020_v17, 16  ;;  %v3250_v28 = vshll.u32 %v3020_v17, 16 }
 0x432   : > { %v13432_v56 = vrot.slane %v3377_v34, 2  ;;  %v13434_v14 = vrot.slane %v3380_v43, 3  ;;  %v3205_v42 = vshrl.u32 %v3009_v40, 16  ;;  %v3208_v61 = vshll.u32 %v3009_v40, 16 }
 0x433   : > { %v3239_v25 = vshrl.u32 %v3011_v36, 16  ;;  %v3242_v49 = vshll.u32 %v3011_v36, 16  ;;  %v3249_v39 = vrot.slane %v3247_v51, 2  ;;  %v3252_v23 = vrot.slane %v3250_v28, 3 }
 0x434   : > { %v3207_v16 = vrot.slane %v3205_v42, 2  ;;  %v3210_v41 = vrot.slane %v3208_v61, 3  ;;  %v3188_v27 = vshrl.u32 %v3008_v11, 16  ;;  %v3191_v44 = vshll.u32 %v3008_v11, 16 }
 0x435   : > { %v3241_v55 = vrot.slane %v3239_v25, 2  ;;  %v3244_v48 = vrot.slane %v3242_v49, 3  ;;  %v13436_v20 = vor.u32 %v3252_v23, %v3249_v39  ;;  %v3198_v53 = vrot.slane %v3196_v29, 2  ;;  %v10845_v29 = vld [vmem:[#allocation7 + $0x100] sm:$0xff]  }
 0x436   : > { %v3211_v17 = vor.u32 %v3210_v41, %v3207_v16  ;;  %v3190_v34 = vrot.slane %v3188_v27, 2  ;;  %v3193_v52 = vrot.slane %v3191_v44, 3  ;;  %v3201_v43 = vrot.slane %v3199_v15, 3 }
 0x437   : > { %v3245_v63 = vor.u32 %v3244_v48, %v3241_v55  ;;  %v2927_v40 = vsel %vm830_vm2, %v13305_v24, %v2926_v26  ;;  %v2929_v11 = vsel %vm830_vm2, %v2926_v26, %v2928_v57  ;;  %v3010_v36 = vpack.c.bf16 %v13414_v9, %v13410_v6  ;;  %v10847_v26 = vld [vmem:[#allocation7 + $0x148] sm:$0xff]  }
 0x438   : > { %v3220_v16 = vsel %vm3186_vm10, %v3211_v17, %v13430_v32  ;;  %v3194_v41 = vor.u32 %v3193_v52, %v3190_v34  ;;  %v13451_v44 = vor.u32 %v3201_v43, %v3198_v53  ;;  %v3019_v27 = vpack.c.bf16 %v2929_v11, %v2927_v40  ;;  %v10849_v52 = vld [vmem:[#allocation7 + $0x108] sm:$0xff]   ;;  %v10851_v11 = vld [vmem:[#allocation7 + $0x150] sm:$0xff]  }
 0x439   : > { %3912 = vmatprep.mubr.bf16.mxu1 %v3220_v16  ;;  %v3254_v15 = vsel %vm3186_vm10, %v3245_v63, %v13436_v20  ;;  %v3222_v51 = vshrl.u32 %v3010_v36, 16  ;;  %v3225_v28 = vshll.u32 %v3010_v36, 16  ;;  %v2913_v18 = vrot.slane %v13405_v22, 1 }
 0x43a   : > { %3968 = vmatprep.mubr.bf16.mxu0 %v3254_v15  ;;  %v3203_v42 = vsel %vm3186_vm10, %v3194_v41, %v13451_v44  ;;  %v3230_v61 = vshrl.u32 %v3019_v27, 16  ;;  %v3233_v25 = vshll.u32 %v3019_v27, 16  ;;  %v2945_v49 = vrot.slane %v13405_v22, 6 }
 0x43b   : > { %3913 = vmatmul.mubr.bf16.vlgmr.msra.gmra.mrb[68].mxu1 %v3203_v42  ;;  %v3224_v39 = vrot.slane %v3222_v51, 2  ;;  %v3227_v23 = vrot.slane %v3225_v28, 3  ;;  %v2914_v63 = vsel %vm791_vm1, %v2911_v12, %v2913_v18  ;;  %v3026_v55 = vpack.c.bf16 %v13405_v22, %v13364_v59  ;;  %v10846_v12 = vld [vmem:[#allocation7 + $0x180] sm:$0xff]  }
 0x43c   : > { %v3232_v48 = vrot.slane %v3230_v61, 2  ;;  %v3235_v53 = vrot.slane %v3233_v25, 3  ;;  %10260 = vmatpush3.bf16.msra.mxu1 %v10845_v29  ;;  %v3027_v17 = vpack.c.bf16 %v2913_v18, %v2914_v63  ;;  %v2946_v34 = vsel %vm2828_vm7, %v2943_v4, %v2945_v49  ;;  %v10848_v18 = vld [vmem:[#allocation7 + $0x1c8] sm:$0xff]  }
 0x43d   : > { %v3228_v43 = vor.u32 %v3227_v23, %v3224_v39  ;;  %v3029_v40 = vpack.c.bf16 %v2945_v49, %v2946_v34  ;;  %10261 = vmatprep.subr.bf16.mxu1 %v10847_v26  ;;  %v3341_v36 = vshrl.u32 %v3026_v55, 16  ;;  %v3344_v16 = vshll.u32 %v3026_v55, 16  ;;  %v10853_v39 = vld [vmem:[#allocation7 + $0x110] sm:$0xff]  }
 0x43e   : > { %v13467_v41 = vor.u32 %v3235_v53, %v3232_v48  ;;  %v3350_v27 = vshrl.u32 %v3027_v17, 16  ;;  %v3353_v15 = vshll.u32 %v3027_v17, 16  ;;  %v2930_v51 = vrot.slane %v13405_v22, 2  ;;  %v10855_v48 = vld [vmem:[#allocation7 + $0x158] sm:$0xff]   ;;  %v10850_v17 = vld [vmem:[#allocation7 + $0x188] sm:$0xff]  }
 0x43f   : > { %v3368_v29 = vshrl.u32 %v3029_v40, 16  ;;  %v3371_v28 = vshll.u32 %v3029_v40, 16  ;;  %v3343_v42 = vrot.slane %v3341_v36, 2  ;;  %v3346_v61 = vrot.slane %v3344_v16, 3  ;;  %v10857_v16 = vld [vmem:[#allocation7 + $0x118] sm:$0xff]  }
 0x440   : > { %v3237_v4 = vsel %vm3186_vm10, %v3228_v43, %v13467_v41  ;;  %v3352_v25 = vrot.slane %v3350_v27, 2  ;;  %v3355_v26 = vrot.slane %v3353_v15, 3  ;;  %10262 = vmatpush3.bf16.msra.mxu1 %v10849_v52  ;;  %v2931_v49 = vsel %vm830_vm2, %v2928_v57, %v2930_v51  ;;  %v10852_v43 = vld [vmem:[#allocation7 + $0x1d0] sm:$0xff]  }
 0x441   : > { %3969 = vmatmul.mubr.bf16.vlgmr.msra.gmra.mrb[84].mxu0 %v3237_v4  ;;  %v3370_v23 = vrot.slane %v3368_v29, 2  ;;  %v3373_v63 = vrot.slane %v3371_v28, 3  ;;  %10263 = vmatprep.subr.bf16.mxu1 %v10851_v11  ;;  %v13475_v22 = vor.u32 %v3346_v61, %v3343_v42  ;;  %v3028_v55 = vpack.c.bf16 %v2930_v51, %v2931_v49  ;;  %v10854_v42 = vld [vmem:[#allocation7 + $0x190] sm:$0xff]  }
 0x442   : > { %10294 = vmatpush3.bf16.msra.mxu0 %v10846_v12  ;;  %v3356_v53 = vor.u32 %v3355_v26, %v3352_v25  ;;  %v2977_v34 = vsel %vm2972_vm9, %v13288_v38, %v13326_v45  ;;  %v2979_v59 = vsel %vm2972_vm9, %v13326_v45, %v13351_v47  ;;  %v13485_v57 = vrot.slane %v3273_v7, 2  ;;  %v10856_v25 = vld [vmem:[#allocation7 + $0x1d8] sm:$0xff]   ;;  %v10861_v26 = vld [vmem:[#allocation7 + $0x120] sm:$0xff]  }
 0x443   : > { %v3374_v52 = vor.u32 %v3373_v63, %v3370_v23  ;;  %10295 = vmatprep.subr.bf16.mxu0 %v10848_v18  ;;  %v3348_v40 = vsel %vm3186_vm10, %v13451_v44, %v13475_v22  ;;  %v3359_v11 = vshrl.u32 %v3028_v55, 16  ;;  %v3362_v36 = vshll.u32 %v3028_v55, 16 }
 0x444   : > { %v3357_v38 = vsel %vm3186_vm10, %v13430_v32, %v3356_v53  ;;  %10264 = vmatpush3.bf16.msra.mxu1 %v10853_v39  ;;  %v3022_v12 = vpack.c.bf16 %v2979_v59, %v2977_v34  ;;  %v3278_v45 = vrot.slane %v3276_v30, 3  ;;  %v13877_v7 = vrot.slane %v13285_v8, 1  ;;  %v10859_v32 = vld [vmem:[#allocation7 + $0x160] sm:$0xff]   ;;  %v10858_v59 = vld [vmem:[#allocation7 + $0x198] sm:$0xff]  }
 0x445   : > { %3920 = vmatprep.mubr.bf16.mxu1 %v3357_v38  ;;  %v3375_v44 = vsel %vm3186_vm10, %v13436_v20, %v3374_v52  ;;  %v3361_v15 = vrot.slane %v3359_v11, 2  ;;  %v3364_v51 = vrot.slane %v3362_v36, 3  ;;  %10265 = vmatprep.subr.bf16.mxu1 %v10855_v48  ;;  %v13878_v29 = vrot.slane %v13331_v35, 1  ;;  %v10863_v48 = vld [vmem:[#allocation7 + $0x168] sm:$0xff]   ;;  %v10860_v11 = vld [vmem:[#allocation7 + $0x1e0] sm:$0xff]  }
 0x446   : > { %v2992_v27 = vsel %vm791_vm1, %v13877_v7, %v2991_v33  ;;  %3976 = vmatprep.mubr.bf16.mxu0 %v3375_v44  ;;  %10296 = vmatpush3.bf16.msra.mxu0 %v10850_v17  ;;  %v3279_v8 = vor.u32 %v3278_v45, %v13485_v57  ;;  %v3281_v30 = vshrl.u32 %v3022_v12, 16  ;;  %v3284_v28 = vshll.u32 %v3022_v12, 16  ;;  %v10865_v12 = vld [vmem:[#allocation7 + $0x128] sm:$0xff]  }
 0x447   : > { %v2993_v1 = vsel %vm791_vm1, %v2991_v33, %v13878_v29  ;;  %v3015_v18 = vpack.c.bf16 %v2992_v27, %v13317_v5  ;;  %10297 = vmatprep.subr.bf16.mxu0 %v10852_v43  ;;  %3921 = vmatmul.mubr.bf16.gmra.mrb[72].mxu1 %v3348_v40  ;;  %v13508_v20 = vor.u32 %v3364_v51, %v3361_v15  ;;  %v3298_v33 = vshrl.u32 %v13359_v60, 16 }
 0x448   : > { %v3024_v61 = vpack.c.bf16 %v13419_v19, %v2993_v1  ;;  %v3021_v4 = vpack.c.bf16 %v13375_v21, %v13345_v0  ;;  %3928 = vmatprep.mubr.bf16.mxu1 %v3356_v53  ;;  %10266 = vmatpush3.bf16.msra.mxu1 %v10857_v16  ;;  %v3283_v49 = vrot.slane %v3281_v30, 2  ;;  %v3286_v39 = vrot.slane %v3284_v28, 3 }
 0x449   : > { %v3307_v23 = vshrl.u32 %v3015_v18, 16  ;;  %v3310_v5 = vshll.u32 %v3015_v18, 16  ;;  %v3366_v63 = vsel %vm3186_vm10, %v13467_v41, %v13508_v20  ;;  %10267 = vmatprep.subr.bf16.mxu1 %v10859_v32  ;;  %v3262_v0 = vor.u32 %v13337_v54, %v13335_v10 }
 0x44a   : > { %v3315_v55 = vshrl.u32 %v3024_v61, 16  ;;  %v3318_v19 = vshll.u32 %v3024_v61, 16  ;;  %3977 = vmatmul.mubr.bf16.gmra.mrb[88].mxu0 %v3366_v63  ;;  %v13519_v21 = vor.u32 %v3286_v39, %v3283_v49  ;;  %v3264_v34 = vshrl.u32 %v3021_v4, 16  ;;  %v10868_v39 = vld [vmem:[#allocation7 + $0x1f0] sm:$0xff]  }
 0x44b   : > { %v3309_v53 = vrot.slane %v3307_v23, 2  ;;  %v3312_v17 = vrot.slane %v3310_v5, 3  ;;  %10298 = vmatpush3.bf16.msra.mxu0 %v10854_v42  ;;  %3984 = vmatprep.mubr.bf16.mxu0 %v3374_v52  ;;  %v3267_v40 = vshll.u32 %v3021_v4, 16  ;;  %v3296_v41 = vor.u32 %v13321_v3, %v13319_v58  ;;  %v10867_v58 = vld [vmem:[#allocation7 + $0x170] sm:$0xff]   ;;  %v10866_v4 = vld [vmem:[#allocation7 + $0x1a8] sm:$0xff]  }
 0x44c   : > { %v3317_v57 = vrot.slane %v3315_v55, 2  ;;  %v3320_v43 = vrot.slane %v3318_v19, 3  ;;  %10299 = vmatprep.subr.bf16.mxu0 %v10856_v25  ;;  %10268 = vmatpush3.bf16.msra.mxu1 %v10861_v26  ;;  %v3288_v10 = vsel %vm3186_vm10, %v3279_v8, %v13519_v21  ;;  %v3266_v36 = vrot.slane %v3264_v34, 2  ;;  %v10873_v55 = vld [vmem:[#allocation7 + $0x138] sm:$0xff]  }
 0x44d   : > { %v3313_v54 = vor.u32 %v3312_v17, %v3309_v53  ;;  %v3300_v38 = vrot.slane %v3298_v33, 2  ;;  %10269 = vmatprep.subr.bf16.mxu1 %v10863_v48  ;;  %v3269_v52 = vrot.slane %v3267_v40, 3  ;;  %v3301_v45 = vshll.u32 %v13359_v60, 16  ;;  %v10862_v60 = vld [vmem:[#allocation7 + $0x1a0] sm:$0xff]  }
 0x44e   : > { %v3321_v16 = vor.u32 %v3320_v43, %v3317_v57  ;;  %v2981_v7 = vsel %vm2972_vm9, %v13351_v47, %v13394_v37  ;;  %v3033_v27 = vpack.c.bf16 %v13308_v62, %v13423_v2  ;;  %v13534_v44 = vor.u32 %v13434_v14, %v13432_v56  ;;  %v10864_v2 = vld [vmem:[#allocation7 + $0x1e8] sm:$0xff]   ;;  %v10870_v57 = vld [vmem:[#allocation7 + $0x1b0] sm:$0xff]  }
 0x44f   : > { %v3031_v3 = vpack.c.bf16 %v13394_v37, %v2981_v7  ;;  %v3032_v15 = vpack.c.bf16 %v13297_v46, %v13391_v31  ;;  %10300 = vmatpush3.bf16.msra.mxu0 %v10858_v59  ;;  %3929 = vmatmul.mubr.bf16.gmra.mrb[76].mxu1 %v13475_v22  ;;  %v3270_v47 = vor.u32 %v3269_v52, %v3266_v36  ;;  %v3303_v32 = vrot.slane %v3301_v45, 3  ;;  %v10869_v22 = vld [vmem:[#allocation7 + $0x130] sm:$0xff]   ;;  %v10876_v7 = vld [vmem:[#allocation7 + $0x208] sm:$0xff]  }
 0x450   : > { %v3322_v51 = vsel %vm3186_vm10, %v3313_v54, %v3321_v16  ;;  %v13879_v37 = vrot.slane %v13331_v35, 2  ;;  %v13880_v29 = vrot.slane %v13323_v13, 2  ;;  %10301 = vmatprep.subr.bf16.mxu0 %v10860_v11  ;;  %4024 = vmatprep.mubr.bf16.mxu1 %v3288_v10  ;;  %v3404_v46 = vshrl.u32 %v3033_v27, 16  ;;  %v10871_v13 = vld [vmem:[#allocation7 + $0x178] sm:$0xff]   ;;  %v10875_v54 = vld [vmem:[#allocation7 + $0x200] sm:$0xff]  }
 0x451   : > { %v3386_v56 = vshrl.u32 %v3031_v3, 16  ;;  %v3389_v14 = vshll.u32 %v3031_v3, 16  ;;  %v3407_v31 = vshll.u32 %v3033_v27, 16  ;;  %10270 = vmatpush3.bf16.msra.mxu1 %v10865_v12  ;;  %v3271_v1 = vsel %vm3186_vm10, %v3262_v0, %v3270_v47  ;;  %v10872_v11 = vld [vmem:[#allocation7 + $0x1f8] sm:$0xff]   ;;  %v10877_v3 = vld [vmem:[#allocation7 + $0x210] sm:$0xff]  }
 0x452   : > { %v3003_v62 = vsel %vm830_vm2, %v13880_v29, %v13879_v37  ;;  %v3304_v8 = vor.u32 %v3303_v32, %v3300_v38  ;;  %v13548_v30 = vsel %vm3186_vm10, %v3270_v47, %v13534_v44  ;;  %v3395_v35 = vshrl.u32 %v3032_v15, 16  ;;  %3985 = vmatmul.mubr.bf16.gmra.mrb[92].mxu0 %v13508_v20  ;;  %10271 = vmatprep.subr.bf16.mxu1 %v10867_v58  ;;  %v10874_v12 = vld [vmem:[#allocation7 + $0x1b8] sm:$0xff]  }
 0x453   : > { %v3388_v28 = vrot.slane %v3386_v56, 2  ;;  %v3391_v18 = vrot.slane %v3389_v14, 3  ;;  %v3406_v42 = vrot.slane %v3404_v46, 2  ;;  %v3409_v61 = vrot.slane %v3407_v31, 3  ;;  %10302 = vmatpush3.bf16.msra.mxu0 %v10862_v60  ;;  %4080 = vmatprep.mubr.bf16.mxu0 %v3322_v51  ;;  %v10878_v27 = vld [vmem:[#allocation7 + $0x218] sm:$0xff]   ;;  %v10880_v60 = vld [vmem:[#allocation7 + $0x228] sm:$0xff]  }
 0x454   : > { %v3305_v33 = vsel %vm3186_vm10, %v3296_v41, %v3304_v8  ;;  %v3397_v25 = vrot.slane %v3395_v35, 2  ;;  %v3398_v26 = vshll.u32 %v3032_v15, 16  ;;  %v3025_v49 = vpack.c.bf16 %v13410_v6, %v3003_v62  ;;  %10303 = vmatprep.subr.bf16.mxu0 %v10864_v2  ;;  %v10879_v15 = vld [vmem:[#allocation7 + $0x220] sm:$0xff]   ;;  %v10881_v51 = vld [vmem:[#allocation7 + $0x230] sm:$0xff]   ;;  %v10882_v47 = vld [vmem:[#allocation7 + $0x238] sm:$0xff]  }
 0x455   : > { %v3392_v23 = vor.u32 %v3391_v18, %v3388_v28  ;;  %v3410_v5 = vor.u32 %v3409_v61, %v3406_v42  ;;  %v3324_v20 = vshrl.u32 %v13353_v50, 16  ;;  %v3327_v63 = vshll.u32 %v13353_v50, 16  ;;  %10272 = vmatpush3.bf16.msra.mxu1 %v10869_v22  ;;  %v10886_v32 = vld [vmem:[#allocation12 + $0x4] ss:$16 sps:$4 sm:$0xff]   ;;  %v10890_v29 = vld [vmem:[#allocation12 + $0x20] ss:$16 sps:$4 sm:$0xff]  }
 0x456   : > { %v3400_v19 = vrot.slane %v3398_v26, 3  ;;  %v3332_v48 = vshrl.u32 %v3025_v49, 16  ;;  %v3335_v0 = vshll.u32 %v3025_v49, 16  ;;  %v3034_v53 = vpack.c.bf16 %v13305_v24, %v13414_v9  ;;  %10273 = vmatprep.subr.bf16.mxu1 %v10871_v13  ;;  %v10892_v37 = vld [vmem:[#allocation12 + $0x24] ss:$16 sps:$4 sm:$0xff]  }
 0x457   : > { %v3393_v6 = vsel %vm3186_vm10, %v13519_v21, %v3392_v23  ;;  %v3411_v17 = vsel %vm3186_vm10, %v3321_v16, %v3410_v5  ;;  %v3326_v34 = vrot.slane %v3324_v20, 2  ;;  %v3329_v59 = vrot.slane %v3327_v63, 3  ;;  %10304 = vmatpush3.bf16.msra.mxu0 %v10866_v4  ;;  %v10898_v62 = vld [vmem:[#allocation12 + $0x44] ss:$16 sps:$4 sm:$0xff]   ;;  %v10896_v2 = vld [vmem:[#allocation12 + $0x40] ss:$16 sps:$4 sm:$0xff]  }
 0x458   : > { %v3401_v43 = vor.u32 %v3400_v19, %v3397_v25  ;;  %v3334_v50 = vrot.slane %v3332_v48, 2  ;;  %v3337_v40 = vrot.slane %v3335_v0, 3  ;;  %v3413_v41 = vshrl.u32 %v3034_v53, 16  ;;  %10305 = vmatprep.subr.bf16.mxu0 %v10868_v39  ;;  %v10904_v56 = vld [vmem:[#allocation12 + $0x64] ss:$16 sps:$4 sm:$0xff]  }
 0x459   : > { %v3416_v10 = vshll.u32 %v3034_v53, 16  ;;  %10274 = vmatpush3.bf16.msra.mxu1 %v10873_v55  ;;  %v3330_v9 = vor.u32 %v3329_v59, %v3326_v34  ;;  %v13881_v38 = vmov 0.0   ;;  %v10902_v14 = vld [vmem:[#allocation12 + $0x60] ss:$16 sps:$4 sm:$0xff]   ;;  %v10910_v46 = vld [vmem:[#allocation12 + $0x84] ss:$16 sps:$4 sm:$0xff]  }
 0x45a   : > { %v3402_v24 = vsel %vm3186_vm10, %v3304_v8, %v3401_v43  ;;  %v3338_v36 = vor.u32 %v3337_v40, %v3334_v50  ;;  %v3415_v21 = vrot.slane %v3413_v41, 2  ;;  %10456 = vmatprep.subr.bf16.mxu1 %v13881_v38  ;;  %v10908_v31 = vld [vmem:[#allocation12 + $0x80] ss:$16 sps:$4 sm:$0xff]   ;;  %v10916_v22 = vld [vmem:[#allocation12 + $0xa4] ss:$16 sps:$4 sm:$0xff]  }
 0x45b   : > { %v3418_v16 = vrot.slane %v3416_v10, 3  ;;  %10306 = vmatpush3.bf16.msra.mxu0 %v10870_v57  ;;  %v10922_v8 = vld [vmem:[#allocation12 + $0xc4] ss:$16 sps:$4 sm:$0xff]   ;;  %v10920_v35 = vld [vmem:[#allocation12 + $0xc0] ss:$16 sps:$4 sm:$0xff]  }
 0x45c   : > { %v3339_v52 = vsel %vm3186_vm10, %v3330_v9, %v3338_v36  ;;  %10307 = vmatprep.subr.bf16.mxu0 %v10872_v11  ;;  %4025 = vmatmul.mubr.bf16.vlgmr.msra.gmra.mrb[80].mxu1 %v3271_v1  ;;  %v10914_v1 = vld [vmem:[#allocation12 + $0xa0] ss:$16 sps:$4 sm:$0xff]   ;;  %v10928_v42 = vld [vmem:[#allocation12 + $0xe4] ss:$16 sps:$4 sm:$0xff]  }
 0x45d   : > { %v3419_v45 = vor.u32 %v3418_v16, %v3415_v21  ;;  %4032 = vmatprep.mubr.bf16.mxu1 %v3393_v6  ;;  %10457 = vmatpush3.bf16.msra.mxu1 %v10875_v54  ;;  %v9278_v61 = vld [vmem:[#allocation9] ss:$0 sm:$0xff]  ;;  %v10926_v25 = vld [vmem:[#allocation12 + $0xe0] ss:$16 sps:$4 sm:$0xff]  }
 0x45e   : > { %10458 = vmatprep.subr.bf16.mxu1 %v13881_v38  ;;  %v10934_v39 = vld [vmem:[#allocation12 + $0x104] ss:$16 sps:$4 sm:$0xff]   ;;  %v10932_v55 = vld [vmem:[#allocation12 + $0x100] ss:$16 sps:$4 sm:$0xff]  }
 0x45f   : > { %v3420_v58 = vsel %vm3186_vm10, %v3338_v36, %v3419_v45  ;;  %10308 = vmatpush3.bf16.msra.mxu0 %v10874_v12  ;;  %v10940_v53 = vld [vmem:[#allocation12 + $0x124] ss:$16 sps:$4 sm:$0xff]   ;;  %v10938_v34 = vld [vmem:[#allocation12 + $0x120] ss:$16 sps:$4 sm:$0xff]  }
 0x460   : > { %10484 = vmatprep.subr.bf16.mxu0 %v13881_v38  ;;  %v10946_v50 = vld [vmem:[#allocation12 + $0x144] ss:$16 sps:$4 sm:$0xff]  }
 0x461   : > { %10459 = vmatpush3.bf16.msra.mxu1 %v10876_v7  ;;  %v10952_v12 = vld [vmem:[#allocation12 + $0x164] ss:$16 sps:$4 sm:$0xff]  }
 0x462   : > { %4081 = vmatmul.mubr.bf16.vlgmr.msra.gmra.mrb[96].mxu0 %v3305_v33  ;;  %10460 = vmatprep.subr.bf16.mxu1 %v13881_v38 }
 0x463   : > { %4088 = vmatprep.mubr.bf16.mxu0 %v3411_v17 }
 0x464   : > { %4033 = vmatmul.mubr.bf16.gmra.mrb[84].mxu1 %v13548_v30 }
 0x465   : > { %4040 = vmatprep.mubr.bf16.mxu1 %v3392_v23  ;;  %10461 = vmatpush3.bf16.msra.mxu1 %v10877_v3 }
 0x466   : > { %10462 = vmatprep.subr.bf16.mxu1 %v13881_v38 }
 0x469   : > { %10463 = vmatpush3.bf16.msra.mxu1 %v10878_v27 }
 0x46a   : > { %4089 = vmatmul.mubr.bf16.gmra.mrb[100].mxu0 %v3402_v24  ;;  %10464 = vmatprep.subr.bf16.mxu1 %v13881_v38  ;;  %v10944_v24 = vld [vmem:[#allocation12 + $0x140] ss:$16 sps:$4 sm:$0xff]  }
 0x46b   : > { %4096 = vmatprep.mubr.bf16.mxu0 %v3410_v5 }
 0x46c   : > { %4041 = vmatmul.mubr.bf16.gmra.mrb[88].mxu1 %v13534_v44  ;;  %v10884_v44 = vld [vmem:[#allocation12] ss:$16 sps:$4 sm:$0xff]  }
 0x46d   : > { %10465 = vmatpush3.bf16.msra.mxu1 %v10879_v15  ;;  %10472 = vmatprep.mubr.msk.bf16.mxu1 %vm12214_vm5, %v13881_v38 }
 0x46e   : > { %10466 = vmatprep.subr.bf16.mxu1 %v13881_v38 }
 0x471   : > { %10467 = vmatpush3.bf16.msra.mxu1 %v10880_v60 }
 0x472   : > { %4097 = vmatmul.mubr.bf16.gmra.mrb[104].mxu0 %v3401_v43  ;;  %10468 = vmatprep.subr.bf16.mxu1 %v13881_v38 }
 0x473   : > { %10490 = vmatprep.mubr.msk.bf16.mxu0 %vm12214_vm5, %v13881_v38 }
 0x475   : > { %10469 = vmatpush3.bf16.msra.mxu1 %v10881_v51  ;;  %v10958_v51 = vld [vmem:[#allocation12 + $0x184] ss:$16 sps:$4 sm:$0xff]  }
 0x476   : > { %10470 = vmatprep.subr.bf16.mxu1 %v13881_v38 }
 0x479   : > { %10471 = vmatpush3.bf16.msra.mxu1 %v10882_v47 }
 0x47a   : > { %6080 = vmatprep.subr.bf16.mxu1 %v10886_v32 }
 0x47c   : > { %10473 = vmatmul.mubr.bf16.vlgmr.msra.gmra.mrb[92].mxu1 %v3339_v52 }
 0x47d   : > { %10476 = vmatprep.mubr.msk.bf16.mxu1 %vm12214_vm5, %v13881_v38  ;;  %6081 = vmatpush1.bf16.msra.mxu1 %v10884_v44 }
 0x47e   : > { %6082 = vmatprep.subr.bf16.mxu1 %v10892_v37 }
 0x481   : > { %6083 = vmatpush1.bf16.msra.mxu1 %v10890_v29  ;;  %v10956_v29 = vld [vmem:[#allocation12 + $0x180] ss:$16 sps:$4 sm:$0xff]  }
 0x482   : > { %6084 = vmatprep.subr.bf16.mxu1 %v10898_v62 }
 0x484   : > { %10477 = vmatmul.mubr.bf16.gmra.mrb[96].mxu1 %v3420_v58  ;;  %v10950_v58 = vld [vmem:[#allocation12 + $0x160] ss:$16 sps:$4 sm:$0xff]  }
 0x485   : > { %10480 = vmatprep.mubr.msk.bf16.mxu1 %vm12214_vm5, %v13881_v38  ;;  %6085 = vmatpush1.bf16.msra.mxu1 %v10896_v2 }
 0x486   : > { %6086 = vmatprep.subr.bf16.mxu1 %v10904_v56 }
 0x489   : > { %6087 = vmatpush1.bf16.msra.mxu1 %v10902_v14  ;;  %v10964_v14 = vld [vmem:[#allocation12 + $0x1a4] ss:$16 sps:$4 sm:$0xff]  }
 0x48a   : > { %6088 = vmatprep.subr.bf16.mxu1 %v10910_v46 }
 0x48c   : > { %10481 = vmatmul.mubr.bf16.gmra.mrb[100].mxu1 %v3419_v45 }
 0x48d   : > { %6089 = vmatpush1.bf16.msra.mxu1 %v10908_v31  ;;  %v10962_v31 = vld [vmem:[#allocation12 + $0x1a0] ss:$16 sps:$4 sm:$0xff]  }
 0x48e   : > { %6090 = vmatprep.subr.bf16.mxu1 %v10916_v22 }
 0x491   : > { %6091 = vmatpush1.bf16.msra.mxu1 %v10914_v1 }
 0x492   : > { %6092 = vmatprep.subr.bf16.mxu1 %v10922_v8 }
 0x495   : > { %6093 = vmatpush1.bf16.msra.mxu1 %v10920_v35 }
 0x496   : > { %6094 = vmatprep.subr.bf16.mxu1 %v10928_v42 }
 0x499   : > { %6095 = vmatpush1.bf16.msra.mxu1 %v10926_v25 }
 0x49a   : > { %6096 = vmatprep.subr.bf16.mxu1 %v10934_v39 }
 0x49d   : > { %6097 = vmatpush1.bf16.msra.mxu1 %v10932_v55 }
 0x49e   : > { %6098 = vmatprep.subr.bf16.mxu1 %v10940_v53 }
 0x4a1   : > { %6099 = vmatpush1.bf16.msra.mxu1 %v10938_v34 }
 0x4a2   : > { %6100 = vmatprep.subr.bf16.mxu1 %v10946_v50 }
 0x4a5   : > { %6101 = vmatpush1.bf16.msra.mxu1 %v10944_v24 }
 0x4a6   : > { %6102 = vmatprep.subr.bf16.mxu1 %v10952_v12 }
 0x4a9   : > { %6103 = vmatpush1.bf16.msra.mxu1 %v10950_v58 }
 0x4aa   : > { %6104 = vmatprep.subr.bf16.mxu1 %v10958_v51 }
 0x4ad   : > { %6105 = vmatpush1.bf16.msra.mxu1 %v10956_v29 }
 0x4ae   : > { %6106 = vmatprep.subr.bf16.mxu1 %v10964_v14 }
 0x4b1   : > { %6107 = vmatpush1.bf16.msra.mxu1 %v10962_v31 }
 0x50e   : > { %v10207_v30 = vpop.f32.mrb[68].mxu1 }
 0x50f   : > { %v10208_v13 = vpop.f32.mrb[69].mxu1 }
 0x510   : > { %v10209_v28 = vadd.f32 %v10208_v13, %v10207_v30  ;;  %v10210_v18 = vpop.f32.mrb[70].mxu1 }
 0x511   : > { %v10211_v4 = vpop.f32.mrb[71].mxu1 }
 0x512   : > { %v10212_v33 = vadd.f32 %v10211_v4, %v10210_v18  ;;  %v3915_v49 = vadd.f32 %v10209_v28, %v9278_v61 }
 0x514   : > { %v10241_v26 = vpop.f32.mrb[84].mxu0  ;;  %v3918_v63 = vadd.f32 %v10212_v33, %v9278_v61 }
 0x515   : > { %v10242_v23 = vpop.f32.mrb[85].mxu0 }
 0x516   : > { %v10243_v5 = vadd.f32 %v10242_v23, %v10241_v26  ;;  %v10244_v20 = vpop.f32.mrb[86].mxu0 }
 0x517   : > { %v10245_v19 = vpop.f32.mrb[87].mxu0 }
 0x518   : > { %v3971_v48 = vadd.f32 %v10243_v5, %v3915_v49  ;;  %v10246_v0 = vadd.f32 %v10245_v19, %v10244_v20 }
 0x51a   : > { %v3974_v6 = vadd.f32 %v10246_v0, %v3918_v63  ;;  %v10213_v17 = vpop.f32.mrb[72].mxu1 }
 0x51b   : > { %v10214_v59 = vpop.f32.mrb[73].mxu1 }
 0x51c   : > { %v10215_v57 = vadd.f32 %v10214_v59, %v10213_v17  ;;  %v10216_v43 = vpop.f32.mrb[74].mxu1 }
 0x51d   : > { %v10247_v40 = vpop.f32.mrb[88].mxu0  ;;  %v10217_v41 = vpop.f32.mrb[75].mxu1 }
 0x51e   : > { %v3923_v11 = vadd.f32 %v10215_v57, %v9278_v61  ;;  %v10248_v10 = vpop.f32.mrb[89].mxu0  ;;  %v10218_v54 = vadd.f32 %v10217_v41, %v10216_v43 }
 0x51f   : > { %v10249_v9 = vadd.f32 %v10248_v10, %v10247_v40  ;;  %v10250_v36 = vpop.f32.mrb[90].mxu0 }
 0x520   : > { %v3926_v21 = vadd.f32 %v10218_v54, %v9278_v61  ;;  %v10251_v16 = vpop.f32.mrb[91].mxu0 }
 0x521   : > { %v3979_v52 = vadd.f32 %v10249_v9, %v3923_v11  ;;  %v10252_v45 = vadd.f32 %v10251_v16, %v10250_v36 }
 0x522   : > { %v10219_v7 = vpop.f32.mrb[76].mxu1 }
 0x523   : > { %v3982_v3 = vadd.f32 %v10252_v45, %v3926_v21  ;;  %v10220_v27 = vpop.f32.mrb[77].mxu1 }
 0x524   : > { %v10221_v15 = vadd.f32 %v10220_v27, %v10219_v7  ;;  %v10222_v60 = vpop.f32.mrb[78].mxu1 }
 0x525   : > { %v10253_v47 = vpop.f32.mrb[92].mxu0  ;;  %v10223_v44 = vpop.f32.mrb[79].mxu1 }
 0x526   : > { %v3931_v32 = vadd.f32 %v10221_v15, %v9278_v61  ;;  %v10254_v37 = vpop.f32.mrb[93].mxu0 }
 0x527   : > { %v10255_v62 = vadd.f32 %v10254_v37, %v10253_v47  ;;  %v10256_v2 = vpop.f32.mrb[94].mxu0 }
 0x528   : > { %v10257_v56 = vpop.f32.mrb[95].mxu0 }
 0x529   : > { %v3987_v46 = vadd.f32 %v10255_v62, %v3931_v32 }
 0x52f   : > { %v10275_v22 = vpop.f32.mrb[80].mxu1 }
 0x530   : > { %v10276_v1 = vpop.f32.mrb[81].mxu1 }
 0x531   : > { %v10277_v8 = vadd.f32 %v10276_v1, %v10275_v22  ;;  %v10278_v30 = vpop.f32.mrb[82].mxu1 }
 0x532   : > { %v10279_v35 = vpop.f32.mrb[83].mxu1 }
 0x533   : > { %v4027_v13 = vadd.f32 %v10277_v8, %v3971_v48  ;;  %v10280_v28 = vadd.f32 %v10279_v35, %v10278_v30 }
 0x535   : > { %v10309_v18 = vpop.f32.mrb[96].mxu0  ;;  %v4030_v42 = vadd.f32 %v10280_v28, %v3974_v6 }
 0x536   : > { %v10310_v61 = vpop.f32.mrb[97].mxu0 }
 0x537   : > { %v10311_v4 = vadd.f32 %v10310_v61, %v10309_v18  ;;  %v10312_v33 = vpop.f32.mrb[98].mxu0  ;;  %v10281_v25 = vpop.f32.mrb[84].mxu1 }
 0x538   : > { %v10313_v26 = vpop.f32.mrb[99].mxu0  ;;  %v10282_v49 = vpop.f32.mrb[85].mxu1 }
 0x539   : > { %v10314_v39 = vadd.f32 %v10313_v26, %v10312_v33  ;;  %v10283_v23 = vadd.f32 %v10282_v49, %v10281_v25  ;;  %v10284_v5 = vpop.f32.mrb[86].mxu1  ;;  %v4083_v20 = vadd.f32 %v10311_v4, %v4027_v13 }
 0x53a   : > { %v10285_v63 = vpop.f32.mrb[87].mxu1 }
 0x53b   : > { %v4035_v55 = vadd.f32 %v10283_v23, %v3979_v52  ;;  %v10286_v19 = vadd.f32 %v10285_v63, %v10284_v5  ;;  %v4086_v0 = vadd.f32 %v10314_v39, %v4030_v42 }
 0x53d   : > { %v10315_v53 = vpop.f32.mrb[100].mxu0  ;;  %v4038_v17 = vadd.f32 %v10286_v19, %v3982_v3 }
 0x53e   : > { %v10316_v48 = vpop.f32.mrb[101].mxu0 }
 0x53f   : > { %v10317_v34 = vadd.f32 %v10316_v48, %v10315_v53  ;;  %v10318_v59 = vpop.f32.mrb[102].mxu0  ;;  %v10287_v6 = vpop.f32.mrb[88].mxu1 }
 0x540   : > { %v10319_v57 = vpop.f32.mrb[103].mxu0  ;;  %v10288_v43 = vpop.f32.mrb[89].mxu1 }
 0x541   : > { %v10320_v50 = vadd.f32 %v10319_v57, %v10318_v59  ;;  %v10289_v40 = vadd.f32 %v10288_v43, %v10287_v6  ;;  %v10290_v41 = vpop.f32.mrb[90].mxu1  ;;  %v4091_v11 = vadd.f32 %v10317_v34, %v4035_v55 }
 0x542   : > { %v10291_v10 = vpop.f32.mrb[91].mxu1 }
 0x543   : > { %v4043_v54 = vadd.f32 %v10289_v40, %v3987_v46  ;;  %v4094_v24 = vadd.f32 %v10320_v50, %v4038_v17 }
 0x545   : > { %v10321_v9 = vpop.f32.mrb[104].mxu0 }
 0x546   : > { %v10322_v36 = vpop.f32.mrb[105].mxu0 }
 0x547   : > { %v10323_v21 = vadd.f32 %v10322_v36, %v10321_v9  ;;  %v10324_v16 = vpop.f32.mrb[106].mxu0 }
 0x548   : > { %v10325_v12 = vpop.f32.mrb[107].mxu0 }
 0x549   : > { %v4099_v52 = vadd.f32 %v10323_v21, %v4043_v54 }
 0x54f   : > { %v4138_v45 = vpop.f32.mrb[92].mxu1 }
 0x550   : > { %v4139_v7 = vadd.f32 %v4138_v45, %v4083_v20  ;;  %v10474_v58 = vpop.f32.mrb[93].mxu1 }
 0x551   : > { %v4141_v3 = vpop.f32.mrb[94].mxu1 }
 0x552   : > { %v4160_v27 = vmax.f32 %v4139_v7, 0.0  ;;  %v4142_v15 = vadd.f32 %v4141_v3, %v4086_v0  ;;  %v10475_v60 = vpop.f32.mrb[95].mxu1 }
 0x554   : > { %v4161_v51 = vmax.f32 %v4142_v15, 0.0  ;;  %v4172_v47 = vrot.slane %v4160_v27, 1  ;;  %v4194_v44 = vrot.slane %v4160_v27, 6  ;;  %v4165_v32 = vrot.slane %v4160_v27, 4 }
 0x555   : > { %v4215_v56 = vrot.slane %v4160_v27, 7 }
 0x556   : > { %v4173_v37 = vrot.slane %v4161_v51, 1  ;;  %v4191_v29 = vrot.slane %v4161_v51, 4  ;;  %v4195_v62 = vrot.slane %v4161_v51, 6  ;;  %v4216_v2 = vrot.slane %v4161_v51, 7 }
 0x557   : > { %v4146_v14 = vpop.f32.mrb[96].mxu1 }
 0x558   : > { %v4147_v46 = vadd.f32 %v4146_v14, %v4091_v11  ;;  %v10478_v31 = vpop.f32.mrb[97].mxu1  ;;  %v4192_v22 = vsel %vm751_vm0, %v4191_v29, %v4165_v32  ;;  %v4174_v1 = vsel %vm791_vm1, %v4172_v47, %v4173_v37  ;;  %v4196_v8 = vsel %vm2828_vm7, %v4194_v44, %v4195_v62  ;;  %v10889_v29 = vld [vmem:[#allocation12 + $0xc] ss:$16 sps:$4 sm:$0xff]  }
 0x559   : > { %v4149_v30 = vpop.f32.mrb[98].mxu1  ;;  %v4186_v35 = vmax.f32 %v4160_v27, %v4174_v1  ;;  %v4217_v13 = vsel %vm886_vm4, %v4215_v56, %v4216_v2  ;;  %v4203_v54 = vrot.slane %v4192_v22, 6  ;;  %v4224_v12 = vrot.slane %v4192_v22, 7  ;;  %v10887_v56 = vld [vmem:[#allocation12 + $0x8] ss:$16 sps:$4 sm:$0xff]  }
 0x55a   : > { %v4162_v28 = vmax.f32 %v4147_v46, 0.0  ;;  %v4150_v18 = vadd.f32 %v4149_v30, %v4094_v24  ;;  %v10479_v42 = vpop.f32.mrb[99].mxu1  ;;  %v10895_v14 = vld [vmem:[#allocation12 + $0x2c] ss:$16 sps:$4 sm:$0xff]   ;;  %v10893_v46 = vld [vmem:[#allocation12 + $0x28] ss:$16 sps:$4 sm:$0xff]  }
 0x55b   : > { %v4210_v61 = vmax.f32 %v4186_v35, %v4196_v8  ;;  %v10901_v31 = vld [vmem:[#allocation12 + $0x4c] ss:$16 sps:$4 sm:$0xff]   ;;  %v10899_v22 = vld [vmem:[#allocation12 + $0x48] ss:$16 sps:$4 sm:$0xff]  }
 0x55c   : > { %v4175_v4 = vrot.slane %v4162_v28, 1  ;;  %v4197_v33 = vrot.slane %v4162_v28, 6  ;;  %v4218_v25 = vrot.slane %v4162_v28, 7  ;;  %v4163_v26 = vmax.f32 %v4150_v18, 0.0  ;;  %v10907_v1 = vld [vmem:[#allocation12 + $0x6c] ss:$16 sps:$4 sm:$0xff]  }
 0x55d   : > { %v4231_v49 = vmax.f32 %v4210_v61, %v4217_v13  ;;  %v10913_v8 = vld [vmem:[#allocation12 + $0x8c] ss:$16 sps:$4 sm:$0xff]   ;;  %v10911_v30 = vld [vmem:[#allocation12 + $0x88] ss:$16 sps:$4 sm:$0xff]  }
 0x55e   : > { %v4176_v39 = vsel %vm791_vm1, %v4173_v37, %v4175_v4  ;;  %v4177_v23 = vrot.slane %v4163_v26, 1  ;;  %v4199_v5 = vrot.slane %v4163_v26, 6  ;;  %v4220_v20 = vrot.slane %v4163_v26, 7  ;;  %v10919_v35 = vld [vmem:[#allocation12 + $0xac] ss:$16 sps:$4 sm:$0xff]  }
 0x55f   : > { %v4154_v63 = vpop.f32.mrb[100].mxu1  ;;  %v4187_v55 = vmax.f32 %v4161_v51, %v4176_v39  ;;  %v4198_v19 = vsel %vm2828_vm7, %v4195_v62, %v4197_v33  ;;  %v4219_v0 = vsel %vm886_vm4, %v4216_v2, %v4218_v25  ;;  %v10883_v2 = vld [vmem:[#allocation10] sm:$0xff]  }
 0x560   : > { %v4178_v53 = vsel %vm791_vm1, %v4175_v4, %v4177_v23  ;;  %v4155_v17 = vadd.f32 %v4154_v63, %v4099_v52  ;;  %v10482_v48 = vpop.f32.mrb[101].mxu1  ;;  %v4200_v34 = vsel %vm2828_vm7, %v4197_v33, %v4199_v5  ;;  %v4221_v59 = vsel %vm886_vm4, %v4218_v25, %v4220_v20  ;;  %v10917_v13 = vld [vmem:[#allocation12 + $0xa8] ss:$16 sps:$4 sm:$0xff]   ;;  %v10931_v42 = vld [vmem:[#allocation12 + $0xec] ss:$16 sps:$4 sm:$0xff]  }
 0x561   : > { %v4157_v6 = vpop.f32.mrb[102].mxu1  ;;  %v4211_v57 = vmax.f32 %v4187_v55, %v4198_v19  ;;  %v4188_v43 = vmax.f32 %v4162_v28, %v4178_v53  ;;  %v10925_v28 = vld [vmem:[#allocation12 + $0xcc] ss:$16 sps:$4 sm:$0xff]   ;;  %v10923_v18 = vld [vmem:[#allocation12 + $0xc8] ss:$16 sps:$4 sm:$0xff]  }
 0x562   : > { %v4164_v50 = vmax.f32 %v4155_v17, 0.0  ;;  %v10483_v40 = vpop.f32.mrb[103].mxu1  ;;  %v10929_v61 = vld [vmem:[#allocation12 + $0xe8] ss:$16 sps:$4 sm:$0xff]   ;;  %v10937_v4 = vld [vmem:[#allocation12 + $0x10c] ss:$16 sps:$4 sm:$0xff]  }
 0x563   : > { %v4232_v41 = vmax.f32 %v4211_v57, %v4219_v0  ;;  %v4212_v11 = vmax.f32 %v4188_v43, %v4200_v34  ;;  %v10935_v33 = vld [vmem:[#allocation12 + $0x108] ss:$16 sps:$4 sm:$0xff]   ;;  %v10943_v25 = vld [vmem:[#allocation12 + $0x12c] ss:$16 sps:$4 sm:$0xff]   ;;  %v10968_v0 = vld [vmem:[#allocation12 + $0x1c0] ss:$16 sps:$4 sm:$0xff]   ;;  %v4296_v40 = vlaneseq }
 0x564   : > { %v4166_v10 = vsel %vm751_vm0, %v4165_v32, %v4164_v50  ;;  %v10947_v39 = vld [vmem:[#allocation12 + $0x148] ss:$16 sps:$4 sm:$0xff]   ;;  %v10967_v55 = vld [vmem:[#allocation12 + $0x1ac] ss:$16 sps:$4 sm:$0xff]   ;;  %v10970_v53 = vld [vmem:[#allocation12 + $0x1c4] ss:$16 sps:$4 sm:$0xff]  }
 0x565   : > { %v4179_v24 = vrot.slane %v4166_v10, 1  ;;  %v4201_v9 = vrot.slane %v4166_v10, 6  ;;  %v4222_v36 = vrot.slane %v4166_v10, 7  ;;  %v4238_v21 = vpack.c.bf16 %v4232_v41, %v4231_v49  ;;  %v10949_v49 = vld [vmem:[#allocation12 + $0x14c] ss:$16 sps:$4 sm:$0xff]   ;;  %6108 = vmatprep.subr.bf16.mxu1 %v10970_v53 }
 0x566   : > { %v4233_v16 = vmax.f32 %v4212_v11, %v4221_v59  ;;  %v10959_v63 = vld [vmem:[#allocation12 + $0x188] ss:$16 sps:$4 sm:$0xff]   ;;  %v10973_v48 = vld [vmem:[#allocation12 + $0x1cc] ss:$16 sps:$4 sm:$0xff]   ;;  %v10976_v34 = vld [vmem:[#allocation12 + $0x1e4] ss:$16 sps:$4 sm:$0xff]   ;;  %6109 = vmatpush1.bf16.msra.mxu1 %v10968_v0 }
 0x567   : > { %v4180_v52 = vsel %vm791_vm1, %v4177_v23, %v4179_v24  ;;  %v4190_v45 = vmax.f32 %v4164_v50, %v4179_v24  ;;  %v4202_v7 = vsel %vm2828_vm7, %v4199_v5, %v4201_v9  ;;  %v4204_v58 = vsel %vm2828_vm7, %v4201_v9, %v4203_v54  ;;  %10485 = vmatpush3.bf16.msra.mxu0 %v4238_v21  ;;  %v10955_v23 = vld [vmem:[#allocation12 + $0x16c] ss:$16 sps:$4 sm:$0xff]   ;;  %v10953_v5 = vld [vmem:[#allocation12 + $0x168] ss:$16 sps:$4 sm:$0xff]   ;;  %v10974_v59 = vld [vmem:[#allocation12 + $0x1e0] ss:$16 sps:$4 sm:$0xff]  }
 0x568   : > { %v4189_v3 = vmax.f32 %v4163_v26, %v4180_v52  ;;  %10486 = vmatprep.subr.bf16.mxu0 %v13881_v38  ;;  %v4223_v27 = vsel %vm886_vm4, %v4220_v20, %v4222_v36  ;;  %v4225_v15 = vsel %vm886_vm4, %v4222_v36, %v4224_v12  ;;  %v10941_v26 = vld [vmem:[#allocation12 + $0x128] ss:$16 sps:$4 sm:$0xff]   ;;  %v10961_v20 = vld [vmem:[#allocation12 + $0x18c] ss:$16 sps:$4 sm:$0xff]   ;;  %6110 = vmatprep.subr.bf16.mxu1 %v10976_v34  ;;  %v10982_v43 = vld [vmem:[#allocation12 + $0x204] ss:$16 sps:$4 sm:$0xff]  }
 0x569   : > { %v4214_v60 = vmax.f32 %v4190_v45, %v4204_v58  ;;  %v10965_v19 = vld [vmem:[#allocation12 + $0x1a8] ss:$16 sps:$4 sm:$0xff]   ;;  %v10979_v6 = vld [vmem:[#allocation12 + $0x1ec] ss:$16 sps:$4 sm:$0xff]   ;;  %v13601_v41 = vshrl.u32 %v4296_v40, 7  ;;  %vm6595_vm1 = vcmask 130048  }
 0x56a   : > { %v4213_v51 = vmax.f32 %v4189_v3, %v4202_v7  ;;  %v10971_v17 = vld [vmem:[#allocation12 + $0x1c8] ss:$16 sps:$4 sm:$0xff]   ;;  %6111 = vmatpush1.bf16.msra.mxu1 %v10974_v59  ;;  %v10985_v50 = vld [vmem:[#allocation12 + $0x20c] ss:$16 sps:$4 sm:$0xff]   ;;  %v11010_v53 = vld [vmem:[#allocation12 + $0x2a0] ss:$16 sps:$4 sm:$0xff]  }
 0x56b   : > { %v4235_v47 = vmax.f32 %v4214_v60, %v4225_v15  ;;  %v10977_v57 = vld [vmem:[#allocation12 + $0x1e8] ss:$16 sps:$4 sm:$0xff]   ;;  %6123 = vmatprep.subr.bf16.mxu1 %v10982_v43  ;;  %vm4303_vm12 = vcmp.lt.s32.totalorder %v13601_v41, 4  ;;  %vm4298_vm13 = vcmp.lt.s32.totalorder %v13601_v41, 5  ;;  %vm4313_vm14 = vcmp.lt.s32.totalorder %v13601_v41, 1 }
 0x56c   : > { %v4234_v44 = vmax.f32 %v4213_v51, %v4223_v27  ;;  %vm4308_vm15 = vcmp.lt.s32.totalorder %v13601_v41, 3  ;;  %vm4318_vm0 = vcmp.lt.s32.totalorder %v13601_v41, 7  ;;  %v11015_v0 = vld [vmem:[#allocation12 + $0x2ac] ss:$16 sps:$4 sm:$0xff]   ;;  %v11016_v59 = vld [vmem:[#allocation12 + $0x2c0] ss:$16 sps:$4 sm:$0xff]  }
 0x56d   : > { %v4240_v37 = vpack.c.bf16 %v4235_v47, %v4235_v47  ;;  %v11021_v34 = vld [vmem:[#allocation12 + $0x2cc] ss:$16 sps:$4 sm:$0xff]   ;;  %v11025_v40 = vld [vmem:[#allocation12 + $0x2e8] ss:$16 sps:$4 sm:$0xff]  }
 0x56e   : > { %v4239_v32 = vpack.c.bf16 %v4234_v44, %v4233_v16  ;;  %v11027_v43 = vld [vmem:[#allocation12 + $0x2ec] ss:$16 sps:$4 sm:$0xff]  }
 0x56f   : > { %v4251_v62 = vsel %vm2828_vm7, %v4240_v37, 0  ;;  %v10983_v37 = vld [vmem:[#allocation12 + $0x208] ss:$16 sps:$4 sm:$0xff]  }
 0x570   : > { %10487 = vmatpush3.bf16.msra.mxu0 %v4239_v32  ;;  %v10980_v32 = vld [vmem:[#allocation12 + $0x200] ss:$16 sps:$4 sm:$0xff]  }
 0x571   : > { %10488 = vmatprep.subr.bf16.mxu0 %v13881_v38  ;;  %v10905_v38 = vld [vmem:[#allocation12 + $0x68] ss:$16 sps:$4 sm:$0xff]  }
 0x574   : > { %10489 = vmatpush3.bf16.msra.mxu0 %v4251_v62 }
 0x575   : > { %6295 = vmatprep.subr.bf16.mxu0 %v10889_v29 }
 0x577   : > { %10491 = vmatmul.mubr.msk.bf16.vlgmr.msra.gmra.mrb[108].mxu0 %vm4246_vm11, %v10883_v2 }
 0x578   : > { %6296 = vmatpush1.bf16.msra.mxu0 %v10887_v56 }
 0x579   : > { %6297 = vmatprep.subr.bf16.mxu0 %v10895_v14 }
 0x57c   : > { %6298 = vmatpush1.bf16.msra.mxu0 %v10893_v46 }
 0x57d   : > { %6299 = vmatprep.subr.bf16.mxu0 %v10901_v31 }
 0x580   : > { %6300 = vmatpush1.bf16.msra.mxu0 %v10899_v22  ;;  %v10988_v22 = vld [vmem:[#allocation12 + $0x224] ss:$16 sps:$4 sm:$0xff]  }
 0x581   : > { %6301 = vmatprep.subr.bf16.mxu0 %v10907_v1  ;;  %v10991_v1 = vld [vmem:[#allocation12 + $0x22c] ss:$16 sps:$4 sm:$0xff]  }
 0x584   : > { %6302 = vmatpush1.bf16.msra.mxu0 %v10905_v38 }
 0x585   : > { %6303 = vmatprep.subr.bf16.mxu0 %v10913_v8 }
 0x588   : > { %6304 = vmatpush1.bf16.msra.mxu0 %v10911_v30 }
 0x589   : > { %6305 = vmatprep.subr.bf16.mxu0 %v10919_v35 }
 0x58c   : > { %6306 = vmatpush1.bf16.msra.mxu0 %v10917_v13 }
 0x58d   : > { %6307 = vmatprep.subr.bf16.mxu0 %v10925_v28 }
 0x590   : > { %6308 = vmatpush1.bf16.msra.mxu0 %v10923_v18  ;;  %v10986_v18 = vld [vmem:[#allocation12 + $0x220] ss:$16 sps:$4 sm:$0xff]  }
 0x591   : > { %6309 = vmatprep.subr.bf16.mxu0 %v10931_v42  ;;  %v10989_v42 = vld [vmem:[#allocation12 + $0x228] ss:$16 sps:$4 sm:$0xff]  }
 0x594   : > { %6310 = vmatpush1.bf16.msra.mxu0 %v10929_v61  ;;  %v10994_v61 = vld [vmem:[#allocation12 + $0x244] ss:$16 sps:$4 sm:$0xff]  }
 0x595   : > { %6311 = vmatprep.subr.bf16.mxu0 %v10937_v4  ;;  %v10997_v4 = vld [vmem:[#allocation12 + $0x24c] ss:$16 sps:$4 sm:$0xff]  }
 0x598   : > { %6312 = vmatpush1.bf16.msra.mxu0 %v10935_v33  ;;  %v10992_v33 = vld [vmem:[#allocation12 + $0x240] ss:$16 sps:$4 sm:$0xff]  }
 0x599   : > { %6313 = vmatprep.subr.bf16.mxu0 %v10943_v25  ;;  %v10995_v25 = vld [vmem:[#allocation12 + $0x248] ss:$16 sps:$4 sm:$0xff]  }
 0x59c   : > { %6314 = vmatpush1.bf16.msra.mxu0 %v10941_v26  ;;  %v11000_v26 = vld [vmem:[#allocation12 + $0x264] ss:$16 sps:$4 sm:$0xff]  }
 0x59d   : > { %6315 = vmatprep.subr.bf16.mxu0 %v10949_v49  ;;  %v11003_v49 = vld [vmem:[#allocation12 + $0x26c] ss:$16 sps:$4 sm:$0xff]  }
 0x5a0   : > { %6316 = vmatpush1.bf16.msra.mxu0 %v10947_v39  ;;  %v10998_v39 = vld [vmem:[#allocation12 + $0x260] ss:$16 sps:$4 sm:$0xff]  }
 0x5a1   : > { %6317 = vmatprep.subr.bf16.mxu0 %v10955_v23  ;;  %v11001_v23 = vld [vmem:[#allocation12 + $0x268] ss:$16 sps:$4 sm:$0xff]  }
 0x5a4   : > { %6318 = vmatpush1.bf16.msra.mxu0 %v10953_v5  ;;  %v11006_v5 = vld [vmem:[#allocation12 + $0x284] ss:$16 sps:$4 sm:$0xff]  }
 0x5a5   : > { %6319 = vmatprep.subr.bf16.mxu0 %v10961_v20  ;;  %v11009_v20 = vld [vmem:[#allocation12 + $0x28c] ss:$16 sps:$4 sm:$0xff]  }
 0x5a8   : > { %6320 = vmatpush1.bf16.msra.mxu0 %v10959_v63  ;;  %v11004_v63 = vld [vmem:[#allocation12 + $0x280] ss:$16 sps:$4 sm:$0xff]  }
 0x5a9   : > { %6321 = vmatprep.subr.bf16.mxu0 %v10967_v55  ;;  %v11007_v55 = vld [vmem:[#allocation12 + $0x288] ss:$16 sps:$4 sm:$0xff]  }
 0x5ac   : > { %6322 = vmatpush1.bf16.msra.mxu0 %v10965_v19  ;;  %v11012_v19 = vld [vmem:[#allocation12 + $0x2a4] ss:$16 sps:$4 sm:$0xff]  }
 0x5ad   : > { %6323 = vmatprep.subr.bf16.mxu0 %v10973_v48  ;;  %v11018_v48 = vld [vmem:[#allocation12 + $0x2c4] ss:$16 sps:$4 sm:$0xff]  }
 0x5b0   : > { %6324 = vmatpush1.bf16.msra.mxu0 %v10971_v17  ;;  %v11013_v17 = vld [vmem:[#allocation12 + $0x2a8] ss:$16 sps:$4 sm:$0xff]  }
 0x5b1   : > { %6325 = vmatprep.subr.bf16.mxu0 %v10979_v6  ;;  %v11019_v6 = vld [vmem:[#allocation12 + $0x2c8] ss:$16 sps:$4 sm:$0xff]  }
 0x5b4   : > { %6326 = vmatpush1.bf16.msra.mxu0 %v10977_v57  ;;  %v11024_v57 = vld [vmem:[#allocation12 + $0x2e4] ss:$16 sps:$4 sm:$0xff]  }
 0x5b5   : > { %6338 = vmatprep.subr.bf16.mxu0 %v10985_v50  ;;  %v11022_v50 = vld [vmem:[#allocation12 + $0x2e0] ss:$16 sps:$4 sm:$0xff]  }
 0x64a   : > { %v4287_v11 = vpop.f32.mrb[108].mxu0 }
 0x64b   : > { %v10492_v10 = vpop.f32.mrb[109].mxu0  ;;  %v4294_v54 = vrot.slane %v4287_v11, 3  ;;  %v4306_v24 = vrot.slane %v4287_v11, 5  ;;  %v4301_v36 = vrot.slane %v4287_v11, 4  ;;  %v4311_v7 = vrot.slane %v4287_v11, 7 }
 0x64c   : > { %v4290_v9 = vpop.f32.mrb[110].mxu0  ;;  %v4316_v58 = vrot.slane %v4287_v11, 1  ;;  %v11033_v10 = vld [vmem:[#allocation12 + $0x30c] ss:$16 sps:$4 sm:$0xff]  }
 0x64d   : > { %v4295_v21 = vrot.slane %v4290_v9, 3  ;;  %v4307_v16 = vrot.slane %v4290_v9, 5  ;;  %v10493_v12 = vpop.f32.mrb[111].mxu0  ;;  %v4302_v52 = vrot.slane %v4290_v9, 4  ;;  %v4312_v45 = vrot.slane %v4290_v9, 7 }
 0x64e   : > { %v4317_v3 = vrot.slane %v4290_v9, 1  ;;  %v13608_v27 = vpack.c.bf16 %v4290_v9, %v4287_v11  ;;  %v11030_v11 = vld [vmem:[#allocation12 + $0x304] ss:$16 sps:$4 sm:$0xff]  }
 0x64f   : > { %v4304_v15 = vsel %vm4303_vm12, %v4301_v36, %v4302_v52  ;;  %v4305_v60 = vsel %vm4303_vm12, %v4302_v52, %v4301_v36  ;;  %v4299_v51 = vsel %vm4298_vm13, %v4294_v54, %v4295_v21  ;;  %v4300_v47 = vsel %vm4298_vm13, %v4295_v21, %v4294_v54  ;;  %v11028_v54 = vld [vmem:[#allocation12 + $0x300] ss:$16 sps:$4 sm:$0xff]   ;;  %v11036_v9 = vld [vmem:[#allocation12 + $0x324] ss:$16 sps:$4 sm:$0xff]   ;;  %v11039_v36 = vld [vmem:[#allocation12 + $0x32c] ss:$16 sps:$4 sm:$0xff]  }
 0x650   : > { %v4322_v44 = vpack.c.bf16 %v4304_v15, %v4305_v60  ;;  %v4321_v29 = vpack.c.bf16 %v4299_v51, %v4300_v47  ;;  %v4314_v62 = vsel %vm4313_vm14, %v4311_v7, %v4312_v45  ;;  %v4315_v2 = vsel %vm4313_vm14, %v4312_v45, %v4311_v7  ;;  %v11034_v21 = vld [vmem:[#allocation12 + $0x320] ss:$16 sps:$4 sm:$0xff]   ;;  %v11042_v12 = vld [vmem:[#allocation12 + $0x344] ss:$16 sps:$4 sm:$0xff]   ;;  %v11045_v52 = vld [vmem:[#allocation12 + $0x34c] ss:$16 sps:$4 sm:$0xff]  }
 0x651   : > { %v4324_v56 = vpack.c.bf16 %v4314_v62, %v4315_v2  ;;  %v4309_v14 = vsel %vm4308_vm15, %v4306_v24, %v4307_v16  ;;  %v4310_v46 = vsel %vm4308_vm15, %v4307_v16, %v4306_v24  ;;  %v4319_v31 = vsel %vm4318_vm0, %v4316_v58, %v4317_v3  ;;  %v11031_v24 = vld [vmem:[#allocation12 + $0x308] ss:$16 sps:$4 sm:$0xff]   ;;  %v11040_v45 = vld [vmem:[#allocation12 + $0x340] ss:$16 sps:$4 sm:$0xff]  }
 0x652   : > { %6112 = vmatprep.mubr.bf16.mxu1 %v4322_v44  ;;  %6327 = vmatprep.mubr.bf16.mxu0 %v4322_v44  ;;  %v13628_v38 = vpack.c.bf16 %v4309_v14, %v4310_v46  ;;  %v4320_v8 = vsel %vm4318_vm0, %v4317_v3, %v4316_v58  ;;  %v13632_v30 = vpack.c.bf16 %v4305_v60, %v4304_v15  ;;  %v11037_v16 = vld [vmem:[#allocation12 + $0x328] ss:$16 sps:$4 sm:$0xff]   ;;  %v11048_v58 = vld [vmem:[#allocation12 + $0x364] ss:$16 sps:$4 sm:$0xff]   ;;  %v11051_v3 = vld [vmem:[#allocation12 + $0x36c] ss:$16 sps:$4 sm:$0xff]  }
 0x653   : > { %6113 = vmatmul.mubr.bf16.vlgmr.msra.gmra.mrb[104].mxu1 %v4321_v29  ;;  %6328 = vmatmul.mubr.bf16.vlgmr.msra.gmra.mrb[112].mxu0 %v4321_v29  ;;  %v13634_v35 = vpack.c.bf16 %v4320_v8, %v4319_v31  ;;  %v13636_v13 = vpack.c.bf16 %v4300_v47, %v4299_v51  ;;  %v13638_v28 = vpack.c.bf16 %v4310_v46, %v4309_v14  ;;  %v11043_v7 = vld [vmem:[#allocation12 + $0x348] ss:$16 sps:$4 sm:$0xff]   ;;  %v11046_v15 = vld [vmem:[#allocation12 + $0x360] ss:$16 sps:$4 sm:$0xff]   ;;  %v11054_v51 = vld [vmem:[#allocation12 + $0x384] ss:$16 sps:$4 sm:$0xff]  }
 0x654   : > { %6124 = vmatpush1.bf16.msra.mxu1 %v10980_v32  ;;  %6339 = vmatpush1.bf16.msra.mxu0 %v10983_v37  ;;  %v11049_v60 = vld [vmem:[#allocation12 + $0x368] ss:$16 sps:$4 sm:$0xff]   ;;  %v11057_v47 = vld [vmem:[#allocation12 + $0x38c] ss:$16 sps:$4 sm:$0xff]   ;;  %v11052_v44 = vld [vmem:[#allocation12 + $0x380] ss:$16 sps:$4 sm:$0xff]  }
 0x655   : > { %6155 = vmatprep.mubr.bf16.mxu1 %v4324_v56  ;;  %6370 = vmatprep.mubr.bf16.mxu0 %v4324_v56  ;;  %v11055_v32 = vld [vmem:[#allocation12 + $0x388] ss:$16 sps:$4 sm:$0xff]   ;;  %v11060_v37 = vld [vmem:[#allocation12 + $0x3a4] ss:$16 sps:$4 sm:$0xff]   ;;  %v11063_v29 = vld [vmem:[#allocation12 + $0x3ac] ss:$16 sps:$4 sm:$0xff]  }
 0x656   : > { %6125 = vmatprep.subr.bf16.mxu1 %v10988_v22  ;;  %6340 = vmatprep.subr.bf16.mxu0 %v10991_v1  ;;  %v11058_v62 = vld [vmem:[#allocation12 + $0x3a0] ss:$16 sps:$4 sm:$0xff]   ;;  %v11061_v2 = vld [vmem:[#allocation12 + $0x3a8] ss:$16 sps:$4 sm:$0xff]   ;;  %v11066_v56 = vld [vmem:[#allocation12 + $0x3c4] ss:$16 sps:$4 sm:$0xff]  }
 0x657   : > { %v11069_v14 = vld [vmem:[#allocation12 + $0x3cc] ss:$16 sps:$4 sm:$0xff]   ;;  %v11064_v46 = vld [vmem:[#allocation12 + $0x3c0] ss:$16 sps:$4 sm:$0xff]   ;;  %v11067_v31 = vld [vmem:[#allocation12 + $0x3c8] ss:$16 sps:$4 sm:$0xff]  }
 0x658   : > { %6126 = vmatpush1.bf16.msra.mxu1 %v10986_v18  ;;  %6341 = vmatpush1.bf16.msra.mxu0 %v10989_v42  ;;  %v11072_v22 = vld [vmem:[#allocation12 + $0x3e4] ss:$16 sps:$4 sm:$0xff]   ;;  %v11075_v1 = vld [vmem:[#allocation12 + $0x3ec] ss:$16 sps:$4 sm:$0xff]   ;;  %v11070_v8 = vld [vmem:[#allocation12 + $0x3e0] ss:$16 sps:$4 sm:$0xff]  }
 0x659   : > { %6127 = vmatprep.subr.bf16.mxu1 %v10994_v61  ;;  %6342 = vmatprep.subr.bf16.mxu0 %v10997_v4  ;;  %v11073_v18 = vld [vmem:[#allocation12 + $0x3e8] ss:$16 sps:$4 sm:$0xff]   ;;  %v11078_v42 = vld [vmem:[#allocation12 + $0x404] ss:$16 sps:$4 sm:$0xff]   ;;  %v11081_v61 = vld [vmem:[#allocation12 + $0x40c] ss:$16 sps:$4 sm:$0xff]  }
 0x65a   : > { %v11076_v4 = vld [vmem:[#allocation12 + $0x400] ss:$16 sps:$4 sm:$0xff]  }
 0x65c   : > { %6128 = vmatpush1.bf16.msra.mxu1 %v10992_v33  ;;  %6343 = vmatpush1.bf16.msra.mxu0 %v10995_v25  ;;  %v11079_v33 = vld [vmem:[#allocation12 + $0x408] ss:$16 sps:$4 sm:$0xff]   ;;  %v11084_v25 = vld [vmem:[#allocation12 + $0x424] ss:$16 sps:$4 sm:$0xff]  }
 0x65d   : > { %6129 = vmatprep.subr.bf16.mxu1 %v11000_v26  ;;  %6344 = vmatprep.subr.bf16.mxu0 %v11003_v49  ;;  %v11087_v26 = vld [vmem:[#allocation12 + $0x42c] ss:$16 sps:$4 sm:$0xff]   ;;  %v11082_v49 = vld [vmem:[#allocation12 + $0x420] ss:$16 sps:$4 sm:$0xff]  }
 0x660   : > { %6130 = vmatpush1.bf16.msra.mxu1 %v10998_v39  ;;  %6345 = vmatpush1.bf16.msra.mxu0 %v11001_v23  ;;  %v11085_v39 = vld [vmem:[#allocation12 + $0x428] ss:$16 sps:$4 sm:$0xff]   ;;  %v11090_v23 = vld [vmem:[#allocation12 + $0x444] ss:$16 sps:$4 sm:$0xff]  }
 0x661   : > { %6131 = vmatprep.subr.bf16.mxu1 %v11006_v5  ;;  %6346 = vmatprep.subr.bf16.mxu0 %v11009_v20  ;;  %v11093_v5 = vld [vmem:[#allocation12 + $0x44c] ss:$16 sps:$4 sm:$0xff]   ;;  %v11088_v20 = vld [vmem:[#allocation12 + $0x440] ss:$16 sps:$4 sm:$0xff]  }
 0x664   : > { %6132 = vmatpush1.bf16.msra.mxu1 %v11004_v63  ;;  %6347 = vmatpush1.bf16.msra.mxu0 %v11007_v55  ;;  %v11091_v63 = vld [vmem:[#allocation12 + $0x448] ss:$16 sps:$4 sm:$0xff]   ;;  %v11096_v55 = vld [vmem:[#allocation12 + $0x464] ss:$16 sps:$4 sm:$0xff]  }
 0x665   : > { %6133 = vmatprep.subr.bf16.mxu1 %v11012_v19  ;;  %6348 = vmatprep.subr.bf16.mxu0 %v11015_v0  ;;  %v11094_v19 = vld [vmem:[#allocation12 + $0x460] ss:$16 sps:$4 sm:$0xff]   ;;  %v11097_v0 = vld [vmem:[#allocation12 + $0x468] ss:$16 sps:$4 sm:$0xff]  }
 0x668   : > { %6134 = vmatpush1.bf16.msra.mxu1 %v11010_v53  ;;  %6349 = vmatpush1.bf16.msra.mxu0 %v11013_v17  ;;  %v11102_v53 = vld [vmem:[#allocation12 + $0x484] ss:$16 sps:$4 sm:$0xff]   ;;  %v11100_v17 = vld [vmem:[#allocation12 + $0x480] ss:$16 sps:$4 sm:$0xff]  }
 0x669   : > { %6135 = vmatprep.subr.bf16.mxu1 %v11018_v48  ;;  %6350 = vmatprep.subr.bf16.mxu0 %v11021_v34  ;;  %v11103_v48 = vld [vmem:[#allocation12 + $0x488] ss:$16 sps:$4 sm:$0xff]   ;;  %v11108_v34 = vld [vmem:[#allocation12 + $0x4a4] ss:$16 sps:$4 sm:$0xff]  }
 0x66c   : > { %6136 = vmatpush1.bf16.msra.mxu1 %v11016_v59  ;;  %6351 = vmatpush1.bf16.msra.mxu0 %v11019_v6  ;;  %v11111_v59 = vld [vmem:[#allocation12 + $0x4ac] ss:$16 sps:$4 sm:$0xff]   ;;  %v11106_v6 = vld [vmem:[#allocation12 + $0x4a0] ss:$16 sps:$4 sm:$0xff]  }
 0x66d   : > { %6137 = vmatprep.subr.bf16.mxu1 %v11024_v57  ;;  %6352 = vmatprep.subr.bf16.mxu0 %v11027_v43  ;;  %v11109_v57 = vld [vmem:[#allocation12 + $0x4a8] ss:$16 sps:$4 sm:$0xff]   ;;  %v11114_v43 = vld [vmem:[#allocation12 + $0x4c4] ss:$16 sps:$4 sm:$0xff]  }
 0x670   : > { %6138 = vmatpush1.bf16.msra.mxu1 %v11022_v50  ;;  %6353 = vmatpush1.bf16.msra.mxu0 %v11025_v40  ;;  %v11117_v50 = vld [vmem:[#allocation12 + $0x4cc] ss:$16 sps:$4 sm:$0xff]   ;;  %v11112_v40 = vld [vmem:[#allocation12 + $0x4c0] ss:$16 sps:$4 sm:$0xff]  }
 0x671   : > { %6139 = vmatprep.subr.bf16.mxu1 %v11030_v11  ;;  %6354 = vmatprep.subr.bf16.mxu0 %v11033_v10  ;;  %v11115_v11 = vld [vmem:[#allocation12 + $0x4c8] ss:$16 sps:$4 sm:$0xff]   ;;  %v11120_v10 = vld [vmem:[#allocation12 + $0x4e4] ss:$16 sps:$4 sm:$0xff]  }
 0x674   : > { %6140 = vmatpush1.bf16.msra.mxu1 %v11028_v54  ;;  %6355 = vmatpush1.bf16.msra.mxu0 %v11031_v24  ;;  %v11123_v54 = vld [vmem:[#allocation12 + $0x4ec] ss:$16 sps:$4 sm:$0xff]   ;;  %v11118_v24 = vld [vmem:[#allocation12 + $0x4e0] ss:$16 sps:$4 sm:$0xff]  }
 0x675   : > { %6141 = vmatprep.subr.bf16.mxu1 %v11036_v9  ;;  %6356 = vmatprep.subr.bf16.mxu0 %v11039_v36  ;;  %v11121_v9 = vld [vmem:[#allocation12 + $0x4e8] ss:$16 sps:$4 sm:$0xff]   ;;  %v11126_v36 = vld [vmem:[#allocation12 + $0x504] ss:$16 sps:$4 sm:$0xff]  }
 0x678   : > { %6142 = vmatpush1.bf16.msra.mxu1 %v11034_v21  ;;  %6357 = vmatpush1.bf16.msra.mxu0 %v11037_v16  ;;  %v11129_v21 = vld [vmem:[#allocation12 + $0x50c] ss:$16 sps:$4 sm:$0xff]   ;;  %v11124_v16 = vld [vmem:[#allocation12 + $0x500] ss:$16 sps:$4 sm:$0xff]  }
 0x679   : > { %6143 = vmatprep.subr.bf16.mxu1 %v11042_v12  ;;  %6358 = vmatprep.subr.bf16.mxu0 %v11045_v52  ;;  %v11127_v12 = vld [vmem:[#allocation12 + $0x508] ss:$16 sps:$4 sm:$0xff]   ;;  %v11132_v52 = vld [vmem:[#allocation12 + $0x524] ss:$16 sps:$4 sm:$0xff]  }
 0x67c   : > { %6144 = vmatpush1.bf16.msra.mxu1 %v11040_v45  ;;  %6359 = vmatpush1.bf16.msra.mxu0 %v11043_v7  ;;  %v11135_v45 = vld [vmem:[#allocation12 + $0x52c] ss:$16 sps:$4 sm:$0xff]   ;;  %v11130_v7 = vld [vmem:[#allocation12 + $0x520] ss:$16 sps:$4 sm:$0xff]  }
 0x67d   : > { %6145 = vmatprep.subr.bf16.mxu1 %v11048_v58  ;;  %6360 = vmatprep.subr.bf16.mxu0 %v11051_v3  ;;  %v11133_v58 = vld [vmem:[#allocation12 + $0x528] ss:$16 sps:$4 sm:$0xff]   ;;  %v11138_v3 = vld [vmem:[#allocation12 + $0x544] ss:$16 sps:$4 sm:$0xff]  }
 0x680   : > { %6146 = vmatpush1.bf16.msra.mxu1 %v11046_v15  ;;  %6361 = vmatpush1.bf16.msra.mxu0 %v11049_v60  ;;  %v11141_v15 = vld [vmem:[#allocation12 + $0x54c] ss:$16 sps:$4 sm:$0xff]   ;;  %v11136_v60 = vld [vmem:[#allocation12 + $0x540] ss:$16 sps:$4 sm:$0xff]  }
 0x681   : > { %6147 = vmatprep.subr.bf16.mxu1 %v11054_v51  ;;  %6362 = vmatprep.subr.bf16.mxu0 %v11057_v47  ;;  %v11139_v51 = vld [vmem:[#allocation12 + $0x548] ss:$16 sps:$4 sm:$0xff]   ;;  %v11144_v47 = vld [vmem:[#allocation12 + $0x564] ss:$16 sps:$4 sm:$0xff]  }
 0x684   : > { %6148 = vmatpush1.bf16.msra.mxu1 %v11052_v44  ;;  %6363 = vmatpush1.bf16.msra.mxu0 %v11055_v32  ;;  %v11147_v44 = vld [vmem:[#allocation12 + $0x56c] ss:$16 sps:$4 sm:$0xff]   ;;  %v11142_v32 = vld [vmem:[#allocation12 + $0x560] ss:$16 sps:$4 sm:$0xff]  }
 0x685   : > { %6149 = vmatprep.subr.bf16.mxu1 %v11060_v37  ;;  %6364 = vmatprep.subr.bf16.mxu0 %v11063_v29  ;;  %v11145_v37 = vld [vmem:[#allocation12 + $0x568] ss:$16 sps:$4 sm:$0xff]   ;;  %v11150_v29 = vld [vmem:[#allocation12 + $0x584] ss:$16 sps:$4 sm:$0xff]  }
 0x688   : > { %6150 = vmatpush1.bf16.msra.mxu1 %v11058_v62  ;;  %6365 = vmatpush1.bf16.msra.mxu0 %v11061_v2  ;;  %v11153_v62 = vld [vmem:[#allocation12 + $0x58c] ss:$16 sps:$4 sm:$0xff]   ;;  %v11148_v2 = vld [vmem:[#allocation12 + $0x580] ss:$16 sps:$4 sm:$0xff]  }
 0x689   : > { %6151 = vmatprep.subr.bf16.mxu1 %v11066_v56  ;;  %6366 = vmatprep.subr.bf16.mxu0 %v11069_v14  ;;  %v11151_v56 = vld [vmem:[#allocation12 + $0x588] ss:$16 sps:$4 sm:$0xff]   ;;  %v11156_v14 = vld [vmem:[#allocation12 + $0x5a4] ss:$16 sps:$4 sm:$0xff]  }
 0x68c   : > { %6152 = vmatpush1.bf16.msra.mxu1 %v11064_v46  ;;  %6367 = vmatpush1.bf16.msra.mxu0 %v11067_v31  ;;  %v11159_v46 = vld [vmem:[#allocation12 + $0x5ac] ss:$16 sps:$4 sm:$0xff]   ;;  %v11154_v31 = vld [vmem:[#allocation12 + $0x5a0] ss:$16 sps:$4 sm:$0xff]  }
 0x68d   : > { %6153 = vmatprep.subr.bf16.mxu1 %v11072_v22  ;;  %6368 = vmatprep.subr.bf16.mxu0 %v11075_v1  ;;  %v11157_v22 = vld [vmem:[#allocation12 + $0x5a8] ss:$16 sps:$4 sm:$0xff]   ;;  %v11162_v1 = vld [vmem:[#allocation12 + $0x5c4] ss:$16 sps:$4 sm:$0xff]  }
 0x690   : > { %6154 = vmatpush1.bf16.msra.mxu1 %v11070_v8  ;;  %6369 = vmatpush1.bf16.msra.mxu0 %v11073_v18  ;;  %v11165_v8 = vld [vmem:[#allocation12 + $0x5cc] ss:$16 sps:$4 sm:$0xff]   ;;  %v11160_v18 = vld [vmem:[#allocation12 + $0x5c0] ss:$16 sps:$4 sm:$0xff]  }
 0x691   : > { %6166 = vmatprep.subr.bf16.mxu1 %v11078_v42  ;;  %6381 = vmatprep.subr.bf16.mxu0 %v11081_v61  ;;  %v11163_v42 = vld [vmem:[#allocation12 + $0x5c8] ss:$16 sps:$4 sm:$0xff]   ;;  %v11168_v61 = vld [vmem:[#allocation12 + $0x5e4] ss:$16 sps:$4 sm:$0xff]  }
 0x693   : > { %6156 = vmatmul.mubr.bf16.vlgmr.msra.gmra.mrb[104].mxu1 %v13628_v38  ;;  %6371 = vmatmul.mubr.bf16.vlgmr.msra.gmra.mrb[112].mxu0 %v13628_v38  ;;  %v11099_v38 = vld [vmem:[#allocation12 + $0x46c] ss:$16 sps:$4 sm:$0xff]  }
 0x694   : > { %6167 = vmatpush1.bf16.msra.mxu1 %v11076_v4  ;;  %6198 = vmatprep.mubr.bf16.mxu1 %v13634_v35  ;;  %v11171_v4 = vld [vmem:[#allocation12 + $0x5ec] ss:$16 sps:$4 sm:$0xff]  }
 0x695   : > { %6382 = vmatpush1.bf16.msra.mxu0 %v11079_v33  ;;  %6413 = vmatprep.mubr.bf16.mxu0 %v13634_v35  ;;  %v11105_v35 = vld [vmem:[#allocation12 + $0x48c] ss:$16 sps:$4 sm:$0xff]   ;;  %v11166_v33 = vld [vmem:[#allocation12 + $0x5e0] ss:$16 sps:$4 sm:$0xff]  }
 0x696   : > { %6168 = vmatprep.subr.bf16.mxu1 %v11084_v25  ;;  %6383 = vmatprep.subr.bf16.mxu0 %v11087_v26  ;;  %v11169_v25 = vld [vmem:[#allocation12 + $0x5e8] ss:$16 sps:$4 sm:$0xff]   ;;  %v11174_v26 = vld [vmem:[#allocation12 + $0x604] ss:$16 sps:$4 sm:$0xff]  }
 0x698   : > { %6169 = vmatpush1.bf16.msra.mxu1 %v11082_v49  ;;  %v11177_v49 = vld [vmem:[#allocation12 + $0x60c] ss:$16 sps:$4 sm:$0xff]  }
 0x699   : > { %6384 = vmatpush1.bf16.msra.mxu0 %v11085_v39  ;;  %6170 = vmatprep.subr.bf16.mxu1 %v11090_v23  ;;  %v11172_v39 = vld [vmem:[#allocation12 + $0x600] ss:$16 sps:$4 sm:$0xff]   ;;  %v11175_v23 = vld [vmem:[#allocation12 + $0x608] ss:$16 sps:$4 sm:$0xff]  }
 0x69a   : > { %6385 = vmatprep.subr.bf16.mxu0 %v11093_v5  ;;  %v11180_v5 = vld [vmem:[#allocation12 + $0x624] ss:$16 sps:$4 sm:$0xff]  }
 0x69c   : > { %6171 = vmatpush1.bf16.msra.mxu1 %v11088_v20  ;;  %v11183_v20 = vld [vmem:[#allocation12 + $0x62c] ss:$16 sps:$4 sm:$0xff]  }
 0x69d   : > { %6386 = vmatpush1.bf16.msra.mxu0 %v11091_v63  ;;  %6172 = vmatprep.subr.bf16.mxu1 %v11096_v55  ;;  %v11178_v63 = vld [vmem:[#allocation12 + $0x620] ss:$16 sps:$4 sm:$0xff]   ;;  %v11181_v55 = vld [vmem:[#allocation12 + $0x628] ss:$16 sps:$4 sm:$0xff]  }
 0x69e   : > { %6387 = vmatprep.subr.bf16.mxu0 %v11099_v38  ;;  %v11186_v38 = vld [vmem:[#allocation12 + $0x644] ss:$16 sps:$4 sm:$0xff]  }
 0x6a0   : > { %6173 = vmatpush1.bf16.msra.mxu1 %v11094_v19  ;;  %v11189_v19 = vld [vmem:[#allocation12 + $0x64c] ss:$16 sps:$4 sm:$0xff]  }
 0x6a1   : > { %6388 = vmatpush1.bf16.msra.mxu0 %v11097_v0  ;;  %6174 = vmatprep.subr.bf16.mxu1 %v11102_v53  ;;  %v11184_v0 = vld [vmem:[#allocation12 + $0x640] ss:$16 sps:$4 sm:$0xff]   ;;  %v11187_v53 = vld [vmem:[#allocation12 + $0x648] ss:$16 sps:$4 sm:$0xff]  }
 0x6a2   : > { %6389 = vmatprep.subr.bf16.mxu0 %v11105_v35  ;;  %v11192_v35 = vld [vmem:[#allocation12 + $0x664] ss:$16 sps:$4 sm:$0xff]  }
 0x6a4   : > { %6175 = vmatpush1.bf16.msra.mxu1 %v11100_v17  ;;  %v11190_v17 = vld [vmem:[#allocation12 + $0x660] ss:$16 sps:$4 sm:$0xff]  }
 0x6a5   : > { %6390 = vmatpush1.bf16.msra.mxu0 %v11103_v48  ;;  %6176 = vmatprep.subr.bf16.mxu1 %v11108_v34  ;;  %v11193_v48 = vld [vmem:[#allocation12 + $0x668] ss:$16 sps:$4 sm:$0xff]   ;;  %v11198_v34 = vld [vmem:[#allocation12 + $0x684] ss:$16 sps:$4 sm:$0xff]  }
 0x6a6   : > { %6391 = vmatprep.subr.bf16.mxu0 %v11111_v59  ;;  %v11201_v59 = vld [vmem:[#allocation12 + $0x68c] ss:$16 sps:$4 sm:$0xff]  }
 0x6a8   : > { %6177 = vmatpush1.bf16.msra.mxu1 %v11106_v6  ;;  %v11199_v6 = vld [vmem:[#allocation12 + $0x688] ss:$16 sps:$4 sm:$0xff]  }
 0x6a9   : > { %6392 = vmatpush1.bf16.msra.mxu0 %v11109_v57  ;;  %6178 = vmatprep.subr.bf16.mxu1 %v11114_v43  ;;  %v11204_v57 = vld [vmem:[#allocation12 + $0x6a4] ss:$16 sps:$4 sm:$0xff]   ;;  %v11207_v43 = vld [vmem:[#allocation12 + $0x6ac] ss:$16 sps:$4 sm:$0xff]  }
 0x6aa   : > { %6393 = vmatprep.subr.bf16.mxu0 %v11117_v50  ;;  %v11202_v50 = vld [vmem:[#allocation12 + $0x6a0] ss:$16 sps:$4 sm:$0xff]  }
 0x6ac   : > { %6179 = vmatpush1.bf16.msra.mxu1 %v11112_v40  ;;  %v11205_v40 = vld [vmem:[#allocation12 + $0x6a8] ss:$16 sps:$4 sm:$0xff]  }
 0x6ad   : > { %6394 = vmatpush1.bf16.msra.mxu0 %v11115_v11  ;;  %6180 = vmatprep.subr.bf16.mxu1 %v11120_v10  ;;  %v11210_v11 = vld [vmem:[#allocation12 + $0x6c4] ss:$16 sps:$4 sm:$0xff]   ;;  %v11213_v10 = vld [vmem:[#allocation12 + $0x6cc] ss:$16 sps:$4 sm:$0xff]  }
 0x6ae   : > { %6395 = vmatprep.subr.bf16.mxu0 %v11123_v54  ;;  %v11208_v54 = vld [vmem:[#allocation12 + $0x6c0] ss:$16 sps:$4 sm:$0xff]  }
 0x6b0   : > { %6181 = vmatpush1.bf16.msra.mxu1 %v11118_v24  ;;  %v11211_v24 = vld [vmem:[#allocation12 + $0x6c8] ss:$16 sps:$4 sm:$0xff]  }
 0x6b1   : > { %6396 = vmatpush1.bf16.msra.mxu0 %v11121_v9  ;;  %6182 = vmatprep.subr.bf16.mxu1 %v11126_v36  ;;  %v11216_v9 = vld [vmem:[#allocation12 + $0x6e4] ss:$16 sps:$4 sm:$0xff]   ;;  %v11219_v36 = vld [vmem:[#allocation12 + $0x6ec] ss:$16 sps:$4 sm:$0xff]  }
 0x6b2   : > { %6397 = vmatprep.subr.bf16.mxu0 %v11129_v21  ;;  %v11214_v21 = vld [vmem:[#allocation12 + $0x6e0] ss:$16 sps:$4 sm:$0xff]  }
 0x6b4   : > { %6183 = vmatpush1.bf16.msra.mxu1 %v11124_v16  ;;  %v11217_v16 = vld [vmem:[#allocation12 + $0x6e8] ss:$16 sps:$4 sm:$0xff]  }
 0x6b5   : > { %6398 = vmatpush1.bf16.msra.mxu0 %v11127_v12  ;;  %6184 = vmatprep.subr.bf16.mxu1 %v11132_v52  ;;  %v11222_v12 = vld [vmem:[#allocation12 + $0x704] ss:$16 sps:$4 sm:$0xff]   ;;  %v11225_v52 = vld [vmem:[#allocation12 + $0x70c] ss:$16 sps:$4 sm:$0xff]  }
 0x6b6   : > { %6399 = vmatprep.subr.bf16.mxu0 %v11135_v45  ;;  %v11220_v45 = vld [vmem:[#allocation12 + $0x700] ss:$16 sps:$4 sm:$0xff]  }
 0x6b8   : > { %6185 = vmatpush1.bf16.msra.mxu1 %v11130_v7  ;;  %v11223_v7 = vld [vmem:[#allocation12 + $0x708] ss:$16 sps:$4 sm:$0xff]  }
 0x6b9   : > { %6400 = vmatpush1.bf16.msra.mxu0 %v11133_v58  ;;  %6186 = vmatprep.subr.bf16.mxu1 %v11138_v3  ;;  %v11228_v58 = vld [vmem:[#allocation12 + $0x724] ss:$16 sps:$4 sm:$0xff]   ;;  %v11231_v3 = vld [vmem:[#allocation12 + $0x72c] ss:$16 sps:$4 sm:$0xff]  }
 0x6ba   : > { %6401 = vmatprep.subr.bf16.mxu0 %v11141_v15  ;;  %v11226_v15 = vld [vmem:[#allocation12 + $0x720] ss:$16 sps:$4 sm:$0xff]  }
 0x6bc   : > { %6187 = vmatpush1.bf16.msra.mxu1 %v11136_v60  ;;  %v11229_v60 = vld [vmem:[#allocation12 + $0x728] ss:$16 sps:$4 sm:$0xff]  }
 0x6bd   : > { %6402 = vmatpush1.bf16.msra.mxu0 %v11139_v51  ;;  %6188 = vmatprep.subr.bf16.mxu1 %v11144_v47  ;;  %v11234_v51 = vld [vmem:[#allocation12 + $0x744] ss:$16 sps:$4 sm:$0xff]   ;;  %v11237_v47 = vld [vmem:[#allocation12 + $0x74c] ss:$16 sps:$4 sm:$0xff]  }
 0x6be   : > { %6403 = vmatprep.subr.bf16.mxu0 %v11147_v44  ;;  %v11232_v44 = vld [vmem:[#allocation12 + $0x740] ss:$16 sps:$4 sm:$0xff]  }
 0x6c0   : > { %6189 = vmatpush1.bf16.msra.mxu1 %v11142_v32  ;;  %v11235_v32 = vld [vmem:[#allocation12 + $0x748] ss:$16 sps:$4 sm:$0xff]  }
 0x6c1   : > { %6404 = vmatpush1.bf16.msra.mxu0 %v11145_v37  ;;  %6190 = vmatprep.subr.bf16.mxu1 %v11150_v29  ;;  %v11240_v37 = vld [vmem:[#allocation12 + $0x764] ss:$16 sps:$4 sm:$0xff]   ;;  %v11243_v29 = vld [vmem:[#allocation12 + $0x76c] ss:$16 sps:$4 sm:$0xff]  }
 0x6c2   : > { %6405 = vmatprep.subr.bf16.mxu0 %v11153_v62  ;;  %v11238_v62 = vld [vmem:[#allocation12 + $0x760] ss:$16 sps:$4 sm:$0xff]  }
 0x6c4   : > { %6191 = vmatpush1.bf16.msra.mxu1 %v11148_v2  ;;  %v11241_v2 = vld [vmem:[#allocation12 + $0x768] ss:$16 sps:$4 sm:$0xff]  }
 0x6c5   : > { %6406 = vmatpush1.bf16.msra.mxu0 %v11151_v56  ;;  %6192 = vmatprep.subr.bf16.mxu1 %v11156_v14  ;;  %v11246_v56 = vld [vmem:[#allocation12 + $0x784] ss:$16 sps:$4 sm:$0xff]   ;;  %v11249_v14 = vld [vmem:[#allocation12 + $0x78c] ss:$16 sps:$4 sm:$0xff]  }
 0x6c6   : > { %6407 = vmatprep.subr.bf16.mxu0 %v11159_v46  ;;  %v11244_v46 = vld [vmem:[#allocation12 + $0x780] ss:$16 sps:$4 sm:$0xff]  }
 0x6c8   : > { %6193 = vmatpush1.bf16.msra.mxu1 %v11154_v31  ;;  %v11247_v31 = vld [vmem:[#allocation12 + $0x788] ss:$16 sps:$4 sm:$0xff]  }
 0x6c9   : > { %6408 = vmatpush1.bf16.msra.mxu0 %v11157_v22  ;;  %6194 = vmatprep.subr.bf16.mxu1 %v11162_v1  ;;  %v11252_v22 = vld [vmem:[#allocation12 + $0x7a4] ss:$16 sps:$4 sm:$0xff]   ;;  %v11255_v1 = vld [vmem:[#allocation12 + $0x7ac] ss:$16 sps:$4 sm:$0xff]  }
 0x6ca   : > { %6409 = vmatprep.subr.bf16.mxu0 %v11165_v8  ;;  %v11250_v8 = vld [vmem:[#allocation12 + $0x7a0] ss:$16 sps:$4 sm:$0xff]  }
 0x6cc   : > { %6195 = vmatpush1.bf16.msra.mxu1 %v11160_v18  ;;  %v11253_v18 = vld [vmem:[#allocation12 + $0x7a8] ss:$16 sps:$4 sm:$0xff]  }
 0x6cd   : > { %6410 = vmatpush1.bf16.msra.mxu0 %v11163_v42  ;;  %6196 = vmatprep.subr.bf16.mxu1 %v11168_v61  ;;  %v11258_v42 = vld [vmem:[#allocation12 + $0x7c4] ss:$16 sps:$4 sm:$0xff]   ;;  %v11261_v61 = vld [vmem:[#allocation12 + $0x7cc] ss:$16 sps:$4 sm:$0xff]  }
 0x6ce   : > { %6411 = vmatprep.subr.bf16.mxu0 %v11171_v4  ;;  %v11256_v4 = vld [vmem:[#allocation12 + $0x7c0] ss:$16 sps:$4 sm:$0xff]  }
 0x6d0   : > { %6197 = vmatpush1.bf16.msra.mxu1 %v11166_v33  ;;  %v11259_v33 = vld [vmem:[#allocation12 + $0x7c8] ss:$16 sps:$4 sm:$0xff]  }
 0x6d1   : > { %6412 = vmatpush1.bf16.msra.mxu0 %v11169_v25  ;;  %6209 = vmatprep.subr.bf16.mxu1 %v11174_v26  ;;  %v11264_v25 = vld [vmem:[#allocation12 + $0x7e4] ss:$16 sps:$4 sm:$0xff]   ;;  %v11267_v26 = vld [vmem:[#allocation12 + $0x7ec] ss:$16 sps:$4 sm:$0xff]  }
 0x6d2   : > { %6424 = vmatprep.subr.bf16.mxu0 %v11177_v49  ;;  %v11262_v49 = vld [vmem:[#allocation12 + $0x7e0] ss:$16 sps:$4 sm:$0xff]  }
 0x6d3   : > { %6199 = vmatmul.mubr.bf16.vlgmr.msra.gmra.mrb[104].mxu1 %v13608_v27 }
 0x6d4   : > { %6414 = vmatmul.mubr.bf16.vlgmr.msra.gmra.mrb[112].mxu0 %v13608_v27  ;;  %6210 = vmatpush1.bf16.msra.mxu1 %v11172_v39  ;;  %v11195_v27 = vld [vmem:[#allocation12 + $0x66c] ss:$16 sps:$4 sm:$0xff]   ;;  %v11265_v39 = vld [vmem:[#allocation12 + $0x7e8] ss:$16 sps:$4 sm:$0xff]  }
 0x6d5   : > { %6241 = vmatprep.mubr.bf16.mxu1 %v13632_v30  ;;  %6425 = vmatpush1.bf16.msra.mxu0 %v11175_v23  ;;  %v11270_v23 = vld [vmem:[#allocation12 + $0x804] ss:$16 sps:$4 sm:$0xff]  }
 0x6d6   : > { %6456 = vmatprep.mubr.bf16.mxu0 %v13632_v30  ;;  %6211 = vmatprep.subr.bf16.mxu1 %v11180_v5  ;;  %v11196_v30 = vld [vmem:[#allocation12 + $0x680] ss:$16 sps:$4 sm:$0xff]   ;;  %v11273_v5 = vld [vmem:[#allocation12 + $0x80c] ss:$16 sps:$4 sm:$0xff]  }
 0x6d7   : > { %6426 = vmatprep.subr.bf16.mxu0 %v11183_v20  ;;  %v11268_v20 = vld [vmem:[#allocation12 + $0x800] ss:$16 sps:$4 sm:$0xff]  }
 0x6d8   : > { %6212 = vmatpush1.bf16.msra.mxu1 %v11178_v63  ;;  %v11271_v63 = vld [vmem:[#allocation12 + $0x808] ss:$16 sps:$4 sm:$0xff]  }
 0x6d9   : > { %6427 = vmatpush1.bf16.msra.mxu0 %v11181_v55  ;;  %6213 = vmatprep.subr.bf16.mxu1 %v11186_v38  ;;  %v11276_v55 = vld [vmem:[#allocation12 + $0x824] ss:$16 sps:$4 sm:$0xff]   ;;  %v11279_v38 = vld [vmem:[#allocation12 + $0x82c] ss:$16 sps:$4 sm:$0xff]  }
 0x6da   : > { %6428 = vmatprep.subr.bf16.mxu0 %v11189_v19  ;;  %v11274_v19 = vld [vmem:[#allocation12 + $0x820] ss:$16 sps:$4 sm:$0xff]  }
 0x6dc   : > { %6214 = vmatpush1.bf16.msra.mxu1 %v11184_v0  ;;  %v11277_v0 = vld [vmem:[#allocation12 + $0x828] ss:$16 sps:$4 sm:$0xff]  }
 0x6dd   : > { %6429 = vmatpush1.bf16.msra.mxu0 %v11187_v53  ;;  %6215 = vmatprep.subr.bf16.mxu1 %v11192_v35  ;;  %v11282_v53 = vld [vmem:[#allocation12 + $0x844] ss:$16 sps:$4 sm:$0xff]   ;;  %v11285_v35 = vld [vmem:[#allocation12 + $0x84c] ss:$16 sps:$4 sm:$0xff]  }
 0x6de   : > { %6430 = vmatprep.subr.bf16.mxu0 %v11195_v27  ;;  %v12215_v27 = vmov 0  }
 0x6e0   : > { %6216 = vmatpush1.bf16.msra.mxu1 %v11190_v17  ;;  %v11280_v17 = vld [vmem:[#allocation12 + $0x840] ss:$16 sps:$4 sm:$0xff]  }
 0x6e1   : > { %6431 = vmatpush1.bf16.msra.mxu0 %v11193_v48  ;;  %6217 = vmatprep.subr.bf16.mxu1 %v11198_v34  ;;  %v11283_v48 = vld [vmem:[#allocation12 + $0x848] ss:$16 sps:$4 sm:$0xff]   ;;  %v11288_v34 = vld [vmem:[#allocation12 + $0x864] ss:$16 sps:$4 sm:$0xff]  }
 0x6e2   : > { %6432 = vmatprep.subr.bf16.mxu0 %v11201_v59  ;;  %v11286_v59 = vld [vmem:[#allocation12 + $0x860] ss:$16 sps:$4 sm:$0xff]  }
 0x6e4   : > { %6218 = vmatpush1.bf16.msra.mxu1 %v11196_v30  ;;  %v11289_v30 = vld [vmem:[#allocation12 + $0x868] ss:$16 sps:$4 sm:$0xff]  }
 0x6e5   : > { %6433 = vmatpush1.bf16.msra.mxu0 %v11199_v6  ;;  %6219 = vmatprep.subr.bf16.mxu1 %v11204_v57  ;;  %v11294_v6 = vld [vmem:[#allocation12 + $0x884] ss:$16 sps:$4 sm:$0xff]   ;;  %v11297_v57 = vld [vmem:[#allocation12 + $0x88c] ss:$16 sps:$4 sm:$0xff]  }
 0x6e6   : > { %6434 = vmatprep.subr.bf16.mxu0 %v11207_v43  ;;  %v11292_v43 = vld [vmem:[#allocation12 + $0x880] ss:$16 sps:$4 sm:$0xff]  }
 0x6e8   : > { %6220 = vmatpush1.bf16.msra.mxu1 %v11202_v50  ;;  %v11295_v50 = vld [vmem:[#allocation12 + $0x888] ss:$16 sps:$4 sm:$0xff]  }
 0x6e9   : > { %6435 = vmatpush1.bf16.msra.mxu0 %v11205_v40  ;;  %6221 = vmatprep.subr.bf16.mxu1 %v11210_v11  ;;  %v11300_v40 = vld [vmem:[#allocation12 + $0x8a4] ss:$16 sps:$4 sm:$0xff]   ;;  %v11303_v11 = vld [vmem:[#allocation12 + $0x8ac] ss:$16 sps:$4 sm:$0xff]  }
 0x6ea   : > { %6436 = vmatprep.subr.bf16.mxu0 %v11213_v10  ;;  %v11298_v10 = vld [vmem:[#allocation12 + $0x8a0] ss:$16 sps:$4 sm:$0xff]  }
 0x6ec   : > { %6222 = vmatpush1.bf16.msra.mxu1 %v11208_v54  ;;  %v11301_v54 = vld [vmem:[#allocation12 + $0x8a8] ss:$16 sps:$4 sm:$0xff]  }
 0x6ed   : > { %6437 = vmatpush1.bf16.msra.mxu0 %v11211_v24  ;;  %6223 = vmatprep.subr.bf16.mxu1 %v11216_v9  ;;  %v11306_v24 = vld [vmem:[#allocation12 + $0x8c4] ss:$16 sps:$4 sm:$0xff]   ;;  %v11309_v9 = vld [vmem:[#allocation12 + $0x8cc] ss:$16 sps:$4 sm:$0xff]  }
 0x6ee   : > { %6438 = vmatprep.subr.bf16.mxu0 %v11219_v36  ;;  %v11304_v36 = vld [vmem:[#allocation12 + $0x8c0] ss:$16 sps:$4 sm:$0xff]  }
 0x6f0   : > { %6224 = vmatpush1.bf16.msra.mxu1 %v11214_v21  ;;  %v11307_v21 = vld [vmem:[#allocation12 + $0x8c8] ss:$16 sps:$4 sm:$0xff]  }
 0x6f1   : > { %6439 = vmatpush1.bf16.msra.mxu0 %v11217_v16  ;;  %6225 = vmatprep.subr.bf16.mxu1 %v11222_v12  ;;  %v11312_v16 = vld [vmem:[#allocation12 + $0x8e4] ss:$16 sps:$4 sm:$0xff]   ;;  %v11315_v12 = vld [vmem:[#allocation12 + $0x8ec] ss:$16 sps:$4 sm:$0xff]  }
 0x6f2   : > { %6440 = vmatprep.subr.bf16.mxu0 %v11225_v52  ;;  %v11310_v52 = vld [vmem:[#allocation12 + $0x8e0] ss:$16 sps:$4 sm:$0xff]  }
 0x6f4   : > { %6226 = vmatpush1.bf16.msra.mxu1 %v11220_v45  ;;  %v11313_v45 = vld [vmem:[#allocation12 + $0x8e8] ss:$16 sps:$4 sm:$0xff]  }
 0x6f5   : > { %6441 = vmatpush1.bf16.msra.mxu0 %v11223_v7  ;;  %6227 = vmatprep.subr.bf16.mxu1 %v11228_v58  ;;  %v11316_v7 = vld [vmem:[#allocation16] ss:$16 sps:$4 sm:$0xff]   ;;  %v11318_v58 = vld [vmem:[#allocation16 + $0x4] ss:$16 sps:$4 sm:$0xff]  }
 0x6f6   : > { %6442 = vmatprep.subr.bf16.mxu0 %v11231_v3  ;;  %v11324_v3 = vld [vmem:[#allocation16 + $0x24] ss:$16 sps:$4 sm:$0xff]  }
 0x6f8   : > { %6228 = vmatpush1.bf16.msra.mxu1 %v11226_v15  ;;  %v11322_v15 = vld [vmem:[#allocation16 + $0x20] ss:$16 sps:$4 sm:$0xff]  }
 0x6f9   : > { %6443 = vmatpush1.bf16.msra.mxu0 %v11229_v60  ;;  %6229 = vmatprep.subr.bf16.mxu1 %v11234_v51  ;;  %v11330_v60 = vld [vmem:[#allocation16 + $0x44] ss:$16 sps:$4 sm:$0xff]   ;;  %v11328_v51 = vld [vmem:[#allocation16 + $0x40] ss:$16 sps:$4 sm:$0xff]  }
 0x6fa   : > { %6444 = vmatprep.subr.bf16.mxu0 %v11237_v47  ;;  %v11336_v47 = vld [vmem:[#allocation16 + $0x64] ss:$16 sps:$4 sm:$0xff]  }
 0x6fc   : > { %6230 = vmatpush1.bf16.msra.mxu1 %v11232_v44  ;;  %v11334_v44 = vld [vmem:[#allocation16 + $0x60] ss:$16 sps:$4 sm:$0xff]  }
 0x6fd   : > { %6445 = vmatpush1.bf16.msra.mxu0 %v11235_v32  ;;  %6231 = vmatprep.subr.bf16.mxu1 %v11240_v37  ;;  %v11342_v32 = vld [vmem:[#allocation16 + $0x84] ss:$16 sps:$4 sm:$0xff]  }
 0x6fe   : > { %6446 = vmatprep.subr.bf16.mxu0 %v11243_v29  ;;  %v11348_v37 = vld [vmem:[#allocation16 + $0xa4] ss:$16 sps:$4 sm:$0xff]   ;;  %v11346_v29 = vld [vmem:[#allocation16 + $0xa0] ss:$16 sps:$4 sm:$0xff]  }
 0x700   : > { %6232 = vmatpush1.bf16.msra.mxu1 %v11238_v62  ;;  %v11354_v62 = vld [vmem:[#allocation16 + $0xc4] ss:$16 sps:$4 sm:$0xff]  }
 0x701   : > { %6447 = vmatpush1.bf16.msra.mxu0 %v11241_v2  ;;  %6233 = vmatprep.subr.bf16.mxu1 %v11246_v56  ;;  %v11352_v2 = vld [vmem:[#allocation16 + $0xc0] ss:$16 sps:$4 sm:$0xff]   ;;  %v11360_v56 = vld [vmem:[#allocation16 + $0xe4] ss:$16 sps:$4 sm:$0xff]  }
 0x702   : > { %6448 = vmatprep.subr.bf16.mxu0 %v11249_v14  ;;  %v11358_v14 = vld [vmem:[#allocation16 + $0xe0] ss:$16 sps:$4 sm:$0xff]  }
 0x704   : > { %6234 = vmatpush1.bf16.msra.mxu1 %v11244_v46  ;;  %v11366_v46 = vld [vmem:[#allocation16 + $0x104] ss:$16 sps:$4 sm:$0xff]  }
 0x705   : > { %6449 = vmatpush1.bf16.msra.mxu0 %v11247_v31  ;;  %6235 = vmatprep.subr.bf16.mxu1 %v11252_v22  ;;  %v11364_v31 = vld [vmem:[#allocation16 + $0x100] ss:$16 sps:$4 sm:$0xff]   ;;  %v11372_v22 = vld [vmem:[#allocation16 + $0x124] ss:$16 sps:$4 sm:$0xff]  }
 0x706   : > { %6450 = vmatprep.subr.bf16.mxu0 %v11255_v1  ;;  %v11370_v1 = vld [vmem:[#allocation16 + $0x120] ss:$16 sps:$4 sm:$0xff]  }
 0x708   : > { %6236 = vmatpush1.bf16.msra.mxu1 %v11250_v8  ;;  %v11378_v8 = vld [vmem:[#allocation16 + $0x144] ss:$16 sps:$4 sm:$0xff]  }
 0x709   : > { %6451 = vmatpush1.bf16.msra.mxu0 %v11253_v18  ;;  %6237 = vmatprep.subr.bf16.mxu1 %v11258_v42  ;;  %v11376_v18 = vld [vmem:[#allocation16 + $0x140] ss:$16 sps:$4 sm:$0xff]   ;;  %v11384_v42 = vld [vmem:[#allocation16 + $0x164] ss:$16 sps:$4 sm:$0xff]  }
 0x70a   : > { %6452 = vmatprep.subr.bf16.mxu0 %v11261_v61  ;;  %v11382_v61 = vld [vmem:[#allocation16 + $0x160] ss:$16 sps:$4 sm:$0xff]  }
 0x70c   : > { %6238 = vmatpush1.bf16.msra.mxu1 %v11256_v4  ;;  %v11390_v4 = vld [vmem:[#allocation16 + $0x184] ss:$16 sps:$4 sm:$0xff]  }
 0x70d   : > { %6453 = vmatpush1.bf16.msra.mxu0 %v11259_v33  ;;  %6239 = vmatprep.subr.bf16.mxu1 %v11264_v25  ;;  %v11388_v33 = vld [vmem:[#allocation16 + $0x180] ss:$16 sps:$4 sm:$0xff]   ;;  %v11396_v25 = vld [vmem:[#allocation16 + $0x1a4] ss:$16 sps:$4 sm:$0xff]  }
 0x70e   : > { %6454 = vmatprep.subr.bf16.mxu0 %v11267_v26  ;;  %v11394_v26 = vld [vmem:[#allocation16 + $0x1a0] ss:$16 sps:$4 sm:$0xff]  }
 0x710   : > { %6240 = vmatpush1.bf16.msra.mxu1 %v11262_v49  ;;  %v11402_v49 = vld [vmem:[#allocation16 + $0x1c4] ss:$16 sps:$4 sm:$0xff]  }
 0x711   : > { %6455 = vmatpush1.bf16.msra.mxu0 %v11265_v39  ;;  %6252 = vmatprep.subr.bf16.mxu1 %v11270_v23  ;;  %v11400_v39 = vld [vmem:[#allocation16 + $0x1c0] ss:$16 sps:$4 sm:$0xff]   ;;  %v13656_v23 = vsub.s32 0, %v13601_v41 }
 0x712   : > { %6467 = vmatprep.subr.bf16.mxu0 %v11273_v5  ;;  %v4618_v5 = vld [vmem:[#allocation13] sm:$0xf] }
 0x713   : > { %6242 = vmatmul.mubr.bf16.vlgmr.msra.gmra.mrb[104].mxu1 %v13636_v13 }
 0x714   : > { %6457 = vmatmul.mubr.bf16.vlgmr.msra.gmra.mrb[112].mxu0 %v13636_v13  ;;  %6253 = vmatpush1.bf16.msra.mxu1 %v11268_v20  ;;  %v11291_v13 = vld [vmem:[#allocation12 + $0x86c] ss:$16 sps:$4 sm:$0xff]   ;;  %v13659_v20 = vsub.s32 2, %v13601_v41 }
 0x715   : > { %6468 = vmatpush1.bf16.msra.mxu0 %v11271_v63  ;;  %6254 = vmatprep.subr.bf16.mxu1 %v11276_v55  ;;  %v13662_v63 = vsub.s32 1, %v13601_v41  ;;  %v13665_v55 = vsub.s32 3, %v13601_v41  ;;  %v11325_v41 = vld [vmem:[#allocation16 + $0x28] ss:$16 sps:$4 sm:$0xff]  }
 0x716   : > { %6469 = vmatprep.subr.bf16.mxu0 %v11279_v38  ;;  %6284 = vmatprep.mubr.bf16.mxu1 %v12215_v27  ;;  %v4623_v38 = vrot.slane %v4618_v5, %v13656_v23 }
 0x717   : > { %6499 = vmatprep.mubr.bf16.mxu0 %v12215_v27 }
 0x718   : > { %6255 = vmatpush1.bf16.msra.mxu1 %v11274_v19  ;;  %v4631_v19 = vrot.slane %v4618_v5, %v13659_v20 }
 0x719   : > { %6470 = vmatpush1.bf16.msra.mxu0 %v11277_v0  ;;  %6256 = vmatprep.subr.bf16.mxu1 %v11282_v53  ;;  %v4627_v0 = vrot.slane %v4618_v5, %v13662_v63  ;;  %v4635_v53 = vrot.slane %v4618_v5, %v13665_v55 }
 0x71a   : > { %6471 = vmatprep.subr.bf16.mxu0 %v11285_v35 }
 0x71c   : > { %6257 = vmatpush1.bf16.msra.mxu1 %v11280_v17 }
 0x71d   : > { %6472 = vmatpush1.bf16.msra.mxu0 %v11283_v48  ;;  %6258 = vmatprep.subr.bf16.mxu1 %v11288_v34 }
 0x71e   : > { %6473 = vmatprep.subr.bf16.mxu0 %v11291_v13 }
 0x720   : > { %6259 = vmatpush1.bf16.msra.mxu1 %v11286_v59 }
 0x721   : > { %6474 = vmatpush1.bf16.msra.mxu0 %v11289_v30  ;;  %6260 = vmatprep.subr.bf16.mxu1 %v11294_v6 }
 0x722   : > { %6475 = vmatprep.subr.bf16.mxu0 %v11297_v57 }
 0x724   : > { %6261 = vmatpush1.bf16.msra.mxu1 %v11292_v43 }
 0x725   : > { %6476 = vmatpush1.bf16.msra.mxu0 %v11295_v50  ;;  %6262 = vmatprep.subr.bf16.mxu1 %v11300_v40 }
 0x726   : > { %6477 = vmatprep.subr.bf16.mxu0 %v11303_v11 }
 0x728   : > { %6263 = vmatpush1.bf16.msra.mxu1 %v11298_v10 }
 0x729   : > { %6478 = vmatpush1.bf16.msra.mxu0 %v11301_v54  ;;  %6264 = vmatprep.subr.bf16.mxu1 %v11306_v24 }
 0x72a   : > { %6479 = vmatprep.subr.bf16.mxu0 %v11309_v9 }
 0x72c   : > { %6265 = vmatpush1.bf16.msra.mxu1 %v11304_v36 }
 0x72d   : > { %6480 = vmatpush1.bf16.msra.mxu0 %v11307_v21  ;;  %6266 = vmatprep.subr.bf16.mxu1 %v11312_v16 }
 0x72e   : > { %6481 = vmatprep.subr.bf16.mxu0 %v11315_v12 }
 0x730   : > { %6267 = vmatpush1.bf16.msra.mxu1 %v11310_v52 }
 0x731   : > { %6482 = vmatpush1.bf16.msra.mxu0 %v11313_v45 }
 0x732   : > { %7475 = vmatprep.subr.bf16.mxu0 %v11318_v58 }
 0x733   : > { %6285 = vmatmul.mubr.bf16.vlgmr.msra.gmra.mrb[104].mxu1 %v13638_v28 }
 0x734   : > { %6500 = vmatmul.mubr.bf16.vlgmr.msra.gmra.mrb[112].mxu0 %v13638_v28  ;;  %6631 = vmatprep.mubr.bf16.mxu1 %v12215_v27  ;;  %v11340_v28 = vld [vmem:[#allocation16 + $0x80] ss:$16 sps:$4 sm:$0xff]  }
 0x735   : > { %7476 = vmatpush1.bf16.msra.mxu0 %v11316_v7 }
 0x736   : > { %7477 = vmatprep.subr.bf16.mxu0 %v11324_v3 }
 0x739   : > { %7478 = vmatpush1.bf16.msra.mxu0 %v11322_v15 }
 0x73a   : > { %7479 = vmatprep.subr.bf16.mxu0 %v11330_v60 }
 0x73d   : > { %7480 = vmatpush1.bf16.msra.mxu0 %v11328_v51 }
 0x73e   : > { %7481 = vmatprep.subr.bf16.mxu0 %v11336_v47 }
 0x741   : > { %7482 = vmatpush1.bf16.msra.mxu0 %v11334_v44 }
 0x742   : > { %7483 = vmatprep.subr.bf16.mxu0 %v11342_v32 }
 0x745   : > { %7484 = vmatpush1.bf16.msra.mxu0 %v11340_v28 }
 0x746   : > { %7485 = vmatprep.subr.bf16.mxu0 %v11348_v37 }
 0x749   : > { %7486 = vmatpush1.bf16.msra.mxu0 %v11346_v29 }
 0x74a   : > { %7487 = vmatprep.subr.bf16.mxu0 %v11354_v62 }
 0x74d   : > { %7488 = vmatpush1.bf16.msra.mxu0 %v11352_v2 }
 0x74e   : > { %7489 = vmatprep.subr.bf16.mxu0 %v11360_v56 }
 0x751   : > { %7490 = vmatpush1.bf16.msra.mxu0 %v11358_v14 }
 0x752   : > { %7491 = vmatprep.subr.bf16.mxu0 %v11366_v46 }
 0x755   : > { %7492 = vmatpush1.bf16.msra.mxu0 %v11364_v31 }
 0x756   : > { %7493 = vmatprep.subr.bf16.mxu0 %v11372_v22 }
 0x759   : > { %7494 = vmatpush1.bf16.msra.mxu0 %v11370_v1 }
 0x75a   : > { %7495 = vmatprep.subr.bf16.mxu0 %v11378_v8 }
 0x75d   : > { %7496 = vmatpush1.bf16.msra.mxu0 %v11376_v18 }
 0x75e   : > { %7497 = vmatprep.subr.bf16.mxu0 %v11384_v42 }
 0x761   : > { %7498 = vmatpush1.bf16.msra.mxu0 %v11382_v61 }
 0x762   : > { %7499 = vmatprep.subr.bf16.mxu0 %v11390_v4 }
 0x765   : > { %7500 = vmatpush1.bf16.msra.mxu0 %v11388_v33 }
 0x766   : > { %7501 = vmatprep.subr.bf16.mxu0 %v11396_v25 }
 0x769   : > { %7502 = vmatpush1.bf16.msra.mxu0 %v11394_v26 }
 0x76a   : > { %7503 = vmatprep.subr.bf16.mxu0 %v11402_v49 }
 0x76d   : > { %7504 = vmatpush1.bf16.msra.mxu0 %v11400_v39 }
 0x806   : > { %v6286_v35 = vpop.f32.mrb[104].mxu1 }
 0x807   : > { %v10494_v17 = vadd.f32 %v6286_v35, %v4623_v38  ;;  %v6501_v48 = vpop.f32.mrb[112].mxu0  ;;  %v6288_v34 = vpop.f32.mrb[105].mxu1 }
 0x808   : > { %v10498_v13 = vadd.f32 %v6501_v48, %v4631_v19  ;;  %v10495_v59 = vadd.f32 %v6288_v34, %v4627_v0  ;;  %v6503_v30 = vpop.f32.mrb[113].mxu0  ;;  %v6290_v6 = vpop.f32.mrb[106].mxu1 }
 0x809   : > { %v13671_v57 = vmax.f32 %v10494_v17, 0.0  ;;  %v10499_v43 = vadd.f32 %v6503_v30, %v4635_v53  ;;  %v10496_v50 = vadd.f32 %v6290_v6, %v4623_v38  ;;  %v6505_v40 = vpop.f32.mrb[114].mxu0  ;;  %v6292_v11 = vpop.f32.mrb[107].mxu1 }
 0x80a   : > { %v13673_v10 = vmax.f32 %v10498_v13, 0.0  ;;  %v6511_v54 = vmax.f32 %v10495_v59, 0.0  ;;  %v10500_v24 = vadd.f32 %v6505_v40, %v4631_v19  ;;  %v10497_v9 = vadd.f32 %v6292_v11, %v4627_v0  ;;  %v6507_v36 = vpop.f32.mrb[115].mxu0 }
 0x80b   : > { %v13675_v21 = vmax.f32 %v10499_v43, 0.0  ;;  %v6518_v16 = vrot.slane %v13671_v57, 1  ;;  %v6542_v12 = vrot.slane %v13671_v57, 4  ;;  %v6566_v52 = vrot.slane %v13671_v57, 5 }
 0x80c   : > { %v6520_v45 = vrot.slane %v13673_v10, 1  ;;  %v6544_v7 = vrot.slane %v13673_v10, 4  ;;  %v6568_v58 = vrot.slane %v13673_v10, 5  ;;  %v6519_v3 = vrot.slane %v6511_v54, 1 }
 0x80d   : > { %v6543_v15 = vrot.slane %v6511_v54, 4  ;;  %v6567_v60 = vrot.slane %v6511_v54, 5  ;;  %v6514_v51 = vmax.f32 %v10496_v50, 0.0  ;;  %v13683_v47 = vmax.f32 %v10500_v24, 0.0 }
 0x80e   : > { %v6515_v44 = vmax.f32 %v10497_v9, 0.0  ;;  %v6521_v32 = vrot.slane %v13675_v21, 1  ;;  %v6545_v28 = vrot.slane %v13675_v21, 4  ;;  %v6569_v37 = vrot.slane %v13675_v21, 5 }
 0x80f   : > { %v10501_v29 = vadd.f32 %v6507_v36, %v4635_v53  ;;  %v6522_v62 = vrot.slane %v6514_v51, 1  ;;  %v6546_v2 = vrot.slane %v6514_v51, 4  ;;  %v6570_v56 = vrot.slane %v6514_v51, 5 }
 0x810   : > { %v6524_v14 = vrot.slane %v13683_v47, 1  ;;  %v6548_v46 = vrot.slane %v13683_v47, 4  ;;  %v6572_v31 = vrot.slane %v13683_v47, 5  ;;  %v6523_v22 = vrot.slane %v6515_v44, 1 }
 0x811   : > { %v6547_v1 = vrot.slane %v6515_v44, 4  ;;  %v6526_v8 = vsel %vm4318_vm0, %v6518_v16, %v6522_v62  ;;  %v6530_v18 = vsel %vm4318_vm0, %v6522_v62, %v6518_v16  ;;  %v6554_v42 = vsel %vm4303_vm12, %v6546_v2, %v6542_v12 }
 0x812   : > { %v6528_v61 = vsel %vm4318_vm0, %v6520_v45, %v6524_v14  ;;  %v6538_v4 = vmax.f32 %v6514_v51, %v6530_v18  ;;  %v6532_v33 = vsel %vm4318_vm0, %v6524_v14, %v6520_v45  ;;  %v6556_v25 = vsel %vm4303_vm12, %v6548_v46, %v6544_v7  ;;  %v6590_v18 = vld [vmem:[#allocation15] sm:$0xf] }
 0x813   : > { %v6531_v26 = vsel %vm4318_vm0, %v6523_v22, %v6519_v3  ;;  %v6540_v49 = vmax.f32 %v13683_v47, %v6532_v33  ;;  %v6571_v5 = vrot.slane %v6515_v44, 5  ;;  %v6517_v38 = vmax.f32 %v10501_v29, 0.0  ;;  %v11339_v33 = vld [vmem:[#allocation16 + $0x6c] ss:$16 sps:$4 sm:$0xff]  }
 0x814   : > { %v6539_v39 = vmax.f32 %v6515_v44, %v6531_v26  ;;  %v6562_v19 = vmax.f32 %v6538_v4, %v6554_v42  ;;  %v6527_v0 = vsel %vm4318_vm0, %v6519_v3, %v6523_v22  ;;  %v6551_v53 = vsel %vm4303_vm12, %v6543_v15, %v6547_v1  ;;  %v11321_v42 = vld [vmem:[#allocation16 + $0xc] ss:$16 sps:$4 sm:$0xff]  }
 0x815   : > { %v6555_v35 = vsel %vm4303_vm12, %v6547_v1, %v6543_v15  ;;  %v6564_v17 = vmax.f32 %v6540_v49, %v6556_v25  ;;  %v6525_v48 = vrot.slane %v6517_v38, 1  ;;  %v6549_v34 = vrot.slane %v6517_v38, 4  ;;  %v11327_v4 = vld [vmem:[#allocation16 + $0x2c] ss:$16 sps:$4 sm:$0xff]   ;;  %v11337_v25 = vld [vmem:[#allocation16 + $0x68] ss:$16 sps:$4 sm:$0xff]  }
 0x816   : > { %v6573_v13 = vrot.slane %v6517_v38, 5  ;;  %v6535_v59 = vmax.f32 %v6511_v54, %v6527_v0  ;;  %v6563_v30 = vmax.f32 %v6539_v39, %v6555_v35  ;;  %v6575_v6 = vsel %vm4308_vm15, %v6567_v60, %v6571_v5  ;;  %v11345_v26 = vld [vmem:[#allocation16 + $0x8c] ss:$16 sps:$4 sm:$0xff]   ;;  %v11343_v49 = vld [vmem:[#allocation16 + $0x88] ss:$16 sps:$4 sm:$0xff]  }
 0x817   : > { %v6579_v43 = vsel %vm4308_vm15, %v6571_v5, %v6567_v60  ;;  %v6533_v50 = vsel %vm4318_vm0, %v6525_v48, %v6521_v32  ;;  %v6534_v40 = vmax.f32 %v13671_v57, %v6526_v8  ;;  %v6550_v11 = vsel %vm4303_vm12, %v6542_v12, %v6546_v2  ;;  %v11349_v39 = vld [vmem:[#allocation16 + $0xa8] ss:$16 sps:$4 sm:$0xff]   ;;  %v11357_v5 = vld [vmem:[#allocation16 + $0xcc] ss:$16 sps:$4 sm:$0xff]  }
 0x818   : > { %v6574_v24 = vsel %vm4308_vm15, %v6566_v52, %v6570_v56  ;;  %v6541_v9 = vmax.f32 %v6517_v38, %v6533_v50  ;;  %v6559_v54 = vmax.f32 %v6535_v59, %v6551_v53  ;;  %v6587_v36 = vmax.f32 %v6563_v30, %v6579_v43  ;;  %v11355_v38 = vld [vmem:[#allocation16 + $0xc8] ss:$16 sps:$4 sm:$0xff]   ;;  %v11369_v53 = vld [vmem:[#allocation16 + $0x10c] ss:$16 sps:$4 sm:$0xff]  }
 0x819   : > { %v6578_v16 = vsel %vm4308_vm15, %v6570_v56, %v6566_v52  ;;  %v6558_v45 = vmax.f32 %v6534_v40, %v6550_v11  ;;  %v6529_v15 = vsel %vm4318_vm0, %v6521_v32, %v6525_v48  ;;  %v6553_v57 = vsel %vm4303_vm12, %v6545_v28, %v6549_v34  ;;  %v11361_v0 = vld [vmem:[#allocation16 + $0xe8] ss:$16 sps:$4 sm:$0xff]   ;;  %v11387_v59 = vld [vmem:[#allocation16 + $0x16c] ss:$16 sps:$4 sm:$0xff]  }
 0x81a   : > { %v6586_v3 = vmax.f32 %v6562_v19, %v6578_v16  ;;  %v6583_v60 = vmax.f32 %v6559_v54, %v6575_v6  ;;  %v6537_v12 = vmax.f32 %v13675_v21, %v6529_v15  ;;  %v6557_v51 = vsel %vm4303_vm12, %v6549_v34, %v6545_v28  ;;  %v11363_v19 = vld [vmem:[#allocation16 + $0xec] ss:$16 sps:$4 sm:$0xff]   ;;  %v11367_v35 = vld [vmem:[#allocation16 + $0x108] ss:$16 sps:$4 sm:$0xff]   ;;  %v11408_v54 = vld [vmem:[#allocation16 + $0x1e4] ss:$16 sps:$4 sm:$0xff]  }
 0x81b   : > { %v6577_v47 = vsel %vm4308_vm15, %v6569_v37, %v6573_v13  ;;  %v6582_v44 = vmax.f32 %v6558_v45, %v6574_v24  ;;  %v6565_v29 = vmax.f32 %v6541_v9, %v6557_v51  ;;  %v6581_v52 = vsel %vm4308_vm15, %v6573_v13, %v6569_v37  ;;  %v11373_v48 = vld [vmem:[#allocation16 + $0x128] ss:$16 sps:$4 sm:$0xff]   ;;  %v11381_v34 = vld [vmem:[#allocation16 + $0x14c] ss:$16 sps:$4 sm:$0xff]   ;;  %v11406_v9 = vld [vmem:[#allocation16 + $0x1e0] ss:$16 sps:$4 sm:$0xff]   ;;  %7505 = vmatprep.subr.bf16.mxu0 %v11408_v54 }
 0x81c   : > { %v6536_v62 = vmax.f32 %v13673_v10, %v6528_v61  ;;  %v6592_v32 = vpack.c.bf16 %v6587_v36, %v6583_v60  ;;  %v6561_v2 = vmax.f32 %v6537_v12, %v6553_v57  ;;  %v6552_v21 = vsel %vm4303_vm12, %v6544_v7, %v6548_v46  ;;  %v11319_v10 = vld [vmem:[#allocation16 + $0x8] ss:$16 sps:$4 sm:$0xff]   ;;  %v11393_v6 = vld [vmem:[#allocation16 + $0x18c] ss:$16 sps:$4 sm:$0xff]   ;;  %7506 = vmatpush1.bf16.msra.mxu0 %v11406_v9  ;;  %v11414_v45 = vld [vmem:[#allocation16 + $0x204] ss:$16 sps:$4 sm:$0xff]  }
 0x81d   : > { %v6576_v28 = vsel %vm4308_vm15, %v6568_v58, %v6572_v31  ;;  %v6591_v56 = vpack.c.bf16 %v6586_v3, %v6582_v44  ;;  %v6589_v14 = vmax.f32 %v6565_v29, %v6581_v52  ;;  %v6580_v37 = vsel %vm4308_vm15, %v6572_v31, %v6568_v58  ;;  %v11333_v58 = vld [vmem:[#allocation16 + $0x4c] ss:$16 sps:$4 sm:$0xff]   ;;  %v11331_v31 = vld [vmem:[#allocation16 + $0x48] ss:$16 sps:$4 sm:$0xff]   ;;  %7516 = vmatprep.subr.bf16.mxu0 %v11414_v45  ;;  %v11412_v12 = vld [vmem:[#allocation16 + $0x200] ss:$16 sps:$4 sm:$0xff]  }
 0x81e   : > { %v6560_v22 = vmax.f32 %v6536_v62, %v6552_v21  ;;  %6599 = vmatprep.subr.bf16.mxu1 %v6592_v32  ;;  %v6585_v1 = vmax.f32 %v6561_v2, %v6577_v47  ;;  %v6588_v8 = vmax.f32 %v6564_v17, %v6580_v37  ;;  %v11375_v17 = vld [vmem:[#allocation16 + $0x12c] ss:$16 sps:$4 sm:$0xff]   ;;  %v11379_v13 = vld [vmem:[#allocation16 + $0x148] ss:$16 sps:$4 sm:$0xff]   ;;  %v11420_v29 = vld [vmem:[#allocation16 + $0x224] ss:$16 sps:$4 sm:$0xff]  }
 0x81f   : > { %6600 = vmatpush1.bf16.msra.mxu1 %v6591_v56  ;;  %v11385_v30 = vld [vmem:[#allocation16 + $0x168] ss:$16 sps:$4 sm:$0xff]   ;;  %v11399_v50 = vld [vmem:[#allocation16 + $0x1ac] ss:$16 sps:$4 sm:$0xff]   ;;  %v11418_v32 = vld [vmem:[#allocation16 + $0x220] ss:$16 sps:$4 sm:$0xff]  }
 0x820   : > { %v6584_v7 = vmax.f32 %v6560_v22, %v6576_v28  ;;  %v6594_v46 = vpack.c.bf16 %v6589_v14, %v6585_v1  ;;  %v11391_v43 = vld [vmem:[#allocation16 + $0x188] ss:$16 sps:$4 sm:$0xff]   ;;  %v11405_v11 = vld [vmem:[#allocation16 + $0x1cc] ss:$16 sps:$4 sm:$0xff]   ;;  %v11426_v21 = vld [vmem:[#allocation16 + $0x244] ss:$16 sps:$4 sm:$0xff]  }
 0x821   : > { %v11397_v40 = vld [vmem:[#allocation16 + $0x1a8] ss:$16 sps:$4 sm:$0xff]   ;;  %v11411_v16 = vld [vmem:[#allocation16 + $0x1ec] ss:$16 sps:$4 sm:$0xff]   ;;  %v11424_v22 = vld [vmem:[#allocation16 + $0x240] ss:$16 sps:$4 sm:$0xff]  }
 0x822   : > { %v6593_v61 = vpack.c.bf16 %v6588_v8, %v6584_v7  ;;  %6640 = vmatprep.subr.bf16.mxu1 %v6594_v46  ;;  %9641 = vmatmul.mubr.msk.bf16.vlgmr.msra.gmra.mrb[108].mxu1 %vm6595_vm1, %v6590_v18  ;;  %v11403_v24 = vld [vmem:[#allocation16 + $0x1c8] ss:$16 sps:$4 sm:$0xff]   ;;  %v11417_v3 = vld [vmem:[#allocation16 + $0x20c] ss:$16 sps:$4 sm:$0xff]   ;;  %v11478_v54 = vld [vmem:[#allocation16 + $0x360] ss:$16 sps:$4 sm:$0xff]  }
 0x823   : > { %6672 = vmatprep.mubr.bf16.mxu1 %v12215_v27  ;;  %v11351_v27 = vld [vmem:[#allocation16 + $0xac] ss:$16 sps:$4 sm:$0xff]   ;;  %v11409_v36 = vld [vmem:[#allocation16 + $0x1e8] ss:$16 sps:$4 sm:$0xff]  }
 0x824   : > { %6641 = vmatpush1.bf16.msra.mxu1 %v6593_v61  ;;  %v11415_v51 = vld [vmem:[#allocation16 + $0x208] ss:$16 sps:$4 sm:$0xff]   ;;  %v11423_v52 = vld [vmem:[#allocation16 + $0x22c] ss:$16 sps:$4 sm:$0xff]  }
 0x825   : > { %7557 = vmatprep.subr.bf16.mxu1 %v11321_v42  ;;  %v11421_v2 = vld [vmem:[#allocation16 + $0x228] ss:$16 sps:$4 sm:$0xff]   ;;  %v11429_v28 = vld [vmem:[#allocation16 + $0x24c] ss:$16 sps:$4 sm:$0xff]   ;;  %v11430_v42 = vld [vmem:[#allocation16 + $0x260] ss:$16 sps:$4 sm:$0xff]  }
 0x826   : > { %v11427_v37 = vld [vmem:[#allocation16 + $0x248] ss:$16 sps:$4 sm:$0xff]   ;;  %v11435_v7 = vld [vmem:[#allocation16 + $0x26c] ss:$16 sps:$4 sm:$0xff]  }
 0x827   : > { %v11433_v61 = vld [vmem:[#allocation16 + $0x268] ss:$16 sps:$4 sm:$0xff]   ;;  %v11483_v9 = vld [vmem:[#allocation16 + $0x36c] ss:$16 sps:$4 sm:$0xff]  }
 0x828   : > { %v11489_v45 = vld [vmem:[#allocation16 + $0x38c] ss:$16 sps:$4 sm:$0xff]  }
 0x82a   : > { %9642 = vmatmul.mubr.msk.bf16.vlgmr.msra.gmra.mrb[112].mxu1 %vm6595_vm1, %v6590_v18  ;;  %v11432_v18 = vld [vmem:[#allocation16 + $0x264] ss:$16 sps:$4 sm:$0xff]  }
 0x82b   : > { %7558 = vmatpush1.bf16.msra.mxu1 %v11319_v10  ;;  %v11438_v10 = vld [vmem:[#allocation16 + $0x284] ss:$16 sps:$4 sm:$0xff]  }
 0x82c   : > { %7559 = vmatprep.subr.bf16.mxu1 %v11327_v4  ;;  %v11441_v4 = vld [vmem:[#allocation16 + $0x28c] ss:$16 sps:$4 sm:$0xff]  }
 0x82f   : > { %7560 = vmatpush1.bf16.msra.mxu1 %v11325_v41  ;;  %v11436_v41 = vld [vmem:[#allocation16 + $0x280] ss:$16 sps:$4 sm:$0xff]  }
 0x830   : > { %7561 = vmatprep.subr.bf16.mxu1 %v11333_v58  ;;  %v11439_v58 = vld [vmem:[#allocation16 + $0x288] ss:$16 sps:$4 sm:$0xff]  }
 0x833   : > { %7562 = vmatpush1.bf16.msra.mxu1 %v11331_v31  ;;  %v11444_v31 = vld [vmem:[#allocation16 + $0x2a4] ss:$16 sps:$4 sm:$0xff]  }
 0x834   : > { %7563 = vmatprep.subr.bf16.mxu1 %v11339_v33  ;;  %v11447_v33 = vld [vmem:[#allocation16 + $0x2ac] ss:$16 sps:$4 sm:$0xff]  }
 0x837   : > { %7564 = vmatpush1.bf16.msra.mxu1 %v11337_v25  ;;  %v11442_v25 = vld [vmem:[#allocation16 + $0x2a0] ss:$16 sps:$4 sm:$0xff]  }
 0x838   : > { %7565 = vmatprep.subr.bf16.mxu1 %v11345_v26  ;;  %v11445_v26 = vld [vmem:[#allocation16 + $0x2a8] ss:$16 sps:$4 sm:$0xff]  }
 0x83b   : > { %7566 = vmatpush1.bf16.msra.mxu1 %v11343_v49  ;;  %v11450_v49 = vld [vmem:[#allocation16 + $0x2c4] ss:$16 sps:$4 sm:$0xff]  }
 0x83c   : > { %7567 = vmatprep.subr.bf16.mxu1 %v11351_v27  ;;  %v11453_v27 = vld [vmem:[#allocation16 + $0x2cc] ss:$16 sps:$4 sm:$0xff]  }
 0x83f   : > { %7568 = vmatpush1.bf16.msra.mxu1 %v11349_v39  ;;  %v11448_v39 = vld [vmem:[#allocation16 + $0x2c0] ss:$16 sps:$4 sm:$0xff]  }
 0x840   : > { %7569 = vmatprep.subr.bf16.mxu1 %v11357_v5  ;;  %v11451_v5 = vld [vmem:[#allocation16 + $0x2c8] ss:$16 sps:$4 sm:$0xff]  }
 0x843   : > { %7570 = vmatpush1.bf16.msra.mxu1 %v11355_v38  ;;  %v11456_v38 = vld [vmem:[#allocation16 + $0x2e4] ss:$16 sps:$4 sm:$0xff]  }
 0x844   : > { %7571 = vmatprep.subr.bf16.mxu1 %v11363_v19  ;;  %v11459_v19 = vld [vmem:[#allocation16 + $0x2ec] ss:$16 sps:$4 sm:$0xff]  }
 0x847   : > { %7572 = vmatpush1.bf16.msra.mxu1 %v11361_v0  ;;  %v11454_v0 = vld [vmem:[#allocation16 + $0x2e0] ss:$16 sps:$4 sm:$0xff]  }
 0x848   : > { %7573 = vmatprep.subr.bf16.mxu1 %v11369_v53  ;;  %v11457_v53 = vld [vmem:[#allocation16 + $0x2e8] ss:$16 sps:$4 sm:$0xff]  }
 0x84b   : > { %7574 = vmatpush1.bf16.msra.mxu1 %v11367_v35  ;;  %v11462_v35 = vld [vmem:[#allocation16 + $0x304] ss:$16 sps:$4 sm:$0xff]  }
 0x84c   : > { %7575 = vmatprep.subr.bf16.mxu1 %v11375_v17  ;;  %v11465_v17 = vld [vmem:[#allocation16 + $0x30c] ss:$16 sps:$4 sm:$0xff]  }
 0x84f   : > { %7576 = vmatpush1.bf16.msra.mxu1 %v11373_v48  ;;  %v11460_v48 = vld [vmem:[#allocation16 + $0x300] ss:$16 sps:$4 sm:$0xff]  }
 0x850   : > { %7577 = vmatprep.subr.bf16.mxu1 %v11381_v34  ;;  %v11463_v34 = vld [vmem:[#allocation16 + $0x308] ss:$16 sps:$4 sm:$0xff]  }
 0x853   : > { %7578 = vmatpush1.bf16.msra.mxu1 %v11379_v13  ;;  %v11468_v13 = vld [vmem:[#allocation16 + $0x324] ss:$16 sps:$4 sm:$0xff]  }
 0x854   : > { %7579 = vmatprep.subr.bf16.mxu1 %v11387_v59  ;;  %v11471_v59 = vld [vmem:[#allocation16 + $0x32c] ss:$16 sps:$4 sm:$0xff]  }
 0x857   : > { %7580 = vmatpush1.bf16.msra.mxu1 %v11385_v30  ;;  %v11466_v30 = vld [vmem:[#allocation16 + $0x320] ss:$16 sps:$4 sm:$0xff]  }
 0x858   : > { %7581 = vmatprep.subr.bf16.mxu1 %v11393_v6  ;;  %v11469_v6 = vld [vmem:[#allocation16 + $0x328] ss:$16 sps:$4 sm:$0xff]  }
 0x85b   : > { %7582 = vmatpush1.bf16.msra.mxu1 %v11391_v43  ;;  %v11474_v43 = vld [vmem:[#allocation16 + $0x344] ss:$16 sps:$4 sm:$0xff]  }
 0x85c   : > { %7583 = vmatprep.subr.bf16.mxu1 %v11399_v50  ;;  %v11477_v50 = vld [vmem:[#allocation16 + $0x34c] ss:$16 sps:$4 sm:$0xff]  }
 0x85f   : > { %7584 = vmatpush1.bf16.msra.mxu1 %v11397_v40  ;;  %v11472_v40 = vld [vmem:[#allocation16 + $0x340] ss:$16 sps:$4 sm:$0xff]  }
 0x860   : > { %7585 = vmatprep.subr.bf16.mxu1 %v11405_v11  ;;  %v11475_v11 = vld [vmem:[#allocation16 + $0x348] ss:$16 sps:$4 sm:$0xff]  }
 0x863   : > { %7586 = vmatpush1.bf16.msra.mxu1 %v11403_v24  ;;  %v11480_v24 = vld [vmem:[#allocation16 + $0x364] ss:$16 sps:$4 sm:$0xff]  }
 0x864   : > { %7587 = vmatprep.subr.bf16.mxu1 %v11411_v16  ;;  %v11486_v16 = vld [vmem:[#allocation16 + $0x384] ss:$16 sps:$4 sm:$0xff]  }
 0x867   : > { %7588 = vmatpush1.bf16.msra.mxu1 %v11409_v36  ;;  %v11481_v36 = vld [vmem:[#allocation16 + $0x368] ss:$16 sps:$4 sm:$0xff]  }
 0x868   : > { %7598 = vmatprep.subr.bf16.mxu1 %v11417_v3  ;;  %v11484_v3 = vld [vmem:[#allocation16 + $0x380] ss:$16 sps:$4 sm:$0xff]  }
 0x8f5   : > { %v6633_v15 = vpop.f32.mrb[108].mxu1 }
 0x8f6   : > { %v6635_v57 = vpop.f32.mrb[109].mxu1  ;;  %v6681_v44 = vpack.c.bf16 %v6633_v15, %v6633_v15  ;;  %v11487_v15 = vld [vmem:[#allocation16 + $0x388] ss:$16 sps:$4 sm:$0xff]  }
 0x8f7   : > { %v6682_v60 = vpack.c.bf16 %v6635_v57, %v6635_v57  ;;  %v6637_v47 = vpop.f32.mrb[110].mxu1  ;;  %v11492_v57 = vld [vmem:[#allocation16 + $0x3a4] ss:$16 sps:$4 sm:$0xff]  }
 0x8f8   : > { %v6638_v62 = vpop.f32.mrb[111].mxu1  ;;  %v11498_v47 = vld [vmem:[#allocation16 + $0x3c4] ss:$16 sps:$4 sm:$0xff]  }
 0x8f9   : > { %7507 = vmatprep.mubr.bf16.mxu0 %v6682_v60  ;;  %7589 = vmatprep.mubr.bf16.mxu1 %v6682_v60  ;;  %v11495_v60 = vld [vmem:[#allocation16 + $0x3ac] ss:$16 sps:$4 sm:$0xff]   ;;  %v11504_v62 = vld [vmem:[#allocation16 + $0x3e4] ss:$16 sps:$4 sm:$0xff]  }
 0x8fa   : > { %7508 = vmatmul.mubr.bf16.vlgmr.msra.gmra.mrb[116].mxu0 %v6681_v44  ;;  %7590 = vmatmul.mubr.bf16.vlgmr.msra.gmra.mrb[116].mxu1 %v6681_v44  ;;  %v11501_v44 = vld [vmem:[#allocation16 + $0x3cc] ss:$16 sps:$4 sm:$0xff]  }
 0x8fb   : > { %7517 = vmatpush1.bf16.msra.mxu0 %v11412_v12  ;;  %7599 = vmatpush1.bf16.msra.mxu1 %v11415_v51  ;;  %v11490_v12 = vld [vmem:[#allocation16 + $0x3a0] ss:$16 sps:$4 sm:$0xff]   ;;  %v11493_v51 = vld [vmem:[#allocation16 + $0x3a8] ss:$16 sps:$4 sm:$0xff]  }
 0x8fc   : > { %7518 = vmatprep.subr.bf16.mxu0 %v11420_v29  ;;  %7600 = vmatprep.subr.bf16.mxu1 %v11423_v52  ;;  %v11496_v29 = vld [vmem:[#allocation16 + $0x3c0] ss:$16 sps:$4 sm:$0xff]   ;;  %v11499_v52 = vld [vmem:[#allocation16 + $0x3c8] ss:$16 sps:$4 sm:$0xff]  }
 0x8fd   : > { %v13752_v56 = vpop.f32.mrb[112].mxu1 }
 0x8fe   : > { %v6676_v14 = vpop.f32.mrb[113].mxu1 }
 0x8ff   : > { %7519 = vmatpush1.bf16.msra.mxu0 %v11418_v32  ;;  %7601 = vmatpush1.bf16.msra.mxu1 %v11421_v2  ;;  %v6684_v1 = vpack.c.bf16 %v6676_v14, %v6676_v14  ;;  %v6678_v8 = vpop.f32.mrb[114].mxu1  ;;  %v11507_v32 = vld [vmem:[#allocation16 + $0x3ec] ss:$16 sps:$4 sm:$0xff]   ;;  %v11502_v2 = vld [vmem:[#allocation16 + $0x3e0] ss:$16 sps:$4 sm:$0xff]  }
 0x900   : > { %7520 = vmatprep.subr.bf16.mxu0 %v11426_v21  ;;  %7602 = vmatprep.subr.bf16.mxu1 %v11429_v28  ;;  %v6679_v46 = vpop.f32.mrb[115].mxu1  ;;  %v11505_v21 = vld [vmem:[#allocation16 + $0x3e8] ss:$16 sps:$4 sm:$0xff]   ;;  %v11513_v14 = vld [vmem:[#allocation19 + $0xc] ss:$16 sps:$4 sm:$0xff]  }
 0x901   : > { %7548 = vmatprep.mubr.bf16.mxu0 %v6684_v1  ;;  %7630 = vmatprep.mubr.bf16.mxu1 %v6684_v1  ;;  %v11510_v28 = vld [vmem:[#allocation19 + $0x4] ss:$16 sps:$4 sm:$0xff]   ;;  %v6683_v1 = vpack.c.bf16 %v13752_v56, %v13752_v56  ;;  %v11517_v46 = vld [vmem:[#allocation19 + $0x28] ss:$16 sps:$4 sm:$0xff]  }
 0x902   : > { %v11516_v8 = vld [vmem:[#allocation19 + $0x24] ss:$16 sps:$4 sm:$0xff]  }
 0x903   : > { %7521 = vmatpush1.bf16.msra.mxu0 %v11424_v22  ;;  %7603 = vmatpush1.bf16.msra.mxu1 %v11427_v37  ;;  %v11508_v22 = vld [vmem:[#allocation19] ss:$16 sps:$4 sm:$0xff]   ;;  %v11511_v37 = vld [vmem:[#allocation19 + $0x8] ss:$16 sps:$4 sm:$0xff]   ;;  %v11528_v56 = vld [vmem:[#allocation19 + $0x64] ss:$16 sps:$4 sm:$0xff]  }
 0x904   : > { %7522 = vmatprep.subr.bf16.mxu0 %v11432_v18  ;;  %7604 = vmatprep.subr.bf16.mxu1 %v11435_v7  ;;  %v11519_v18 = vld [vmem:[#allocation19 + $0x2c] ss:$16 sps:$4 sm:$0xff]   ;;  %v11514_v7 = vld [vmem:[#allocation19 + $0x20] ss:$16 sps:$4 sm:$0xff]  }
 0x907   : > { %7523 = vmatpush1.bf16.msra.mxu0 %v11430_v42  ;;  %7605 = vmatpush1.bf16.msra.mxu1 %v11433_v61  ;;  %v11522_v42 = vld [vmem:[#allocation19 + $0x44] ss:$16 sps:$4 sm:$0xff]   ;;  %v11525_v61 = vld [vmem:[#allocation19 + $0x4c] ss:$16 sps:$4 sm:$0xff]  }
 0x908   : > { %7524 = vmatprep.subr.bf16.mxu0 %v11438_v10  ;;  %7606 = vmatprep.subr.bf16.mxu1 %v11441_v4  ;;  %v11520_v10 = vld [vmem:[#allocation19 + $0x40] ss:$16 sps:$4 sm:$0xff]   ;;  %v11523_v4 = vld [vmem:[#allocation19 + $0x48] ss:$16 sps:$4 sm:$0xff]  }
 0x90b   : > { %7525 = vmatpush1.bf16.msra.mxu0 %v11436_v41  ;;  %7607 = vmatpush1.bf16.msra.mxu1 %v11439_v58  ;;  %v11531_v41 = vld [vmem:[#allocation19 + $0x6c] ss:$16 sps:$4 sm:$0xff]   ;;  %v11526_v58 = vld [vmem:[#allocation19 + $0x60] ss:$16 sps:$4 sm:$0xff]  }
 0x90c   : > { %7526 = vmatprep.subr.bf16.mxu0 %v11444_v31  ;;  %7608 = vmatprep.subr.bf16.mxu1 %v11447_v33  ;;  %v11529_v31 = vld [vmem:[#allocation19 + $0x68] ss:$16 sps:$4 sm:$0xff]   ;;  %v11534_v33 = vld [vmem:[#allocation19 + $0x84] ss:$16 sps:$4 sm:$0xff]  }
 0x90f   : > { %7527 = vmatpush1.bf16.msra.mxu0 %v11442_v25  ;;  %7609 = vmatpush1.bf16.msra.mxu1 %v11445_v26  ;;  %v11537_v25 = vld [vmem:[#allocation19 + $0x8c] ss:$16 sps:$4 sm:$0xff]   ;;  %v11532_v26 = vld [vmem:[#allocation19 + $0x80] ss:$16 sps:$4 sm:$0xff]  }
 0x910   : > { %7528 = vmatprep.subr.bf16.mxu0 %v11450_v49  ;;  %7610 = vmatprep.subr.bf16.mxu1 %v11453_v27  ;;  %v11535_v49 = vld [vmem:[#allocation19 + $0x88] ss:$16 sps:$4 sm:$0xff]   ;;  %v11540_v27 = vld [vmem:[#allocation19 + $0xa4] ss:$16 sps:$4 sm:$0xff]  }
 0x913   : > { %7529 = vmatpush1.bf16.msra.mxu0 %v11448_v39  ;;  %7611 = vmatpush1.bf16.msra.mxu1 %v11451_v5  ;;  %v11543_v39 = vld [vmem:[#allocation19 + $0xac] ss:$16 sps:$4 sm:$0xff]   ;;  %v11538_v5 = vld [vmem:[#allocation19 + $0xa0] ss:$16 sps:$4 sm:$0xff]  }
 0x914   : > { %7530 = vmatprep.subr.bf16.mxu0 %v11456_v38  ;;  %7612 = vmatprep.subr.bf16.mxu1 %v11459_v19  ;;  %v11541_v38 = vld [vmem:[#allocation19 + $0xa8] ss:$16 sps:$4 sm:$0xff]   ;;  %v11546_v19 = vld [vmem:[#allocation19 + $0xc4] ss:$16 sps:$4 sm:$0xff]  }
 0x917   : > { %7531 = vmatpush1.bf16.msra.mxu0 %v11454_v0  ;;  %7613 = vmatpush1.bf16.msra.mxu1 %v11457_v53  ;;  %v11549_v0 = vld [vmem:[#allocation19 + $0xcc] ss:$16 sps:$4 sm:$0xff]   ;;  %v11544_v53 = vld [vmem:[#allocation19 + $0xc0] ss:$16 sps:$4 sm:$0xff]  }
 0x918   : > { %7532 = vmatprep.subr.bf16.mxu0 %v11462_v35  ;;  %7614 = vmatprep.subr.bf16.mxu1 %v11465_v17  ;;  %v11547_v35 = vld [vmem:[#allocation19 + $0xc8] ss:$16 sps:$4 sm:$0xff]   ;;  %v11552_v17 = vld [vmem:[#allocation19 + $0xe4] ss:$16 sps:$4 sm:$0xff]  }
 0x91b   : > { %7533 = vmatpush1.bf16.msra.mxu0 %v11460_v48  ;;  %7615 = vmatpush1.bf16.msra.mxu1 %v11463_v34  ;;  %v11555_v48 = vld [vmem:[#allocation19 + $0xec] ss:$16 sps:$4 sm:$0xff]   ;;  %v11550_v34 = vld [vmem:[#allocation19 + $0xe0] ss:$16 sps:$4 sm:$0xff]  }
 0x91c   : > { %7534 = vmatprep.subr.bf16.mxu0 %v11468_v13  ;;  %7616 = vmatprep.subr.bf16.mxu1 %v11471_v59  ;;  %v11553_v13 = vld [vmem:[#allocation19 + $0xe8] ss:$16 sps:$4 sm:$0xff]   ;;  %v11558_v59 = vld [vmem:[#allocation19 + $0x104] ss:$16 sps:$4 sm:$0xff]  }
 0x91f   : > { %7535 = vmatpush1.bf16.msra.mxu0 %v11466_v30  ;;  %7617 = vmatpush1.bf16.msra.mxu1 %v11469_v6  ;;  %v11561_v30 = vld [vmem:[#allocation19 + $0x10c] ss:$16 sps:$4 sm:$0xff]   ;;  %v11556_v6 = vld [vmem:[#allocation19 + $0x100] ss:$16 sps:$4 sm:$0xff]  }
 0x920   : > { %7536 = vmatprep.subr.bf16.mxu0 %v11474_v43  ;;  %7618 = vmatprep.subr.bf16.mxu1 %v11477_v50  ;;  %v11559_v43 = vld [vmem:[#allocation19 + $0x108] ss:$16 sps:$4 sm:$0xff]   ;;  %v11564_v50 = vld [vmem:[#allocation19 + $0x124] ss:$16 sps:$4 sm:$0xff]  }
 0x923   : > { %7537 = vmatpush1.bf16.msra.mxu0 %v11472_v40  ;;  %7619 = vmatpush1.bf16.msra.mxu1 %v11475_v11  ;;  %v11567_v40 = vld [vmem:[#allocation19 + $0x12c] ss:$16 sps:$4 sm:$0xff]   ;;  %v11562_v11 = vld [vmem:[#allocation19 + $0x120] ss:$16 sps:$4 sm:$0xff]  }
 0x924   : > { %7538 = vmatprep.subr.bf16.mxu0 %v11480_v24  ;;  %7620 = vmatprep.subr.bf16.mxu1 %v11483_v9  ;;  %v11565_v24 = vld [vmem:[#allocation19 + $0x128] ss:$16 sps:$4 sm:$0xff]   ;;  %v11570_v9 = vld [vmem:[#allocation19 + $0x144] ss:$16 sps:$4 sm:$0xff]  }
 0x927   : > { %7539 = vmatpush1.bf16.msra.mxu0 %v11478_v54  ;;  %7621 = vmatpush1.bf16.msra.mxu1 %v11481_v36  ;;  %v11573_v54 = vld [vmem:[#allocation19 + $0x14c] ss:$16 sps:$4 sm:$0xff]   ;;  %v11568_v36 = vld [vmem:[#allocation19 + $0x140] ss:$16 sps:$4 sm:$0xff]  }
 0x928   : > { %7540 = vmatprep.subr.bf16.mxu0 %v11486_v16  ;;  %7622 = vmatprep.subr.bf16.mxu1 %v11489_v45  ;;  %v11571_v16 = vld [vmem:[#allocation19 + $0x148] ss:$16 sps:$4 sm:$0xff]   ;;  %v11576_v45 = vld [vmem:[#allocation19 + $0x164] ss:$16 sps:$4 sm:$0xff]  }
 0x92b   : > { %7541 = vmatpush1.bf16.msra.mxu0 %v11484_v3  ;;  %7623 = vmatpush1.bf16.msra.mxu1 %v11487_v15  ;;  %v11579_v3 = vld [vmem:[#allocation19 + $0x16c] ss:$16 sps:$4 sm:$0xff]   ;;  %v11574_v15 = vld [vmem:[#allocation19 + $0x160] ss:$16 sps:$4 sm:$0xff]  }
 0x92c   : > { %7542 = vmatprep.subr.bf16.mxu0 %v11492_v57  ;;  %7624 = vmatprep.subr.bf16.mxu1 %v11495_v60  ;;  %v11577_v57 = vld [vmem:[#allocation19 + $0x168] ss:$16 sps:$4 sm:$0xff]   ;;  %v11582_v60 = vld [vmem:[#allocation19 + $0x184] ss:$16 sps:$4 sm:$0xff]  }
 0x92f   : > { %7543 = vmatpush1.bf16.msra.mxu0 %v11490_v12  ;;  %7625 = vmatpush1.bf16.msra.mxu1 %v11493_v51  ;;  %v11585_v12 = vld [vmem:[#allocation19 + $0x18c] ss:$16 sps:$4 sm:$0xff]   ;;  %v11580_v51 = vld [vmem:[#allocation19 + $0x180] ss:$16 sps:$4 sm:$0xff]  }
 0x930   : > { %7544 = vmatprep.subr.bf16.mxu0 %v11498_v47  ;;  %7626 = vmatprep.subr.bf16.mxu1 %v11501_v44  ;;  %v11583_v47 = vld [vmem:[#allocation19 + $0x188] ss:$16 sps:$4 sm:$0xff]   ;;  %v11588_v44 = vld [vmem:[#allocation19 + $0x1a4] ss:$16 sps:$4 sm:$0xff]  }
 0x933   : > { %7545 = vmatpush1.bf16.msra.mxu0 %v11496_v29  ;;  %7627 = vmatpush1.bf16.msra.mxu1 %v11499_v52  ;;  %v11591_v29 = vld [vmem:[#allocation19 + $0x1ac] ss:$16 sps:$4 sm:$0xff]   ;;  %v11586_v52 = vld [vmem:[#allocation19 + $0x1a0] ss:$16 sps:$4 sm:$0xff]  }
 0x934   : > { %7546 = vmatprep.subr.bf16.mxu0 %v11504_v62  ;;  %7628 = vmatprep.subr.bf16.mxu1 %v11507_v32  ;;  %v11589_v62 = vld [vmem:[#allocation19 + $0x1a8] ss:$16 sps:$4 sm:$0xff]   ;;  %v11592_v32 = vld [vmem:[#allocation19 + $0x1c0] ss:$16 sps:$4 sm:$0xff]  }
 0x937   : > { %7547 = vmatpush1.bf16.msra.mxu0 %v11502_v2  ;;  %7629 = vmatpush1.bf16.msra.mxu1 %v11505_v21  ;;  %v11594_v2 = vld [vmem:[#allocation19 + $0x1c4] ss:$16 sps:$4 sm:$0xff]   ;;  %v11595_v21 = vld [vmem:[#allocation19 + $0x1c8] ss:$16 sps:$4 sm:$0xff]  }
 0x938   : > { %8437 = vmatprep.subr.bf16.mxu0 %v11510_v28  ;;  %8519 = vmatprep.subr.bf16.mxu1 %v11513_v14  ;;  %v11597_v28 = vld [vmem:[#allocation19 + $0x1cc] ss:$16 sps:$4 sm:$0xff]   ;;  %v11600_v14 = vld [vmem:[#allocation19 + $0x1e4] ss:$16 sps:$4 sm:$0xff]  }
 0x93a   : > { %7549 = vmatmul.mubr.bf16.vlgmr.msra.gmra.mrb[116].mxu0 %v6683_v1  ;;  %7631 = vmatmul.mubr.bf16.vlgmr.msra.gmra.mrb[116].mxu1 %v6683_v1  ;;  %v11601_v1 = vld [vmem:[#allocation19 + $0x1e8] ss:$16 sps:$4 sm:$0xff]  }
 0x93b   : > { %8438 = vmatpush1.bf16.msra.mxu0 %v11508_v22  ;;  %8520 = vmatpush1.bf16.msra.mxu1 %v11511_v37  ;;  %v11603_v22 = vld [vmem:[#allocation19 + $0x1ec] ss:$16 sps:$4 sm:$0xff]   ;;  %v11598_v37 = vld [vmem:[#allocation19 + $0x1e0] ss:$16 sps:$4 sm:$0xff]  }
 0x93c   : > { %8439 = vmatprep.subr.bf16.mxu0 %v11516_v8  ;;  %8521 = vmatprep.subr.bf16.mxu1 %v11519_v18  ;;  %v11606_v8 = vld [vmem:[#allocation19 + $0x204] ss:$16 sps:$4 sm:$0xff]   ;;  %v11609_v18 = vld [vmem:[#allocation19 + $0x20c] ss:$16 sps:$4 sm:$0xff]  }
 0x93f   : > { %8440 = vmatpush1.bf16.msra.mxu0 %v11514_v7  ;;  %8522 = vmatpush1.bf16.msra.mxu1 %v11517_v46  ;;  %v13756_v7 = vld [vmem:[#allocation18] sm:$0xf] }
 0x940   : > { %8441 = vmatprep.subr.bf16.mxu0 %v11522_v42  ;;  %8523 = vmatprep.subr.bf16.mxu1 %v11525_v61  ;;  %v6818_v46 = vrot.slane %v13756_v7, %v13656_v23  ;;  %v6822_v42 = vrot.slane %v13756_v7, %v13662_v63  ;;  %v6830_v61 = vrot.slane %v13756_v7, %v13665_v55 }
 0x943   : > { %8442 = vmatpush1.bf16.msra.mxu0 %v11520_v10  ;;  %8524 = vmatpush1.bf16.msra.mxu1 %v11523_v4 }
 0x944   : > { %8443 = vmatprep.subr.bf16.mxu0 %v11528_v56  ;;  %8525 = vmatprep.subr.bf16.mxu1 %v11531_v41 }
 0x947   : > { %8444 = vmatpush1.bf16.msra.mxu0 %v11526_v58  ;;  %8526 = vmatpush1.bf16.msra.mxu1 %v11529_v31 }
 0x948   : > { %8445 = vmatprep.subr.bf16.mxu0 %v11534_v33  ;;  %8527 = vmatprep.subr.bf16.mxu1 %v11537_v25 }
 0x94b   : > { %8446 = vmatpush1.bf16.msra.mxu0 %v11532_v26  ;;  %8528 = vmatpush1.bf16.msra.mxu1 %v11535_v49 }
 0x94c   : > { %8447 = vmatprep.subr.bf16.mxu0 %v11540_v27  ;;  %8529 = vmatprep.subr.bf16.mxu1 %v11543_v39 }
 0x94f   : > { %8448 = vmatpush1.bf16.msra.mxu0 %v11538_v5  ;;  %8530 = vmatpush1.bf16.msra.mxu1 %v11541_v38 }
 0x950   : > { %8449 = vmatprep.subr.bf16.mxu0 %v11546_v19  ;;  %8531 = vmatprep.subr.bf16.mxu1 %v11549_v0  ;;  %v11604_v0 = vld [vmem:[#allocation19 + $0x200] ss:$16 sps:$4 sm:$0xff]  }
 0x953   : > { %8450 = vmatpush1.bf16.msra.mxu0 %v11544_v53  ;;  %8532 = vmatpush1.bf16.msra.mxu1 %v11547_v35  ;;  %v11607_v53 = vld [vmem:[#allocation19 + $0x208] ss:$16 sps:$4 sm:$0xff]  }
 0x954   : > { %8451 = vmatprep.subr.bf16.mxu0 %v11552_v17  ;;  %8533 = vmatprep.subr.bf16.mxu1 %v11555_v48  ;;  %v11612_v17 = vld [vmem:[#allocation19 + $0x224] ss:$16 sps:$4 sm:$0xff]   ;;  %v11615_v48 = vld [vmem:[#allocation19 + $0x22c] ss:$16 sps:$4 sm:$0xff]  }
 0x957   : > { %8452 = vmatpush1.bf16.msra.mxu0 %v11550_v34  ;;  %8534 = vmatpush1.bf16.msra.mxu1 %v11553_v13  ;;  %v11610_v13 = vld [vmem:[#allocation19 + $0x220] ss:$16 sps:$4 sm:$0xff]  }
 0x958   : > { %8453 = vmatprep.subr.bf16.mxu0 %v11558_v59  ;;  %8535 = vmatprep.subr.bf16.mxu1 %v11561_v30  ;;  %v11613_v59 = vld [vmem:[#allocation19 + $0x228] ss:$16 sps:$4 sm:$0xff]   ;;  %v11618_v30 = vld [vmem:[#allocation19 + $0x244] ss:$16 sps:$4 sm:$0xff]  }
 0x95b   : > { %8454 = vmatpush1.bf16.msra.mxu0 %v11556_v6  ;;  %8536 = vmatpush1.bf16.msra.mxu1 %v11559_v43  ;;  %v11621_v6 = vld [vmem:[#allocation19 + $0x24c] ss:$16 sps:$4 sm:$0xff]   ;;  %v11616_v43 = vld [vmem:[#allocation19 + $0x240] ss:$16 sps:$4 sm:$0xff]  }
 0x95c   : > { %8455 = vmatprep.subr.bf16.mxu0 %v11564_v50  ;;  %8537 = vmatprep.subr.bf16.mxu1 %v11567_v40  ;;  %v11619_v50 = vld [vmem:[#allocation19 + $0x248] ss:$16 sps:$4 sm:$0xff]   ;;  %v11624_v40 = vld [vmem:[#allocation19 + $0x264] ss:$16 sps:$4 sm:$0xff]  }
 0x95f   : > { %8456 = vmatpush1.bf16.msra.mxu0 %v11562_v11  ;;  %8538 = vmatpush1.bf16.msra.mxu1 %v11565_v24  ;;  %v11627_v11 = vld [vmem:[#allocation19 + $0x26c] ss:$16 sps:$4 sm:$0xff]   ;;  %v11622_v24 = vld [vmem:[#allocation19 + $0x260] ss:$16 sps:$4 sm:$0xff]  }
 0x960   : > { %8457 = vmatprep.subr.bf16.mxu0 %v11570_v9  ;;  %8539 = vmatprep.subr.bf16.mxu1 %v11573_v54  ;;  %v11625_v9 = vld [vmem:[#allocation19 + $0x268] ss:$16 sps:$4 sm:$0xff]   ;;  %v11630_v54 = vld [vmem:[#allocation19 + $0x284] ss:$16 sps:$4 sm:$0xff]  }
 0x963   : > { %8458 = vmatpush1.bf16.msra.mxu0 %v11568_v36  ;;  %8540 = vmatpush1.bf16.msra.mxu1 %v11571_v16  ;;  %v11633_v36 = vld [vmem:[#allocation19 + $0x28c] ss:$16 sps:$4 sm:$0xff]   ;;  %v11628_v16 = vld [vmem:[#allocation19 + $0x280] ss:$16 sps:$4 sm:$0xff]  }
 0x964   : > { %8459 = vmatprep.subr.bf16.mxu0 %v11576_v45  ;;  %8541 = vmatprep.subr.bf16.mxu1 %v11579_v3  ;;  %v11631_v45 = vld [vmem:[#allocation19 + $0x288] ss:$16 sps:$4 sm:$0xff]   ;;  %v11636_v3 = vld [vmem:[#allocation19 + $0x2a4] ss:$16 sps:$4 sm:$0xff]  }
 0x967   : > { %8460 = vmatpush1.bf16.msra.mxu0 %v11574_v15  ;;  %8542 = vmatpush1.bf16.msra.mxu1 %v11577_v57  ;;  %v11639_v15 = vld [vmem:[#allocation19 + $0x2ac] ss:$16 sps:$4 sm:$0xff]   ;;  %v11634_v57 = vld [vmem:[#allocation19 + $0x2a0] ss:$16 sps:$4 sm:$0xff]  }
 0x968   : > { %8461 = vmatprep.subr.bf16.mxu0 %v11582_v60  ;;  %8543 = vmatprep.subr.bf16.mxu1 %v11585_v12  ;;  %v11637_v60 = vld [vmem:[#allocation19 + $0x2a8] ss:$16 sps:$4 sm:$0xff]   ;;  %v11642_v12 = vld [vmem:[#allocation19 + $0x2c4] ss:$16 sps:$4 sm:$0xff]  }
 0x96b   : > { %8462 = vmatpush1.bf16.msra.mxu0 %v11580_v51  ;;  %8544 = vmatpush1.bf16.msra.mxu1 %v11583_v47  ;;  %v11645_v51 = vld [vmem:[#allocation19 + $0x2cc] ss:$16 sps:$4 sm:$0xff]   ;;  %v11640_v47 = vld [vmem:[#allocation19 + $0x2c0] ss:$16 sps:$4 sm:$0xff]  }
 0x96c   : > { %8463 = vmatprep.subr.bf16.mxu0 %v11588_v44  ;;  %8545 = vmatprep.subr.bf16.mxu1 %v11591_v29  ;;  %v11643_v44 = vld [vmem:[#allocation19 + $0x2c8] ss:$16 sps:$4 sm:$0xff]   ;;  %v11648_v29 = vld [vmem:[#allocation19 + $0x2e4] ss:$16 sps:$4 sm:$0xff]  }
 0x96f   : > { %8464 = vmatpush1.bf16.msra.mxu0 %v11586_v52  ;;  %8546 = vmatpush1.bf16.msra.mxu1 %v11589_v62  ;;  %v11651_v52 = vld [vmem:[#allocation19 + $0x2ec] ss:$16 sps:$4 sm:$0xff]   ;;  %v11646_v62 = vld [vmem:[#allocation19 + $0x2e0] ss:$16 sps:$4 sm:$0xff]  }
 0x970   : > { %8465 = vmatprep.subr.bf16.mxu0 %v11594_v2  ;;  %8547 = vmatprep.subr.bf16.mxu1 %v11597_v28  ;;  %v11654_v2 = vld [vmem:[#allocation19 + $0x304] ss:$16 sps:$4 sm:$0xff]   ;;  %v11652_v28 = vld [vmem:[#allocation19 + $0x300] ss:$16 sps:$4 sm:$0xff]  }
 0x973   : > { %8466 = vmatpush1.bf16.msra.mxu0 %v11592_v32  ;;  %8548 = vmatpush1.bf16.msra.mxu1 %v11595_v21  ;;  %v11649_v32 = vld [vmem:[#allocation19 + $0x2e8] ss:$16 sps:$4 sm:$0xff]   ;;  %v11657_v21 = vld [vmem:[#allocation19 + $0x30c] ss:$16 sps:$4 sm:$0xff]  }
 0x974   : > { %8467 = vmatprep.subr.bf16.mxu0 %v11600_v14  ;;  %8549 = vmatprep.subr.bf16.mxu1 %v11603_v22  ;;  %v11655_v14 = vld [vmem:[#allocation19 + $0x308] ss:$16 sps:$4 sm:$0xff]   ;;  %v11660_v22 = vld [vmem:[#allocation19 + $0x324] ss:$16 sps:$4 sm:$0xff]  }
 0x977   : > { %8468 = vmatpush1.bf16.msra.mxu0 %v11598_v37  ;;  %8550 = vmatpush1.bf16.msra.mxu1 %v11601_v1  ;;  %v11663_v37 = vld [vmem:[#allocation19 + $0x32c] ss:$16 sps:$4 sm:$0xff]   ;;  %v11658_v1 = vld [vmem:[#allocation19 + $0x320] ss:$16 sps:$4 sm:$0xff]  }
 0x978   : > { %8478 = vmatprep.subr.bf16.mxu0 %v11606_v8  ;;  %8560 = vmatprep.subr.bf16.mxu1 %v11609_v18  ;;  %v11661_v8 = vld [vmem:[#allocation19 + $0x328] ss:$16 sps:$4 sm:$0xff]   ;;  %v11666_v18 = vld [vmem:[#allocation19 + $0x344] ss:$16 sps:$4 sm:$0xff]  }
 0xa0d   : > { %v7550_v10 = vpop.f32.mrb[116].mxu0  ;;  %v13764_v4 = vpop.f32.mrb[116].mxu1 }
 0xa0e   : > { %v10502_v56 = vadd.f32 %v7550_v10, %v6818_v46  ;;  %v7552_v41 = vpop.f32.mrb[117].mxu0  ;;  %v7634_v58 = vpop.f32.mrb[117].mxu1  ;;  %v11669_v46 = vld [vmem:[#allocation19 + $0x34c] ss:$16 sps:$4 sm:$0xff]   ;;  %v11672_v10 = vld [vmem:[#allocation19 + $0x364] ss:$16 sps:$4 sm:$0xff]  }
 0xa0f   : > { %v10503_v31 = vadd.f32 %v7552_v41, %v6822_v42  ;;  %v10505_v33 = vadd.f32 %v7634_v58, %v6830_v61  ;;  %v7554_v25 = vpop.f32.mrb[118].mxu0  ;;  %v7636_v26 = vpop.f32.mrb[118].mxu1  ;;  %v11664_v42 = vld [vmem:[#allocation19 + $0x340] ss:$16 sps:$4 sm:$0xff]   ;;  %v11667_v61 = vld [vmem:[#allocation19 + $0x348] ss:$16 sps:$4 sm:$0xff]  }
 0xa10   : > { %v7639_v49 = vmax.f32 %v10502_v56, 0.0  ;;  %v7555_v27 = vpop.f32.mrb[119].mxu0  ;;  %v7637_v39 = vpop.f32.mrb[119].mxu1  ;;  %v11675_v56 = vld [vmem:[#allocation19 + $0x36c] ss:$16 sps:$4 sm:$0xff]  }
 0xa11   : > { %v7640_v5 = vmax.f32 %v10503_v31, 0.0  ;;  %v7642_v38 = vmax.f32 %v10505_v33, 0.0  ;;  %v11670_v41 = vld [vmem:[#allocation19 + $0x360] ss:$16 sps:$4 sm:$0xff]   ;;  %v11673_v58 = vld [vmem:[#allocation19 + $0x368] ss:$16 sps:$4 sm:$0xff]  }
 0xa12   : > { %v7643_v35 = vpack.c.bf16 %v7639_v49, %v7639_v49  ;;  %v11678_v31 = vld [vmem:[#allocation19 + $0x384] ss:$16 sps:$4 sm:$0xff]   ;;  %v11681_v33 = vld [vmem:[#allocation19 + $0x38c] ss:$16 sps:$4 sm:$0xff]   ;;  %v11676_v25 = vld [vmem:[#allocation19 + $0x380] ss:$16 sps:$4 sm:$0xff]  }
 0xa13   : > { %v7644_v19 = vpack.c.bf16 %v7640_v5, %v7640_v5  ;;  %v7646_v34 = vpack.c.bf16 %v7642_v38, %v7642_v38  ;;  %v11679_v26 = vld [vmem:[#allocation19 + $0x388] ss:$16 sps:$4 sm:$0xff]   ;;  %v11684_v49 = vld [vmem:[#allocation19 + $0x3a4] ss:$16 sps:$4 sm:$0xff]   ;;  %v11687_v27 = vld [vmem:[#allocation19 + $0x3ac] ss:$16 sps:$4 sm:$0xff]   ;;  %v6826_v38 = vrot.slane %v13756_v7, %v13659_v20 }
 0xa14   : > { %v11682_v39 = vld [vmem:[#allocation19 + $0x3a0] ss:$16 sps:$4 sm:$0xff]   ;;  %v11685_v5 = vld [vmem:[#allocation19 + $0x3a8] ss:$16 sps:$4 sm:$0xff]  }
 0xa15   : > { %8469 = vmatprep.mubr.bf16.mxu0 %v7644_v19  ;;  %8551 = vmatprep.mubr.bf16.mxu1 %v7644_v19  ;;  %v11690_v19 = vld [vmem:[#allocation19 + $0x3c4] ss:$16 sps:$4 sm:$0xff]  }
 0xa16   : > { %8470 = vmatmul.mubr.bf16.vlgmr.msra.gmra.mrb[120].mxu0 %v7643_v35  ;;  %8552 = vmatmul.mubr.bf16.vlgmr.msra.gmra.mrb[120].mxu1 %v7643_v35  ;;  %v11691_v35 = vld [vmem:[#allocation19 + $0x3c8] ss:$16 sps:$4 sm:$0xff]  }
 0xa17   : > { %8479 = vmatpush1.bf16.msra.mxu0 %v11604_v0  ;;  %8561 = vmatpush1.bf16.msra.mxu1 %v11607_v53  ;;  %v11693_v0 = vld [vmem:[#allocation19 + $0x3cc] ss:$16 sps:$4 sm:$0xff]   ;;  %v11688_v53 = vld [vmem:[#allocation19 + $0x3c0] ss:$16 sps:$4 sm:$0xff]   ;;  %v11700_v7 = vld [vmem:[#allocation22 + $0x40] sm:$0xff]  }
 0xa18   : > { %8510 = vmatprep.mubr.bf16.mxu0 %v7646_v34  ;;  %8592 = vmatprep.mubr.bf16.mxu1 %v7646_v34  ;;  %v11699_v34 = vld [vmem:[#allocation19 + $0x3ec] ss:$16 sps:$4 sm:$0xff]  }
 0xa19   : > { %8480 = vmatprep.subr.bf16.mxu0 %v11612_v17  ;;  %8562 = vmatprep.subr.bf16.mxu1 %v11615_v48  ;;  %v10504_v17 = vadd.f32 %v13764_v4, %v6826_v38  ;;  %v11696_v48 = vld [vmem:[#allocation19 + $0x3e4] ss:$16 sps:$4 sm:$0xff]   ;;  %v11704_v4 = vld [vmem:[#allocation22 + $0x48] sm:$0xff]  }
 0xa1b   : > { %8481 = vmatpush1.bf16.msra.mxu0 %v11610_v13  ;;  %8563 = vmatpush1.bf16.msra.mxu1 %v11613_v59  ;;  %v11694_v13 = vld [vmem:[#allocation19 + $0x3e0] ss:$16 sps:$4 sm:$0xff]   ;;  %v11697_v59 = vld [vmem:[#allocation19 + $0x3e8] ss:$16 sps:$4 sm:$0xff]  }
 0xa1c   : > { %8482 = vmatprep.subr.bf16.mxu0 %v11618_v30  ;;  %8564 = vmatprep.subr.bf16.mxu1 %v11621_v6  ;;  %v7641_v30 = vmax.f32 %v10504_v17, 0.0  ;;  %v11701_v6 = vld [vmem:[#allocation22 + $0xc0] sm:$0xff]  }
 0xa1f   : > { %8483 = vmatpush1.bf16.msra.mxu0 %v11616_v43  ;;  %8565 = vmatpush1.bf16.msra.mxu1 %v11619_v50  ;;  %v11702_v43 = vld [vmem:[#allocation22] sm:$0xff]  }
 0xa20   : > { %8484 = vmatprep.subr.bf16.mxu0 %v11624_v40  ;;  %8566 = vmatprep.subr.bf16.mxu1 %v11627_v11  ;;  %v11703_v50 = vld [vmem:[#allocation22 + $0x80] sm:$0xff]   ;;  %v7645_v40 = vpack.c.bf16 %v7641_v30, %v7641_v30  ;;  %v11705_v11 = vld [vmem:[#allocation22 + $0xc8] sm:$0xff]  }
 0xa23   : > { %8485 = vmatpush1.bf16.msra.mxu0 %v11622_v24  ;;  %8567 = vmatpush1.bf16.msra.mxu1 %v11625_v9  ;;  %v11706_v24 = vld [vmem:[#allocation22 + $0x8] sm:$0xff]  }
 0xa24   : > { %8486 = vmatprep.subr.bf16.mxu0 %v11630_v54  ;;  %8568 = vmatprep.subr.bf16.mxu1 %v11633_v36  ;;  %v11707_v9 = vld [vmem:[#allocation22 + $0x88] sm:$0xff]   ;;  %v11708_v54 = vld [vmem:[#allocation22 + $0x50] sm:$0xff]  }
 0xa25   : > { %v11709_v36 = vld [vmem:[#allocation22 + $0xd0] sm:$0xff]  }
 0xa27   : > { %8487 = vmatpush1.bf16.msra.mxu0 %v11628_v16  ;;  %8569 = vmatpush1.bf16.msra.mxu1 %v11631_v45  ;;  %v11710_v16 = vld [vmem:[#allocation22 + $0x10] sm:$0xff]  }
 0xa28   : > { %8488 = vmatprep.subr.bf16.mxu0 %v11636_v3  ;;  %8570 = vmatprep.subr.bf16.mxu1 %v11639_v15  ;;  %v11711_v45 = vld [vmem:[#allocation22 + $0x90] sm:$0xff]   ;;  %v11712_v3 = vld [vmem:[#allocation22 + $0x58] sm:$0xff]  }
 0xa29   : > { %v11713_v15 = vld [vmem:[#allocation22 + $0xd8] sm:$0xff]  }
 0xa2b   : > { %8489 = vmatpush1.bf16.msra.mxu0 %v11634_v57  ;;  %8571 = vmatpush1.bf16.msra.mxu1 %v11637_v60  ;;  %v11714_v57 = vld [vmem:[#allocation22 + $0x18] sm:$0xff]  }
 0xa2c   : > { %8490 = vmatprep.subr.bf16.mxu0 %v11642_v12  ;;  %8572 = vmatprep.subr.bf16.mxu1 %v11645_v51  ;;  %v11715_v60 = vld [vmem:[#allocation22 + $0x98] sm:$0xff]   ;;  %v11716_v12 = vld [vmem:[#allocation22 + $0x60] sm:$0xff]  }
 0xa2d   : > { %v11717_v51 = vld [vmem:[#allocation22 + $0xe0] sm:$0xff]  }
 0xa2f   : > { %8491 = vmatpush1.bf16.msra.mxu0 %v11640_v47  ;;  %8573 = vmatpush1.bf16.msra.mxu1 %v11643_v44  ;;  %v11718_v47 = vld [vmem:[#allocation22 + $0x20] sm:$0xff]  }
 0xa30   : > { %8492 = vmatprep.subr.bf16.mxu0 %v11648_v29  ;;  %8574 = vmatprep.subr.bf16.mxu1 %v11651_v52  ;;  %v11719_v44 = vld [vmem:[#allocation22 + $0xa0] sm:$0xff]   ;;  %v11720_v29 = vld [vmem:[#allocation22 + $0x68] sm:$0xff]  }
 0xa31   : > { %v11721_v52 = vld [vmem:[#allocation22 + $0xe8] sm:$0xff]  }
 0xa33   : > { %8493 = vmatpush1.bf16.msra.mxu0 %v11646_v62  ;;  %8575 = vmatpush1.bf16.msra.mxu1 %v11649_v32  ;;  %v11722_v62 = vld [vmem:[#allocation22 + $0x28] sm:$0xff]  }
 0xa34   : > { %8494 = vmatprep.subr.bf16.mxu0 %v11654_v2  ;;  %8576 = vmatprep.subr.bf16.mxu1 %v11657_v21  ;;  %v11723_v32 = vld [vmem:[#allocation22 + $0xa8] sm:$0xff]   ;;  %v11724_v2 = vld [vmem:[#allocation22 + $0x70] sm:$0xff]  }
 0xa35   : > { %v11725_v21 = vld [vmem:[#allocation22 + $0xf0] sm:$0xff]  }
 0xa37   : > { %8495 = vmatpush1.bf16.msra.mxu0 %v11652_v28  ;;  %8577 = vmatpush1.bf16.msra.mxu1 %v11655_v14  ;;  %v11726_v28 = vld [vmem:[#allocation22 + $0x30] sm:$0xff]  }
 0xa38   : > { %8496 = vmatprep.subr.bf16.mxu0 %v11660_v22  ;;  %8578 = vmatprep.subr.bf16.mxu1 %v11663_v37  ;;  %v11727_v14 = vld [vmem:[#allocation22 + $0xb0] sm:$0xff]   ;;  %v11728_v22 = vld [vmem:[#allocation22 + $0x78] sm:$0xff]  }
 0xa39   : > { %v11729_v37 = vld [vmem:[#allocation22 + $0xf8] sm:$0xff]  }
 0xa3b   : > { %8497 = vmatpush1.bf16.msra.mxu0 %v11658_v1  ;;  %8579 = vmatpush1.bf16.msra.mxu1 %v11661_v8  ;;  %v11730_v1 = vld [vmem:[#allocation22 + $0x38] sm:$0xff]  }
 0xa3c   : > { %8498 = vmatprep.subr.bf16.mxu0 %v11666_v18  ;;  %8580 = vmatprep.subr.bf16.mxu1 %v11669_v46  ;;  %v11731_v8 = vld [vmem:[#allocation22 + $0xb8] sm:$0xff]  }
 0xa3d   : > { %v7775_v18 = vld [vmem:[#allocation21] sm:$0xf] }
 0xa3e   : > { %v7780_v46 = vrot.slane %v7775_v18, %v13656_v23 }
 0xa3f   : > { %8499 = vmatpush1.bf16.msra.mxu0 %v11664_v42  ;;  %8581 = vmatpush1.bf16.msra.mxu1 %v11667_v61  ;;  %v7788_v42 = vrot.slane %v7775_v18, %v13659_v20  ;;  %v7784_v61 = vrot.slane %v7775_v18, %v13662_v63 }
 0xa40   : > { %8500 = vmatprep.subr.bf16.mxu0 %v11672_v10  ;;  %8582 = vmatprep.subr.bf16.mxu1 %v11675_v56  ;;  %v7792_v10 = vrot.slane %v7775_v18, %v13665_v55 }
 0xa43   : > { %8501 = vmatpush1.bf16.msra.mxu0 %v11670_v41  ;;  %8583 = vmatpush1.bf16.msra.mxu1 %v11673_v58 }
 0xa44   : > { %8502 = vmatprep.subr.bf16.mxu0 %v11678_v31  ;;  %8584 = vmatprep.subr.bf16.mxu1 %v11681_v33 }
 0xa47   : > { %8503 = vmatpush1.bf16.msra.mxu0 %v11676_v25  ;;  %8585 = vmatpush1.bf16.msra.mxu1 %v11679_v26 }
 0xa48   : > { %8504 = vmatprep.subr.bf16.mxu0 %v11684_v49  ;;  %8586 = vmatprep.subr.bf16.mxu1 %v11687_v27 }
 0xa4b   : > { %8505 = vmatpush1.bf16.msra.mxu0 %v11682_v39  ;;  %8587 = vmatpush1.bf16.msra.mxu1 %v11685_v5 }
 0xa4c   : > { %8506 = vmatprep.subr.bf16.mxu0 %v11690_v19  ;;  %8588 = vmatprep.subr.bf16.mxu1 %v11693_v0 }
 0xa4f   : > { %8507 = vmatpush1.bf16.msra.mxu0 %v11688_v53  ;;  %8589 = vmatpush1.bf16.msra.mxu1 %v11691_v35 }
 0xa50   : > { %8508 = vmatprep.subr.bf16.mxu0 %v11696_v48  ;;  %8590 = vmatprep.subr.bf16.mxu1 %v11699_v34  ;;  %v9899_v34 = vld [vmem:[#allocation24] ss:$0 sm:$0xff] }
 0xa53   : > { %8509 = vmatpush1.bf16.msra.mxu0 %v11694_v13  ;;  %8591 = vmatpush1.bf16.msra.mxu1 %v11697_v59 }
 0xa54   : > { %10342 = vmatprep.subr.bf16.mxu0 %v11700_v7  ;;  %10364 = vmatprep.subr.bf16.mxu1 %v11701_v6 }
 0xa56   : > { %8511 = vmatmul.mubr.bf16.vlgmr.msra.gmra.mrb[120].mxu0 %v7645_v40  ;;  %8593 = vmatmul.mubr.bf16.vlgmr.msra.gmra.mrb[120].mxu1 %v7645_v40 }
 0xa57   : > { %10343 = vmatpush3.bf16.msra.mxu0 %v11702_v43  ;;  %10365 = vmatpush3.bf16.msra.mxu1 %v11703_v50 }
 0xa58   : > { %10344 = vmatprep.subr.bf16.mxu0 %v11704_v4  ;;  %10366 = vmatprep.subr.bf16.mxu1 %v11705_v11 }
 0xa5b   : > { %10345 = vmatpush3.bf16.msra.mxu0 %v11706_v24  ;;  %10367 = vmatpush3.bf16.msra.mxu1 %v11707_v9 }
 0xa5c   : > { %10346 = vmatprep.subr.bf16.mxu0 %v11708_v54  ;;  %10368 = vmatprep.subr.bf16.mxu1 %v11709_v36 }
 0xa5f   : > { %10347 = vmatpush3.bf16.msra.mxu0 %v11710_v16  ;;  %10369 = vmatpush3.bf16.msra.mxu1 %v11711_v45 }
 0xa60   : > { %10348 = vmatprep.subr.bf16.mxu0 %v11712_v3  ;;  %10370 = vmatprep.subr.bf16.mxu1 %v11713_v15 }
 0xa63   : > { %10349 = vmatpush3.bf16.msra.mxu0 %v11714_v57  ;;  %10371 = vmatpush3.bf16.msra.mxu1 %v11715_v60 }
 0xa64   : > { %10350 = vmatprep.subr.bf16.mxu0 %v11716_v12  ;;  %10372 = vmatprep.subr.bf16.mxu1 %v11717_v51 }
 0xa67   : > { %10351 = vmatpush3.bf16.msra.mxu0 %v11718_v47  ;;  %10373 = vmatpush3.bf16.msra.mxu1 %v11719_v44 }
 0xa68   : > { %10352 = vmatprep.subr.bf16.mxu0 %v11720_v29  ;;  %10374 = vmatprep.subr.bf16.mxu1 %v11721_v52 }
 0xa6b   : > { %10353 = vmatpush3.bf16.msra.mxu0 %v11722_v62  ;;  %10375 = vmatpush3.bf16.msra.mxu1 %v11723_v32 }
 0xa6c   : > { %10354 = vmatprep.subr.bf16.mxu0 %v11724_v2  ;;  %10376 = vmatprep.subr.bf16.mxu1 %v11725_v21 }
 0xa6f   : > { %10355 = vmatpush3.bf16.msra.mxu0 %v11726_v28  ;;  %10377 = vmatpush3.bf16.msra.mxu1 %v11727_v14 }
 0xa70   : > { %10356 = vmatprep.subr.bf16.mxu0 %v11728_v22  ;;  %10378 = vmatprep.subr.bf16.mxu1 %v11729_v37 }
 0xa73   : > { %10357 = vmatpush3.bf16.msra.mxu0 %v11730_v1  ;;  %10379 = vmatpush3.bf16.msra.mxu1 %v11731_v8 }
 0xb29   : > { %v8512_v56 = vpop.f32.mrb[120].mxu0  ;;  %v8594_v41 = vpop.f32.mrb[120].mxu1 }
 0xb2a   : > { %v10506_v58 = vadd.f32 %v8512_v56, %v7780_v46  ;;  %v10508_v31 = vadd.f32 %v8594_v41, %v7788_v42  ;;  %v8514_v33 = vpop.f32.mrb[121].mxu0  ;;  %v8596_v25 = vpop.f32.mrb[121].mxu1 }
 0xb2b   : > { %v10507_v26 = vadd.f32 %v8514_v33, %v7784_v61  ;;  %v10509_v49 = vadd.f32 %v8596_v25, %v7792_v10  ;;  %v8516_v27 = vpop.f32.mrb[122].mxu0  ;;  %v8598_v39 = vpop.f32.mrb[122].mxu1 }
 0xb2c   : > { %v8601_v5 = vmax.f32 %v10506_v58, 0.0  ;;  %v8603_v38 = vmax.f32 %v10508_v31, 0.0  ;;  %v8517_v19 = vpop.f32.mrb[123].mxu0  ;;  %v8599_v23 = vpop.f32.mrb[123].mxu1 }
 0xb2d   : > { %v8602_v0 = vmax.f32 %v10507_v26, 0.0  ;;  %v8604_v20 = vmax.f32 %v10509_v49, 0.0 }
 0xb2e   : > { %v8605_v55 = vpack.c.bf16 %v8601_v5, %v8601_v5  ;;  %v8607_v35 = vpack.c.bf16 %v8603_v38, %v8603_v38 }
 0xb2f   : > { %v8606_v63 = vpack.c.bf16 %v8602_v0, %v8602_v0  ;;  %v8608_v53 = vpack.c.bf16 %v8604_v20, %v8604_v20 }
 0xb31   : > { %8904 = vmatprep.mubr.bf16.mxu0 %v8606_v63  ;;  %8944 = vmatprep.mubr.bf16.mxu1 %v8608_v53 }
 0xb32   : > { %8905 = vmatmul.mubr.bf16.vlgmr.msra.gmra.mrb[124].mxu0 %v8605_v55  ;;  %8945 = vmatmul.mubr.bf16.vlgmr.msra.gmra.mrb[124].mxu1 %v8607_v35 }
 0xc05   : > { %v10358_v17 = vpop.f32.mrb[124].mxu0  ;;  %v10380_v48 = vpop.f32.mrb[124].mxu1 }
 0xc06   : > { %v10359_v13 = vpop.f32.mrb[125].mxu0  ;;  %v10381_v59 = vpop.f32.mrb[125].mxu1 }
 0xc07   : > { %v10360_v30 = vadd.f32 %v10359_v13, %v10358_v17  ;;  %v10382_v7 = vadd.f32 %v10381_v59, %v10380_v48  ;;  %v10361_v6 = vpop.f32.mrb[126].mxu0  ;;  %v10383_v43 = vpop.f32.mrb[126].mxu1 }
 0xc08   : > { %v10362_v50 = vpop.f32.mrb[127].mxu0  ;;  %v10384_v40 = vpop.f32.mrb[127].mxu1 }
 0xc09   : > { %v8907_v4 = vadd.f32 %v10360_v30, %v9899_v34 }
 0xc0b   : > { %v8947_v11 = vadd.f32 %v10382_v7, %v8907_v4 }
 0xc0d   : > { %8952 = vst [vmem:[%s723_s24] sm:$0xff] %v8947_v11 }
 0xc0e PF: > { %s13883_s27 = sld [smem:[#allocation33_spill]] }
 0xc14   : > { %s34_s21 = sadd.s32 1, %s13883_s27  }
 0xc15   : > { %p31_p0 = scmp.ge.s32.totalorder %s34_s21, 4  }
 0xc17   :  { %33 = sbr.rel (!%p31_p0) target bundleno = 13 (0xd), region = 175 }
 0xc1e   :  { %8972 = vsyncpa [#allocation3], 1 }
 0xc1f   :  { %8974 = vsyncpa [#allocation3 + $0x1], 1 }
 0xc20   :  { %8975 = vsyncpa [#allocation5], 1 }
 0xc21   :  { %8976 = vsyncpa [#allocation8], 1 }
 0xc22   :  { %8977 = vsyncpa [#allocation11], 1 }
 0xc23   :  { %8978 = vsyncpa [#allocation14], 1 }
 0xc24   :  { %8979 = vsyncpa [#allocation17], 1 }
 0xc25   :  { %8980 = vsyncpa [#allocation20], 1 }
 0xc26   :  { %8981 = vsyncpa [#allocation23], 1 }

</bundles_post_ra>
